<compile_context>
chip_gen: v6e
topology: v6e:2x2x1
jax: 0.10.0
libtpu: 0.0.40
codegen_flags: <defaults>
</compile_context>

<pallas_src>
import jax
import jax.numpy as jnp
from jax.experimental import pallas as pl
from jax.experimental.pallas import tpu as pltpu


def _round_up(x, m):
    return (x + m - 1) // m * m


# ---------------------------------------------------------------------------
# Pallas kernel: (tm, K) @ (K, N) + (1, N), bf16 in, f32 accumulate
# ---------------------------------------------------------------------------

def _matmul_bias_kernel(x_ref, w_ref, b_ref, o_ref):
    acc = jnp.dot(x_ref[...], w_ref[...], preferred_element_type=jnp.float32)
    o_ref[...] = (acc + b_ref[...]).astype(o_ref.dtype)


def matmul_bias(x, w, b, *, out_dtype=jnp.float32):
    """x: (M, K), w: (K, N), b: (N,) -> (M, N) out_dtype.  MXU in bf16."""
    M, K = x.shape
    K2, N = w.shape
    assert K == K2 and b.shape == (N,)

    x = x.astype(jnp.bfloat16)
    w = w.astype(jnp.bfloat16)
    b = b.astype(jnp.float32).reshape(1, N)

    # Pad contraction dim to a multiple of 128 for aligned lane loads
    # (conv1: K = 75 -> 128).  Zero columns x zero weight rows contribute 0.
    Kp = _round_up(K, 128)
    if Kp != K:
        x = jnp.pad(x, ((0, 0), (0, Kp - K)))
        w = jnp.pad(w, ((0, Kp - K), (0, 0)))

    # Row tile: big enough to hide DMA latency, small enough that
    # 2 x (tm, Kp) bf16 buffers + resident weights stay well under the
    # 16/32 MiB scoped-VMEM defaults on v5e / v6e / v7x.
    tm = min(512, _round_up(M, 16))
    Mp = _round_up(M, tm)
    if Mp != M:
        x = jnp.pad(x, ((0, Mp - M), (0, 0)))     # tail rows sliced off below

    flops = 2 * Mp * Kp * N
    bytes_accessed = Mp * Kp * 2 + Kp * N * 2 + N * 4 + Mp * N * jnp.dtype(out_dtype).itemsize

    out = pl.pallas_call(
        _matmul_bias_kernel,
        out_shape=jax.ShapeDtypeStruct((Mp, N), out_dtype),
        grid=(Mp // tm,),
        in_specs=[
            pl.BlockSpec((tm, Kp), lambda i: (i, 0)),   # row tile, pipelined
            pl.BlockSpec((Kp, N), lambda i: (0, 0)),    # weights VMEM-resident
            pl.BlockSpec((1, N), lambda i: (0, 0)),     # bias VMEM-resident
        ],
        out_specs=pl.BlockSpec((tm, N), lambda i: (i, 0)),
        compiler_params=pltpu.CompilerParams(
            dimension_semantics=("parallel",),
            vmem_limit_bytes=32 * 1024 * 1024,
        ),
        cost_estimate=pl.CostEstimate(
            flops=flops, transcendentals=0, bytes_accessed=bytes_accessed),
    )(x, w, b)
    return out[:M] if Mp != M else out


# ---------------------------------------------------------------------------
# Pallas kernel: fused Linear(1024,64) -> Linear(64,10); hidden stays in VMEM
# ---------------------------------------------------------------------------

def _mlp_kernel(x_ref, w1_ref, b1_ref, w2_ref, b2_ref, o_ref):
    h = jnp.dot(x_ref[...], w1_ref[...], preferred_element_type=jnp.float32)
    h = (h + b1_ref[...]).astype(jnp.bfloat16)
    o = jnp.dot(h, w2_ref[...], preferred_element_type=jnp.float32) + b2_ref[...]
    o_ref[...] = o.astype(o_ref.dtype)


def fused_mlp(x, w1, b1, w2, b2):
    """x: (B, 1024) -> (B, 10); both linears in one Pallas call."""
    M, K = x.shape
    N1 = w1.shape[1]
    N2 = w2.shape[1]

    x = x.astype(jnp.bfloat16)
    w1 = w1.astype(jnp.bfloat16)
    w2 = w2.astype(jnp.bfloat16)
    b1 = b1.astype(jnp.float32).reshape(1, N1)
    b2 = b2.astype(jnp.float32).reshape(1, N2)

    tm = min(256, _round_up(M, 16))
    Mp = _round_up(M, tm)
    if Mp != M:
        x = jnp.pad(x, ((0, Mp - M), (0, 0)))

    out = pl.pallas_call(
        _mlp_kernel,
        out_shape=jax.ShapeDtypeStruct((Mp, N2), jnp.float32),
        grid=(Mp // tm,),
        in_specs=[
            pl.BlockSpec((tm, K), lambda i: (i, 0)),
            pl.BlockSpec((K, N1), lambda i: (0, 0)),
            pl.BlockSpec((1, N1), lambda i: (0, 0)),
            pl.BlockSpec((N1, N2), lambda i: (0, 0)),
            pl.BlockSpec((1, N2), lambda i: (0, 0)),
        ],
        out_specs=pl.BlockSpec((tm, N2), lambda i: (i, 0)),
        compiler_params=pltpu.CompilerParams(
            dimension_semantics=("parallel",),
            vmem_limit_bytes=32 * 1024 * 1024,
        ),
        cost_estimate=pl.CostEstimate(
            flops=2 * Mp * K * N1 + 2 * Mp * N1 * N2,
            transcendentals=0,
            bytes_accessed=Mp * K * 2 + K * N1 * 2 + N1 * N2 * 2 + Mp * N2 * 4),
    )(x, w1, b1, w2, b2)
    return out[:M] if Mp != M else out


# ---------------------------------------------------------------------------
# Pallas kernel: MaxPool2d(2) — one pass over a lane-dense (4, rows, lane) view
# ---------------------------------------------------------------------------

def _maxpool4_kernel(x_ref, o_ref):
    # x_ref: (4, tr, lane) — the 4 corners of each 2x2 window, lane-dense.
    o_ref[...] = jnp.maximum(jnp.maximum(x_ref[0], x_ref[1]),
                             jnp.maximum(x_ref[2], x_ref[3]))


def maxpool2x2(x_nhwc):
    """MaxPool2d(kernel=2, stride=2) on NHWC input."""
    B, H, W, C = x_nhwc.shape
    h2, w2 = H // 2, W // 2
    # Single XLA transpose pass: separate the 4 window corners onto the leading
    # axis; the trailing axis is made 128-wide (lane-dense) whenever possible.
    xt = x_nhwc.reshape(B, h2, 2, w2, 2, C).transpose(2, 4, 0, 1, 3, 5)
    total = B * h2 * w2 * C
    lane = 128 if total % 128 == 0 else C
    rows = total // lane
    xt = xt.reshape(4, rows, lane)

    tr = min(1024, _round_up(rows, 16))
    rows_p = _round_up(rows, tr)
    if rows_p != rows:
        xt = jnp.pad(xt, ((0, 0), (0, rows_p - rows), (0, 0)))

    out = pl.pallas_call(
        _maxpool4_kernel,
        out_shape=jax.ShapeDtypeStruct((rows_p, lane), x_nhwc.dtype),
        grid=(rows_p // tr,),
        in_specs=[pl.BlockSpec((4, tr, lane), lambda i: (0, i, 0))],
        out_specs=pl.BlockSpec((tr, lane), lambda i: (i, 0)),
        compiler_params=pltpu.CompilerParams(
            dimension_semantics=("parallel",)),
    )(xt)
    out = out[:rows] if rows_p != rows else out
    return out.reshape(B, h2, w2, C)


# ---------------------------------------------------------------------------
# Conv2d(k=5, stride=1, pad=2) = im2col (bf16 glue) + Pallas matmul kernel
# ---------------------------------------------------------------------------

def conv2d_same(x_nhwc, w_oihw, bias, k=5, pad=2):
    """x: (B,H,W,Cin); w: (Cout,Cin,k,k) PyTorch layout; bias: (Cout,)."""
    B, H, W, Cin = x_nhwc.shape
    Cout = w_oihw.shape[0]
    xp = jnp.pad(x_nhwc, ((0, 0), (pad, pad), (pad, pad), (0, 0)))
    # Patch ordering (dy, dx, cin) matches the weight flattening below.
    patches = [xp[:, dy:dy + H, dx:dx + W, :]
               for dy in range(k) for dx in range(k)]
    p = jnp.stack(patches, axis=3).reshape(B * H * W, k * k * Cin)
    p = p.astype(jnp.bfloat16)          # halve im2col HBM bytes
    # (Cout, Cin, kh, kw) -> (kh, kw, Cin, Cout) -> (kh*kw*Cin, Cout)
    w_flat = jnp.transpose(w_oihw, (2, 3, 1, 0)).reshape(k * k * Cin, Cout)
    y = matmul_bias(p, w_flat, bias, out_dtype=jnp.bfloat16)   # hot path
    return y.reshape(B, H, W, Cout)


# ---------------------------------------------------------------------------
# Parameters (deterministic, PyTorch-style uniform fan-in init)
# ---------------------------------------------------------------------------

def init_params(key):
    ks = jax.random.split(key, 10)

    def conv_init(kw, kb, cout, cin, ksz):
        bound = 1.0 / (cin * ksz * ksz) ** 0.5
        w = jax.random.uniform(kw, (cout, cin, ksz, ksz), jnp.float32, -bound, bound)
        b = jax.random.uniform(kb, (cout,), jnp.float32, -bound, bound)
        return w, b

    def lin_init(kw, kb, fin, fout):
        bound = 1.0 / fin ** 0.5
        w = jax.random.uniform(kw, (fin, fout), jnp.float32, -bound, bound)
        b = jax.random.uniform(kb, (fout,), jnp.float32, -bound, bound)
        return w, b

    p = {}
    p["w1"], p["b1"] = conv_init(ks[0], ks[1], 32, 3, 5)
    p["w2"], p["b2"] = conv_init(ks[2], ks[3], 32, 32, 5)
    p["w3"], p["b3"] = conv_init(ks[4], ks[5], 64, 32, 5)
    p["wl1"], p["bl1"] = lin_init(ks[6], ks[7], 1024, 64)   # PyTorch NCHW-flatten order
    p["wl2"], p["bl2"] = lin_init(ks[8], ks[9], 64, 10)
    return p


def prepare_params(params):
    """One-time re-layout: wl1 from NCHW-flatten (C,H,W) order to NHWC-flatten
    (H,W,C) order so the forward pass can flatten NHWC directly (no transpose)."""
    C, Hf, Wf = 64, 4, 4
    p = dict(params)
    wl1 = params["wl1"].reshape(C, Hf, Wf, -1).transpose(1, 2, 0, 3)
    p["wl1"] = wl1.reshape(C * Hf * Wf, -1)
    return p


# ---------------------------------------------------------------------------
# Full forward pass (mirrors Tudui.forward; expects prepare_params output)
# ---------------------------------------------------------------------------

@jax.jit
def tudui_forward(params, x_nchw):
    B = x_nchw.shape[0]
    x = jnp.transpose(x_nchw, (0, 2, 3, 1))                # NCHW -> NHWC once
    x = conv2d_same(x, params["w1"], params["b1"])         # (B,32,32,32)
    x = maxpool2x2(x)                                      # (B,16,16,32)
    x = conv2d_same(x, params["w2"], params["b2"])         # (B,16,16,32)
    x = maxpool2x2(x)                                      # (B, 8, 8,32)
    x = conv2d_same(x, params["w3"], params["b3"])         # (B, 8, 8,64)
    x = maxpool2x2(x)                                      # (B, 4, 4,64)
    x = x.reshape(B, -1)                                   # NHWC flatten (wl1 pre-permuted)
    x = fused_mlp(x, params["wl1"], params["bl1"],
                  params["wl2"], params["bl2"])            # (B, 10)
    return x


if __name__ == "__main__":
    key = jax.random.PRNGKey(0)
    k_param, k_input = jax.random.split(key)
    params = prepare_params(init_params(k_param))
    # Linear(1024, 64) implies 32x32 spatial input (32 -> 16 -> 8 -> 4; 64*4*4=1024).
    x = jax.random.normal(k_input, (2, 3, 32, 32), dtype=jnp.float32)
    out = tudui_forward(params, x)
    out = jax.block_until_ready(out)
    assert out.shape == (2, 10) and out.dtype == jnp.float32
    assert bool(jnp.all(jnp.isfinite(out)))
    print("KERNEL_OK")
</pallas_src>

<mosaic_0001>
module attributes {stable_mosaic.version = 11 : i64} {
  func.func @_matmul_bias_kernel(%arg0: i32, %arg1: memref<512x128xbf16, #tpu.memory_space<vmem>>, %arg2: memref<128x32xbf16, #tpu.memory_space<vmem>>, %arg3: memref<1x32xf32, #tpu.memory_space<vmem>>, %arg4: memref<512x32xbf16, #tpu.memory_space<vmem>>) attributes {dimension_semantics = [#tpu.dimension_semantics<parallel>], iteration_bounds = array<i64: 4>, scalar_prefetch = 0 : i64, scratch_operands = 0 : i64, tpu.core_type = #tpu.core_type<tc>, window_params = [{transform_indices = @transform_0, window_bounds = array<i64: 512, 128>}, {pipeline_mode = #tpu.pipeline_mode<synchronous>, transform_indices = @transform_1, window_bounds = array<i64: 128, 32>}, {pipeline_mode = #tpu.pipeline_mode<synchronous>, transform_indices = @transform_2, window_bounds = array<i64: 1, 32>}, {transform_indices = @transform_3, window_bounds = array<i64: 512, 32>}]} {
    %c0 = arith.constant 0 : index
    %c0_0 = arith.constant 0 : index
    %0 = vector.load %arg1[%c0, %c0_0] : memref<512x128xbf16, #tpu.memory_space<vmem>>, vector<512x128xbf16>
    %c0_1 = arith.constant 0 : index
    %c0_2 = arith.constant 0 : index
    %1 = vector.load %arg2[%c0_1, %c0_2] : memref<128x32xbf16, #tpu.memory_space<vmem>>, vector<128x32xbf16>
    %cst = arith.constant dense<0.000000e+00> : vector<512x32xf32>
    %2 = tpu.matmul %0, %1, %cst {dimension_numbers = #tpu.dot_dimension_numbers<[1], [0], [0], [1], [0, 0, 1, 1], [], []>} : vector<512x128xbf16>, vector<128x32xbf16>, vector<512x32xf32> -> vector<512x32xf32>
    %c0_3 = arith.constant 0 : index
    %c0_4 = arith.constant 0 : index
    %3 = vector.load %arg3[%c0_3, %c0_4] : memref<1x32xf32, #tpu.memory_space<vmem>>, vector<1x32xf32>
    %4 = vector.broadcast %3 : vector<1x32xf32> to vector<512x32xf32>
    %5 = arith.addf %2, %4 : vector<512x32xf32>
    %6 = arith.truncf %5 : vector<512x32xf32> to vector<512x32xbf16>
    %c0_5 = arith.constant 0 : index
    %c0_6 = arith.constant 0 : index
    %7 = vector.load %arg4[%c0_5, %c0_6] : memref<512x32xbf16, #tpu.memory_space<vmem>>, vector<512x32xbf16>
    tpu.vector_store %arg4[%c0_5, %c0_6], %6 {strides = array<i32>} : memref<512x32xbf16, #tpu.memory_space<vmem>>, vector<512x32xbf16>,
    return
  }
  func.func @transform_0(%arg0: i32) -> (i32, i32) {
    %c0_i32 = arith.constant 0 : i32
    %c0_i32_0 = arith.constant 0 : i32
    return %arg0, %c0_i32 : i32, i32
  }
  func.func @transform_1(%arg0: i32) -> (i32, i32) {
    %c0_i32 = arith.constant 0 : i32
    %c0_i32_0 = arith.constant 0 : i32
    %c0_i32_1 = arith.constant 0 : i32
    return %c0_i32, %c0_i32_0 : i32, i32
  }
  func.func @transform_2(%arg0: i32) -> (i32, i32) {
    %c0_i32 = arith.constant 0 : i32
    %c0_i32_0 = arith.constant 0 : i32
    %c0_i32_1 = arith.constant 0 : i32
    return %c0_i32, %c0_i32_0 : i32, i32
  }
  func.func @transform_3(%arg0: i32) -> (i32, i32) {
    %c0_i32 = arith.constant 0 : i32
    %c0_i32_0 = arith.constant 0 : i32
    return %arg0, %c0_i32 : i32, i32
  }
}

module attributes {stable_mosaic.version = 11 : i64} {
  func.func @_maxpool4_kernel(%arg0: i32, %arg1: memref<4x128x128xbf16, #tpu.memory_space<vmem>>, %arg2: memref<128x128xbf16, #tpu.memory_space<vmem>>) attributes {dimension_semantics = [#tpu.dimension_semantics<parallel>], iteration_bounds = array<i64: 1>, scalar_prefetch = 0 : i64, scratch_operands = 0 : i64, tpu.core_type = #tpu.core_type<tc>, window_params = [{transform_indices = @transform_0, window_bounds = array<i64: 4, 128, 128>}, {transform_indices = @transform_1, window_bounds = array<i64: 128, 128>}]} {
    %c0 = arith.constant 0 : index
    %c0_0 = arith.constant 0 : index
    %c0_1 = arith.constant 0 : index
    %0 = vector.load %arg1[%c0, %c0_0, %c0_1] : memref<4x128x128xbf16, #tpu.memory_space<vmem>>, vector<1x128x128xbf16>
    %1 = vector.shape_cast %0 : vector<1x128x128xbf16> to vector<128x128xbf16>
    %c1 = arith.constant 1 : index
    %c0_2 = arith.constant 0 : index
    %c0_3 = arith.constant 0 : index
    %2 = vector.load %arg1[%c1, %c0_2, %c0_3] : memref<4x128x128xbf16, #tpu.memory_space<vmem>>, vector<1x128x128xbf16>
    %3 = vector.shape_cast %2 : vector<1x128x128xbf16> to vector<128x128xbf16>
    %4 = arith.maximumf %1, %3 : vector<128x128xbf16>
    %c2 = arith.constant 2 : index
    %c0_4 = arith.constant 0 : index
    %c0_5 = arith.constant 0 : index
    %5 = vector.load %arg1[%c2, %c0_4, %c0_5] : memref<4x128x128xbf16, #tpu.memory_space<vmem>>, vector<1x128x128xbf16>
    %6 = vector.shape_cast %5 : vector<1x128x128xbf16> to vector<128x128xbf16>
    %c3 = arith.constant 3 : index
    %c0_6 = arith.constant 0 : index
    %c0_7 = arith.constant 0 : index
    %7 = vector.load %arg1[%c3, %c0_6, %c0_7] : memref<4x128x128xbf16, #tpu.memory_space<vmem>>, vector<1x128x128xbf16>
    %8 = vector.shape_cast %7 : vector<1x128x128xbf16> to vector<128x128xbf16>
    %9 = arith.maximumf %6, %8 : vector<128x128xbf16>
    %10 = arith.maximumf %4, %9 : vector<128x128xbf16>
    %c0_8 = arith.constant 0 : index
    %c0_9 = arith.constant 0 : index
    %11 = vector.load %arg2[%c0_8, %c0_9] : memref<128x128xbf16, #tpu.memory_space<vmem>>, vector<128x128xbf16>
    tpu.vector_store %arg2[%c0_8, %c0_9], %10 {strides = array<i32>} : memref<128x128xbf16, #tpu.memory_space<vmem>>, vector<128x128xbf16>,
    return
  }
  func.func @transform_0(%arg0: i32) -> (i32, i32, i32) {
    %c0_i32 = arith.constant 0 : i32
    %c0_i32_0 = arith.constant 0 : i32
    %c0_i32_1 = arith.constant 0 : i32
    return %c0_i32, %arg0, %c0_i32_0 : i32, i32, i32
  }
  func.func @transform_1(%arg0: i32) -> (i32, i32) {
    %c0_i32 = arith.constant 0 : i32
    %c0_i32_0 = arith.constant 0 : i32
    return %arg0, %c0_i32 : i32, i32
  }
}

module attributes {stable_mosaic.version = 11 : i64} {
  func.func @_matmul_bias_kernel(%arg0: i32, %arg1: memref<512x896xbf16, #tpu.memory_space<vmem>>, %arg2: memref<896x32xbf16, #tpu.memory_space<vmem>>, %arg3: memref<1x32xf32, #tpu.memory_space<vmem>>, %arg4: memref<512x32xbf16, #tpu.memory_space<vmem>>) attributes {dimension_semantics = [#tpu.dimension_semantics<parallel>], iteration_bounds = array<i64: 1>, scalar_prefetch = 0 : i64, scratch_operands = 0 : i64, tpu.core_type = #tpu.core_type<tc>, window_params = [{transform_indices = @transform_0, window_bounds = array<i64: 512, 896>}, {pipeline_mode = #tpu.pipeline_mode<synchronous>, transform_indices = @transform_1, window_bounds = array<i64: 896, 32>}, {pipeline_mode = #tpu.pipeline_mode<synchronous>, transform_indices = @transform_2, window_bounds = array<i64: 1, 32>}, {transform_indices = @transform_3, window_bounds = array<i64: 512, 32>}]} {
    %c0 = arith.constant 0 : index
    %c0_0 = arith.constant 0 : index
    %0 = vector.load %arg1[%c0, %c0_0] : memref<512x896xbf16, #tpu.memory_space<vmem>>, vector<512x896xbf16>
    %c0_1 = arith.constant 0 : index
    %c0_2 = arith.constant 0 : index
    %1 = vector.load %arg2[%c0_1, %c0_2] : memref<896x32xbf16, #tpu.memory_space<vmem>>, vector<896x32xbf16>
    %cst = arith.constant dense<0.000000e+00> : vector<512x32xf32>
    %2 = tpu.matmul %0, %1, %cst {dimension_numbers = #tpu.dot_dimension_numbers<[1], [0], [0], [1], [0, 0, 1, 1], [], []>} : vector<512x896xbf16>, vector<896x32xbf16>, vector<512x32xf32> -> vector<512x32xf32>
    %c0_3 = arith.constant 0 : index
    %c0_4 = arith.constant 0 : index
    %3 = vector.load %arg3[%c0_3, %c0_4] : memref<1x32xf32, #tpu.memory_space<vmem>>, vector<1x32xf32>
    %4 = vector.broadcast %3 : vector<1x32xf32> to vector<512x32xf32>
    %5 = arith.addf %2, %4 : vector<512x32xf32>
    %6 = arith.truncf %5 : vector<512x32xf32> to vector<512x32xbf16>
    %c0_5 = arith.constant 0 : index
    %c0_6 = arith.constant 0 : index
    %7 = vector.load %arg4[%c0_5, %c0_6] : memref<512x32xbf16, #tpu.memory_space<vmem>>, vector<512x32xbf16>
    tpu.vector_store %arg4[%c0_5, %c0_6], %6 {strides = array<i32>} : memref<512x32xbf16, #tpu.memory_space<vmem>>, vector<512x32xbf16>,
    return
  }
  func.func @transform_0(%arg0: i32) -> (i32, i32) {
    %c0_i32 = arith.constant 0 : i32
    %c0_i32_0 = arith.constant 0 : i32
    return %arg0, %c0_i32 : i32, i32
  }
  func.func @transform_1(%arg0: i32) -> (i32, i32) {
    %c0_i32 = arith.constant 0 : i32
    %c0_i32_0 = arith.constant 0 : i32
    %c0_i32_1 = arith.constant 0 : i32
    return %c0_i32, %c0_i32_0 : i32, i32
  }
  func.func @transform_2(%arg0: i32) -> (i32, i32) {
    %c0_i32 = arith.constant 0 : i32
    %c0_i32_0 = arith.constant 0 : i32
    %c0_i32_1 = arith.constant 0 : i32
    return %c0_i32, %c0_i32_0 : i32, i32
  }
  func.func @transform_3(%arg0: i32) -> (i32, i32) {
    %c0_i32 = arith.constant 0 : i32
    %c0_i32_0 = arith.constant 0 : i32
    return %arg0, %c0_i32 : i32, i32
  }
}

module attributes {stable_mosaic.version = 11 : i64} {
  func.func @_maxpool4_kernel(%arg0: i32, %arg1: memref<4x32x128xbf16, #tpu.memory_space<vmem>>, %arg2: memref<32x128xbf16, #tpu.memory_space<vmem>>) attributes {dimension_semantics = [#tpu.dimension_semantics<parallel>], iteration_bounds = array<i64: 1>, scalar_prefetch = 0 : i64, scratch_operands = 0 : i64, tpu.core_type = #tpu.core_type<tc>, window_params = [{transform_indices = @transform_0, window_bounds = array<i64: 4, 32, 128>}, {transform_indices = @transform_1, window_bounds = array<i64: 32, 128>}]} {
    %c0 = arith.constant 0 : index
    %c0_0 = arith.constant 0 : index
    %c0_1 = arith.constant 0 : index
    %0 = vector.load %arg1[%c0, %c0_0, %c0_1] : memref<4x32x128xbf16, #tpu.memory_space<vmem>>, vector<1x32x128xbf16>
    %1 = vector.shape_cast %0 : vector<1x32x128xbf16> to vector<32x128xbf16>
    %c1 = arith.constant 1 : index
    %c0_2 = arith.constant 0 : index
    %c0_3 = arith.constant 0 : index
    %2 = vector.load %arg1[%c1, %c0_2, %c0_3] : memref<4x32x128xbf16, #tpu.memory_space<vmem>>, vector<1x32x128xbf16>
    %3 = vector.shape_cast %2 : vector<1x32x128xbf16> to vector<32x128xbf16>
    %4 = arith.maximumf %1, %3 : vector<32x128xbf16>
    %c2 = arith.constant 2 : index
    %c0_4 = arith.constant 0 : index
    %c0_5 = arith.constant 0 : index
    %5 = vector.load %arg1[%c2, %c0_4, %c0_5] : memref<4x32x128xbf16, #tpu.memory_space<vmem>>, vector<1x32x128xbf16>
    %6 = vector.shape_cast %5 : vector<1x32x128xbf16> to vector<32x128xbf16>
    %c3 = arith.constant 3 : index
    %c0_6 = arith.constant 0 : index
    %c0_7 = arith.constant 0 : index
    %7 = vector.load %arg1[%c3, %c0_6, %c0_7] : memref<4x32x128xbf16, #tpu.memory_space<vmem>>, vector<1x32x128xbf16>
    %8 = vector.shape_cast %7 : vector<1x32x128xbf16> to vector<32x128xbf16>
    %9 = arith.maximumf %6, %8 : vector<32x128xbf16>
    %10 = arith.maximumf %4, %9 : vector<32x128xbf16>
    %c0_8 = arith.constant 0 : index
    %c0_9 = arith.constant 0 : index
    %11 = vector.load %arg2[%c0_8, %c0_9] : memref<32x128xbf16, #tpu.memory_space<vmem>>, vector<32x128xbf16>
    tpu.vector_store %arg2[%c0_8, %c0_9], %10 {strides = array<i32>} : memref<32x128xbf16, #tpu.memory_space<vmem>>, vector<32x128xbf16>,
    return
  }
  func.func @transform_0(%arg0: i32) -> (i32, i32, i32) {
    %c0_i32 = arith.constant 0 : i32
    %c0_i32_0 = arith.constant 0 : i32
    %c0_i32_1 = arith.constant 0 : i32
    return %c0_i32, %arg0, %c0_i32_0 : i32, i32, i32
  }
  func.func @transform_1(%arg0: i32) -> (i32, i32) {
    %c0_i32 = arith.constant 0 : i32
    %c0_i32_0 = arith.constant 0 : i32
    return %arg0, %c0_i32 : i32, i32
  }
}

module attributes {stable_mosaic.version = 11 : i64} {
  func.func @_matmul_bias_kernel(%arg0: i32, %arg1: memref<128x896xbf16, #tpu.memory_space<vmem>>, %arg2: memref<896x64xbf16, #tpu.memory_space<vmem>>, %arg3: memref<1x64xf32, #tpu.memory_space<vmem>>, %arg4: memref<128x64xbf16, #tpu.memory_space<vmem>>) attributes {dimension_semantics = [#tpu.dimension_semantics<parallel>], iteration_bounds = array<i64: 1>, scalar_prefetch = 0 : i64, scratch_operands = 0 : i64, tpu.core_type = #tpu.core_type<tc>, window_params = [{transform_indices = @transform_0, window_bounds = array<i64: 128, 896>}, {pipeline_mode = #tpu.pipeline_mode<synchronous>, transform_indices = @transform_1, window_bounds = array<i64: 896, 64>}, {pipeline_mode = #tpu.pipeline_mode<synchronous>, transform_indices = @transform_2, window_bounds = array<i64: 1, 64>}, {transform_indices = @transform_3, window_bounds = array<i64: 128, 64>}]} {
    %c0 = arith.constant 0 : index
    %c0_0 = arith.constant 0 : index
    %0 = vector.load %arg1[%c0, %c0_0] : memref<128x896xbf16, #tpu.memory_space<vmem>>, vector<128x896xbf16>
    %c0_1 = arith.constant 0 : index
    %c0_2 = arith.constant 0 : index
    %1 = vector.load %arg2[%c0_1, %c0_2] : memref<896x64xbf16, #tpu.memory_space<vmem>>, vector<896x64xbf16>
    %cst = arith.constant dense<0.000000e+00> : vector<128x64xf32>
    %2 = tpu.matmul %0, %1, %cst {dimension_numbers = #tpu.dot_dimension_numbers<[1], [0], [0], [1], [0, 0, 1, 1], [], []>} : vector<128x896xbf16>, vector<896x64xbf16>, vector<128x64xf32> -> vector<128x64xf32>
    %c0_3 = arith.constant 0 : index
    %c0_4 = arith.constant 0 : index
    %3 = vector.load %arg3[%c0_3, %c0_4] : memref<1x64xf32, #tpu.memory_space<vmem>>, vector<1x64xf32>
    %4 = vector.broadcast %3 : vector<1x64xf32> to vector<128x64xf32>
    %5 = arith.addf %2, %4 : vector<128x64xf32>
    %6 = arith.truncf %5 : vector<128x64xf32> to vector<128x64xbf16>
    %c0_5 = arith.constant 0 : index
    %c0_6 = arith.constant 0 : index
    %7 = vector.load %arg4[%c0_5, %c0_6] : memref<128x64xbf16, #tpu.memory_space<vmem>>, vector<128x64xbf16>
    tpu.vector_store %arg4[%c0_5, %c0_6], %6 {strides = array<i32>} : memref<128x64xbf16, #tpu.memory_space<vmem>>, vector<128x64xbf16>,
    return
  }
  func.func @transform_0(%arg0: i32) -> (i32, i32) {
    %c0_i32 = arith.constant 0 : i32
    %c0_i32_0 = arith.constant 0 : i32
    return %arg0, %c0_i32 : i32, i32
  }
  func.func @transform_1(%arg0: i32) -> (i32, i32) {
    %c0_i32 = arith.constant 0 : i32
    %c0_i32_0 = arith.constant 0 : i32
    %c0_i32_1 = arith.constant 0 : i32
    return %c0_i32, %c0_i32_0 : i32, i32
  }
  func.func @transform_2(%arg0: i32) -> (i32, i32) {
    %c0_i32 = arith.constant 0 : i32
    %c0_i32_0 = arith.constant 0 : i32
    %c0_i32_1 = arith.constant 0 : i32
    return %c0_i32, %c0_i32_0 : i32, i32
  }
  func.func @transform_3(%arg0: i32) -> (i32, i32) {
    %c0_i32 = arith.constant 0 : i32
    %c0_i32_0 = arith.constant 0 : i32
    return %arg0, %c0_i32 : i32, i32
  }
}

module attributes {stable_mosaic.version = 11 : i64} {
  func.func @_maxpool4_kernel(%arg0: i32, %arg1: memref<4x16x128xbf16, #tpu.memory_space<vmem>>, %arg2: memref<16x128xbf16, #tpu.memory_space<vmem>>) attributes {dimension_semantics = [#tpu.dimension_semantics<parallel>], iteration_bounds = array<i64: 1>, scalar_prefetch = 0 : i64, scratch_operands = 0 : i64, tpu.core_type = #tpu.core_type<tc>, window_params = [{transform_indices = @transform_0, window_bounds = array<i64: 4, 16, 128>}, {transform_indices = @transform_1, window_bounds = array<i64: 16, 128>}]} {
    %c0 = arith.constant 0 : index
    %c0_0 = arith.constant 0 : index
    %c0_1 = arith.constant 0 : index
    %0 = vector.load %arg1[%c0, %c0_0, %c0_1] : memref<4x16x128xbf16, #tpu.memory_space<vmem>>, vector<1x16x128xbf16>
    %1 = vector.shape_cast %0 : vector<1x16x128xbf16> to vector<16x128xbf16>
    %c1 = arith.constant 1 : index
    %c0_2 = arith.constant 0 : index
    %c0_3 = arith.constant 0 : index
    %2 = vector.load %arg1[%c1, %c0_2, %c0_3] : memref<4x16x128xbf16, #tpu.memory_space<vmem>>, vector<1x16x128xbf16>
    %3 = vector.shape_cast %2 : vector<1x16x128xbf16> to vector<16x128xbf16>
    %4 = arith.maximumf %1, %3 : vector<16x128xbf16>
    %c2 = arith.constant 2 : index
    %c0_4 = arith.constant 0 : index
    %c0_5 = arith.constant 0 : index
    %5 = vector.load %arg1[%c2, %c0_4, %c0_5] : memref<4x16x128xbf16, #tpu.memory_space<vmem>>, vector<1x16x128xbf16>
    %6 = vector.shape_cast %5 : vector<1x16x128xbf16> to vector<16x128xbf16>
    %c3 = arith.constant 3 : index
    %c0_6 = arith.constant 0 : index
    %c0_7 = arith.constant 0 : index
    %7 = vector.load %arg1[%c3, %c0_6, %c0_7] : memref<4x16x128xbf16, #tpu.memory_space<vmem>>, vector<1x16x128xbf16>
    %8 = vector.shape_cast %7 : vector<1x16x128xbf16> to vector<16x128xbf16>
    %9 = arith.maximumf %6, %8 : vector<16x128xbf16>
    %10 = arith.maximumf %4, %9 : vector<16x128xbf16>
    %c0_8 = arith.constant 0 : index
    %c0_9 = arith.constant 0 : index
    %11 = vector.load %arg2[%c0_8, %c0_9] : memref<16x128xbf16, #tpu.memory_space<vmem>>, vector<16x128xbf16>
    tpu.vector_store %arg2[%c0_8, %c0_9], %10 {strides = array<i32>} : memref<16x128xbf16, #tpu.memory_space<vmem>>, vector<16x128xbf16>,
    return
  }
  func.func @transform_0(%arg0: i32) -> (i32, i32, i32) {
    %c0_i32 = arith.constant 0 : i32
    %c0_i32_0 = arith.constant 0 : i32
    %c0_i32_1 = arith.constant 0 : i32
    return %c0_i32, %arg0, %c0_i32_0 : i32, i32, i32
  }
  func.func @transform_1(%arg0: i32) -> (i32, i32) {
    %c0_i32 = arith.constant 0 : i32
    %c0_i32_0 = arith.constant 0 : i32
    return %arg0, %c0_i32 : i32, i32
  }
}

module attributes {stable_mosaic.version = 11 : i64} {
  func.func @_mlp_kernel(%arg0: i32, %arg1: memref<16x1024xbf16, #tpu.memory_space<vmem>>, %arg2: memref<1024x64xbf16, #tpu.memory_space<vmem>>, %arg3: memref<1x64xf32, #tpu.memory_space<vmem>>, %arg4: memref<64x10xbf16, #tpu.memory_space<vmem>>, %arg5: memref<1x10xf32, #tpu.memory_space<vmem>>, %arg6: memref<16x10xf32, #tpu.memory_space<vmem>>) attributes {dimension_semantics = [#tpu.dimension_semantics<parallel>], iteration_bounds = array<i64: 1>, scalar_prefetch = 0 : i64, scratch_operands = 0 : i64, tpu.core_type = #tpu.core_type<tc>, window_params = [{transform_indices = @transform_0, window_bounds = array<i64: 16, 1024>}, {pipeline_mode = #tpu.pipeline_mode<synchronous>, transform_indices = @transform_1, window_bounds = array<i64: 1024, 64>}, {pipeline_mode = #tpu.pipeline_mode<synchronous>, transform_indices = @transform_2, window_bounds = array<i64: 1, 64>}, {pipeline_mode = #tpu.pipeline_mode<synchronous>, transform_indices = @transform_3, window_bounds = array<i64: 64, 10>}, {pipeline_mode = #tpu.pipeline_mode<synchronous>, transform_indices = @transform_4, window_bounds = array<i64: 1, 10>}, {transform_indices = @transform_5, window_bounds = array<i64: 16, 10>}]} {
    %c0 = arith.constant 0 : index
    %c0_0 = arith.constant 0 : index
    %0 = vector.load %arg1[%c0, %c0_0] : memref<16x1024xbf16, #tpu.memory_space<vmem>>, vector<16x1024xbf16>
    %c0_1 = arith.constant 0 : index
    %c0_2 = arith.constant 0 : index
    %1 = vector.load %arg2[%c0_1, %c0_2] : memref<1024x64xbf16, #tpu.memory_space<vmem>>, vector<1024x64xbf16>
    %cst = arith.constant dense<0.000000e+00> : vector<16x64xf32>
    %2 = tpu.matmul %0, %1, %cst {dimension_numbers = #tpu.dot_dimension_numbers<[1], [0], [0], [1], [0, 0, 1, 1], [], []>} : vector<16x1024xbf16>, vector<1024x64xbf16>, vector<16x64xf32> -> vector<16x64xf32>
    %c0_3 = arith.constant 0 : index
    %c0_4 = arith.constant 0 : index
    %3 = vector.load %arg3[%c0_3, %c0_4] : memref<1x64xf32, #tpu.memory_space<vmem>>, vector<1x64xf32>
    %4 = vector.broadcast %3 : vector<1x64xf32> to vector<16x64xf32>
    %5 = arith.addf %2, %4 : vector<16x64xf32>
    %6 = arith.truncf %5 : vector<16x64xf32> to vector<16x64xbf16>
    %c0_5 = arith.constant 0 : index
    %c0_6 = arith.constant 0 : index
    %7 = vector.load %arg4[%c0_5, %c0_6] : memref<64x10xbf16, #tpu.memory_space<vmem>>, vector<64x10xbf16>
    %cst_7 = arith.constant dense<0.000000e+00> : vector<16x10xf32>
    %8 = tpu.matmul %6, %7, %cst_7 {dimension_numbers = #tpu.dot_dimension_numbers<[1], [0], [0], [1], [0, 0, 1, 1], [], []>} : vector<16x64xbf16>, vector<64x10xbf16>, vector<16x10xf32> -> vector<16x10xf32>
    %c0_8 = arith.constant 0 : index
    %c0_9 = arith.constant 0 : index
    %9 = vector.load %arg5[%c0_8, %c0_9] : memref<1x10xf32, #tpu.memory_space<vmem>>, vector<1x10xf32>
    %10 = vector.broadcast %9 : vector<1x10xf32> to vector<16x10xf32>
    %11 = arith.addf %8, %10 : vector<16x10xf32>
    %c0_10 = arith.constant 0 : index
    %c0_11 = arith.constant 0 : index
    %12 = vector.load %arg6[%c0_10, %c0_11] : memref<16x10xf32, #tpu.memory_space<vmem>>, vector<16x10xf32>
    tpu.vector_store %arg6[%c0_10, %c0_11], %11 {strides = array<i32>} : memref<16x10xf32, #tpu.memory_space<vmem>>, vector<16x10xf32>,
    return
  }
  func.func @transform_0(%arg0: i32) -> (i32, i32) {
    %c0_i32 = arith.constant 0 : i32
    %c0_i32_0 = arith.constant 0 : i32
    return %arg0, %c0_i32 : i32, i32
  }
  func.func @transform_1(%arg0: i32) -> (i32, i32) {
    %c0_i32 = arith.constant 0 : i32
    %c0_i32_0 = arith.constant 0 : i32
    %c0_i32_1 = arith.constant 0 : i32
    return %c0_i32, %c0_i32_0 : i32, i32
  }
  func.func @transform_2(%arg0: i32) -> (i32, i32) {
    %c0_i32 = arith.constant 0 : i32
    %c0_i32_0 = arith.constant 0 : i32
    %c0_i32_1 = arith.constant 0 : i32
    return %c0_i32, %c0_i32_0 : i32, i32
  }
  func.func @transform_3(%arg0: i32) -> (i32, i32) {
    %c0_i32 = arith.constant 0 : i32
    %c0_i32_0 = arith.constant 0 : i32
    %c0_i32_1 = arith.constant 0 : i32
    return %c0_i32, %c0_i32_0 : i32, i32
  }
  func.func @transform_4(%arg0: i32) -> (i32, i32) {
    %c0_i32 = arith.constant 0 : i32
    %c0_i32_0 = arith.constant 0 : i32
    %c0_i32_1 = arith.constant 0 : i32
    return %c0_i32, %c0_i32_0 : i32, i32
  }
  func.func @transform_5(%arg0: i32) -> (i32, i32) {
    %c0_i32 = arith.constant 0 : i32
    %c0_i32_0 = arith.constant 0 : i32
    return %arg0, %c0_i32 : i32, i32
  }
}

</mosaic_0001>

<bundles_post_ra>
// kernel: tudui_forward.7
= control target key start
LH: loop header
LB: loop body
LE: loop exit
PB: predicated region body
PF: predicated region fallthrough
CT: control target
= control target key end

     0   :  { %s1560_s12 = smov 0   ;;  %s1841_s0 = inlined_call_operand.vmem [shape: bf16[2048,128], index: 0, kind: input, shape index: {}]   ;;  %s1842_s1 = inlined_call_operand.vmem [shape: bf16[128,32], index: 1, kind: input, shape index: {}]   ;;  %s1843_s2 = inlined_call_operand.vmem [shape: f32[1,32], index: 2, kind: input, shape index: {}]   ;;  %s1844_s3 = inlined_call_operand.vmem [shape: bf16[2048,32], index: 3, kind: output, shape index: {}]  }
   0x1 LB: > { %s1168_s13 = sadd.s32 4294967295, %s1538_s12   ;;  %p1172_p0 = scmp.ge.s32.totalorder %s1538_s12, 1  ;;  %s1538_s12 = sphi %s1560_s12, %s13_s12  }
   0x2   : > { %p138_p1 = scmp.lt.s32.totalorder %s1538_s12, 5 }
   0x4   : > { %p139_p2 = pnand %p1172_p0, %p138_p1 }
   0x5   : > { %s1173_s16 = sshll.u32 (!%p139_p2), %s1168_s13, 6 }
   0x6   : > { %142 = sbr.rel (%p139_p2) target bundleno = 304 (0x130), region = 32  ;;  %p163_p3 = scmp.lt.s32.totalorder (!%p139_p2), %s1173_s16, 255 }
   0xb   : > { %v1492_v0 = vld [vmem:[%s1842_s1 + $0x38] sm:$0xff]   ;;  %v1493_v1 = vld [vmem:[%s1842_s1 + $0x30] sm:$0xff]   ;;  %s1846_s16 = smov (!%p163_p3, %s1173_s16), 255  ;;  %v1494_v2 = vld [vmem:[%s1842_s1 + $0x28] sm:$0xff]   ;;  %vm1047_vm0 = vcmask 257024  }
   0xc   : > { %1388 = vmatprep.subr.bf16.mxu0 %v1492_v0  ;;  %1468 = vmatprep.subr.bf16.mxu1 %v1492_v0  ;;  %s1174_s21 = sshll.u32 %s1846_s16, 2  ;;  %v1495_v3 = vld [vmem:[%s1842_s1 + $0x20] sm:$0xff]   ;;  %v1496_v6 = vld [vmem:[%s1842_s1 + $0x18] sm:$0xff]   ;;  %v1497_v7 = vld [vmem:[%s1842_s1 + $0x10] sm:$0xff]  }
   0xd   : > { %1389 = vmatpush3.bf16.msra.mxu0 %v1492_v0  ;;  %1476 = vmatpush3.bf16.msra.mxu1 %v1492_v0  ;;  %s1585_s24 = scalar_lea.vmem %s1841_s0, %s1174_s21  ;;  %v1498_v8 = vld [vmem:[%s1842_s1 + $0x8] sm:$0xff]   ;;  %v1499_v9 = vld [vmem:[%s1842_s1] sm:$0xff]   ;;  %s1646_s13 = scalar_lea.vmem %s1844_s3, %s1174_s21 }
   0xe   : > { %1390 = vmatprep.subr.bf16.mxu0 %v1493_v1  ;;  %1469 = vmatprep.subr.bf16.mxu1 %v1493_v1  ;;  %v1500_v4 = vld [vmem:[%s1585_s24] sm:$0xff]   ;;  %v1502_v10 = vld [vmem:[%s1585_s24 + $0x8] sm:$0xff]   ;;  %v1504_v12 = vld [vmem:[%s1585_s24 + $0x10] sm:$0xff]  }
   0xf   : > { %v1501_v5 = vld [vmem:[%s1585_s24 + $0x80] sm:$0xff]   ;;  %1404 = vmatprep.mubr.bf16.mxu0 %v1500_v4  ;;  %v1503_v11 = vld [vmem:[%s1585_s24 + $0x88] sm:$0xff]   ;;  %v1505_v13 = vld [vmem:[%s1585_s24 + $0x90] sm:$0xff]  }
  0x10   : > { %1436 = vmatprep.mubr.bf16.mxu1 %v1501_v5  ;;  %v1506_v14 = vld [vmem:[%s1585_s24 + $0x18] sm:$0xff]   ;;  %v1508_v16 = vld [vmem:[%s1585_s24 + $0x20] sm:$0xff]   ;;  %v1510_v18 = vld [vmem:[%s1585_s24 + $0x28] sm:$0xff]  }
  0x11   : > { %1391 = vmatpush3.bf16.msra.mxu0 %v1493_v1  ;;  %1477 = vmatpush3.bf16.msra.mxu1 %v1493_v1  ;;  %v1507_v15 = vld [vmem:[%s1585_s24 + $0x98] sm:$0xff]   ;;  %v1509_v17 = vld [vmem:[%s1585_s24 + $0xa0] sm:$0xff]   ;;  %v1511_v19 = vld [vmem:[%s1585_s24 + $0xa8] sm:$0xff]  }
  0x12   : > { %1392 = vmatprep.subr.bf16.mxu0 %v1494_v2  ;;  %1470 = vmatprep.subr.bf16.mxu1 %v1494_v2  ;;  %v1512_v20 = vld [vmem:[%s1585_s24 + $0x30] sm:$0xff]   ;;  %v1514_v22 = vld [vmem:[%s1585_s24 + $0x38] sm:$0xff]   ;;  %v1516_v24 = vld [vmem:[%s1585_s24 + $0x40] sm:$0xff]  }
  0x13   : > { %v1513_v21 = vld [vmem:[%s1585_s24 + $0xb0] sm:$0xff]   ;;  %v1515_v23 = vld [vmem:[%s1585_s24 + $0xb8] sm:$0xff]   ;;  %v1517_v25 = vld [vmem:[%s1585_s24 + $0xc0] sm:$0xff]  }
  0x14   : > { %v1518_v26 = vld [vmem:[%s1585_s24 + $0x48] sm:$0xff]   ;;  %v1520_v28 = vld [vmem:[%s1585_s24 + $0x50] sm:$0xff]   ;;  %v1522_v30 = vld [vmem:[%s1585_s24 + $0x58] sm:$0xff]  }
  0x15   : > { %1393 = vmatpush3.bf16.msra.mxu0 %v1494_v2  ;;  %1478 = vmatpush3.bf16.msra.mxu1 %v1494_v2  ;;  %v1519_v27 = vld [vmem:[%s1585_s24 + $0xc8] sm:$0xff]   ;;  %v1521_v29 = vld [vmem:[%s1585_s24 + $0xd0] sm:$0xff]   ;;  %v1523_v31 = vld [vmem:[%s1585_s24 + $0xd8] sm:$0xff]  }
  0x16   : > { %1394 = vmatprep.subr.bf16.mxu0 %v1495_v3  ;;  %1471 = vmatprep.subr.bf16.mxu1 %v1495_v3  ;;  %v1524_v32 = vld [vmem:[%s1585_s24 + $0x60] sm:$0xff]   ;;  %v1526_v34 = vld [vmem:[%s1585_s24 + $0x68] sm:$0xff]   ;;  %v1528_v36 = vld [vmem:[%s1585_s24 + $0x70] sm:$0xff]  }
  0x17   : > { %v1525_v33 = vld [vmem:[%s1585_s24 + $0xe0] sm:$0xff]   ;;  %v1527_v35 = vld [vmem:[%s1585_s24 + $0xe8] sm:$0xff]   ;;  %v1529_v37 = vld [vmem:[%s1585_s24 + $0xf0] sm:$0xff]  }
  0x18   : > { %v1530_v38 = vld [vmem:[%s1585_s24 + $0x78] sm:$0xff]   ;;  %v1637_v40 = vld [vmem:[%s1843_s2] ss:$0 sm:$0xff] }
  0x19   : > { %1395 = vmatpush3.bf16.msra.mxu0 %v1495_v3  ;;  %1479 = vmatpush3.bf16.msra.mxu1 %v1495_v3  ;;  %v1531_v39 = vld [vmem:[%s1585_s24 + $0xf8] sm:$0xff]  }
  0x1a   : > { %1396 = vmatprep.subr.bf16.mxu0 %v1496_v6  ;;  %1472 = vmatprep.subr.bf16.mxu1 %v1496_v6 }
  0x1d   : > { %1397 = vmatpush3.bf16.msra.mxu0 %v1496_v6  ;;  %1480 = vmatpush3.bf16.msra.mxu1 %v1496_v6 }
  0x1e   : > { %1398 = vmatprep.subr.bf16.mxu0 %v1497_v7  ;;  %1473 = vmatprep.subr.bf16.mxu1 %v1497_v7 }
  0x21   : > { %1399 = vmatpush3.bf16.msra.mxu0 %v1497_v7  ;;  %1481 = vmatpush3.bf16.msra.mxu1 %v1497_v7 }
  0x22   : > { %1400 = vmatprep.subr.bf16.mxu0 %v1498_v8  ;;  %1474 = vmatprep.subr.bf16.mxu1 %v1498_v8 }
  0x25   : > { %1401 = vmatpush3.bf16.msra.mxu0 %v1498_v8  ;;  %1482 = vmatpush3.bf16.msra.mxu1 %v1498_v8 }
  0x26   : > { %1402 = vmatprep.subr.bf16.mxu0 %v1499_v9  ;;  %1475 = vmatprep.subr.bf16.mxu1 %v1499_v9 }
  0x29   : > { %1403 = vmatpush3.bf16.msra.mxu0 %v1499_v9  ;;  %1483 = vmatpush3.bf16.msra.mxu1 %v1499_v9 }
  0x2c   : > { %1405 = vmatmul.mubr.bf16.vlgmr.msra.gmra.mxu0 %v1502_v10  ;;  %1437 = vmatmul.mubr.bf16.vlgmr.msra.gmra.mxu1 %v1503_v11 }
  0x2d   : > { %1408 = vmatprep.mubr.bf16.mxu0 %v1504_v12  ;;  %1440 = vmatprep.mubr.bf16.mxu1 %v1505_v13 }
  0x34   : > { %1409 = vmatmul.mubr.bf16.gmra.mxu0 %v1506_v14  ;;  %1441 = vmatmul.mubr.bf16.gmra.mxu1 %v1507_v15 }
  0x35   : > { %1412 = vmatprep.mubr.bf16.mxu0 %v1508_v16  ;;  %1444 = vmatprep.mubr.bf16.mxu1 %v1509_v17 }
  0x3c   : > { %1413 = vmatmul.mubr.bf16.gmra.mxu0 %v1510_v18  ;;  %1445 = vmatmul.mubr.bf16.gmra.mxu1 %v1511_v19 }
  0x3d   : > { %1416 = vmatprep.mubr.bf16.mxu0 %v1512_v20  ;;  %1448 = vmatprep.mubr.bf16.mxu1 %v1513_v21 }
  0x44   : > { %1417 = vmatmul.mubr.bf16.gmra.mxu0 %v1514_v22  ;;  %1449 = vmatmul.mubr.bf16.gmra.mxu1 %v1515_v23 }
  0x45   : > { %1420 = vmatprep.mubr.bf16.mxu0 %v1516_v24  ;;  %1452 = vmatprep.mubr.bf16.mxu1 %v1517_v25 }
  0x4c   : > { %1421 = vmatmul.mubr.bf16.gmra.mxu0 %v1518_v26  ;;  %1453 = vmatmul.mubr.bf16.gmra.mxu1 %v1519_v27 }
  0x4d   : > { %1424 = vmatprep.mubr.bf16.mxu0 %v1520_v28  ;;  %1456 = vmatprep.mubr.bf16.mxu1 %v1521_v29 }
  0x54   : > { %1425 = vmatmul.mubr.bf16.gmra.mxu0 %v1522_v30  ;;  %1457 = vmatmul.mubr.bf16.gmra.mxu1 %v1523_v31 }
  0x55   : > { %1428 = vmatprep.mubr.bf16.mxu0 %v1524_v32  ;;  %1460 = vmatprep.mubr.bf16.mxu1 %v1525_v33 }
  0x5c   : > { %1429 = vmatmul.mubr.bf16.gmra.mxu0 %v1526_v34  ;;  %1461 = vmatmul.mubr.bf16.gmra.mxu1 %v1527_v35 }
  0x5d   : > { %1432 = vmatprep.mubr.bf16.mxu0 %v1528_v36  ;;  %1464 = vmatprep.mubr.bf16.mxu1 %v1529_v37 }
  0x64   : > { %1433 = vmatmul.mubr.bf16.gmra.mxu0 %v1530_v38  ;;  %1465 = vmatmul.mubr.bf16.gmra.mxu1 %v1531_v39 }
  0xec   : > { %v1406_v41 = vpop.f32.mrf.mxu0  ;;  %v1438_v42 = vpop.f32.mrf.mxu1 }
  0xed   : > { %v545_v43 = vadd.f32 %v1406_v41, %v1637_v40  ;;  %v673_v44 = vadd.f32 %v1438_v42, %v1637_v40 }
  0xee   : > { %v536_v45 = vpop.f32.mrf.mxu0  ;;  %v664_v46 = vpop.f32.mrf.mxu1 }
  0xef   : > { %v1286_v47 = vpack.c.bf16 %v545_v43, %v545_v43  ;;  %v1318_v48 = vpack.c.bf16 %v673_v44, %v673_v44  ;;  %v537_v49 = vadd.f32 %v1637_v40, %v536_v45  ;;  %v665_v50 = vadd.f32 %v1637_v40, %v664_v46 }
  0xf0   : > { %v1407_v51 = vpop.f32.mrf.mxu0  ;;  %v1439_v52 = vpop.f32.mrf.mxu1 }
  0xf1   : > { %1050 = vst.msk [vmem:[%s1646_s13 + $0x8] sm:$0xf] %vm1047_vm0, %v1286_v47  ;;  %1082 = vst.msk [vmem:[%s1646_s13 + $0x88] sm:$0xf] %vm1047_vm0, %v1318_v48  ;;  %v1284_v53 = vpack.c.bf16 %v537_v49, %v537_v49  ;;  %v1316_v54 = vpack.c.bf16 %v665_v50, %v665_v50  ;;  %v548_v55 = vadd.f32 %v1407_v51, %v1637_v40 }
  0xf2   : > { %v676_v56 = vadd.f32 %v1439_v52, %v1637_v40  ;;  %v539_v57 = vpop.f32.mrf.mxu0  ;;  %v667_v58 = vpop.f32.mrf.mxu1 }
  0xf3   : > { %1048 = vst.msk [vmem:[%s1646_s13] sm:$0xf] %vm1047_vm0, %v1284_v53  ;;  %1080 = vst.msk [vmem:[%s1646_s13 + $0x80] sm:$0xf] %vm1047_vm0, %v1316_v54  ;;  %v1287_v59 = vpack.c.bf16 %v548_v55, %v548_v55  ;;  %v540_v61 = vadd.f32 %v1637_v40, %v539_v57  ;;  %v668_v62 = vadd.f32 %v1637_v40, %v667_v58 }
  0xf4   : > { %v1319_v60 = vpack.c.bf16 %v676_v56, %v676_v56  ;;  %v1410_v63 = vpop.f32.mrf.mxu0  ;;  %v1442_v0 = vpop.f32.mrf.mxu1 }
  0xf5   : > { %1051 = vst.msk [vmem:[%s1646_s13 + $0xc] sm:$0xf] %vm1047_vm0, %v1287_v59  ;;  %v1285_v1 = vpack.c.bf16 %v540_v61, %v540_v61  ;;  %v1317_v2 = vpack.c.bf16 %v668_v62, %v668_v62  ;;  %v561_v3 = vadd.f32 %v1410_v63, %v1637_v40  ;;  %v689_v4 = vadd.f32 %v1442_v0, %v1637_v40 }
  0xf6   : > { %1083 = vst.msk [vmem:[%s1646_s13 + $0x8c] sm:$0xf] %vm1047_vm0, %v1319_v60  ;;  %v552_v5 = vpop.f32.mrf.mxu0  ;;  %v680_v6 = vpop.f32.mrf.mxu1 }
  0xf7   : > { %1049 = vst.msk [vmem:[%s1646_s13 + $0x4] sm:$0xf] %vm1047_vm0, %v1285_v1  ;;  %1081 = vst.msk [vmem:[%s1646_s13 + $0x84] sm:$0xf] %vm1047_vm0, %v1317_v2  ;;  %v1290_v7 = vpack.c.bf16 %v561_v3, %v561_v3  ;;  %v1322_v8 = vpack.c.bf16 %v689_v4, %v689_v4  ;;  %v553_v9 = vadd.f32 %v1637_v40, %v552_v5 }
  0xf8   : > { %v681_v10 = vadd.f32 %v1637_v40, %v680_v6  ;;  %v1411_v11 = vpop.f32.mrf.mxu0  ;;  %v1443_v12 = vpop.f32.mrf.mxu1 }
  0xf9   : > { %1054 = vst.msk [vmem:[%s1646_s13 + $0x18] sm:$0xf] %vm1047_vm0, %v1290_v7  ;;  %1086 = vst.msk [vmem:[%s1646_s13 + $0x98] sm:$0xf] %vm1047_vm0, %v1322_v8  ;;  %v1288_v13 = vpack.c.bf16 %v553_v9, %v553_v9  ;;  %v564_v15 = vadd.f32 %v1411_v11, %v1637_v40  ;;  %v692_v16 = vadd.f32 %v1443_v12, %v1637_v40 }
  0xfa   : > { %v1320_v14 = vpack.c.bf16 %v681_v10, %v681_v10  ;;  %v555_v17 = vpop.f32.mrf.mxu0  ;;  %v683_v18 = vpop.f32.mrf.mxu1 }
  0xfb   : > { %1052 = vst.msk [vmem:[%s1646_s13 + $0x10] sm:$0xf] %vm1047_vm0, %v1288_v13  ;;  %v1291_v19 = vpack.c.bf16 %v564_v15, %v564_v15  ;;  %v1323_v20 = vpack.c.bf16 %v692_v16, %v692_v16  ;;  %v556_v21 = vadd.f32 %v1637_v40, %v555_v17  ;;  %v684_v22 = vadd.f32 %v1637_v40, %v683_v18 }
  0xfc   : > { %1084 = vst.msk [vmem:[%s1646_s13 + $0x90] sm:$0xf] %vm1047_vm0, %v1320_v14  ;;  %v1414_v23 = vpop.f32.mrf.mxu0  ;;  %v1446_v24 = vpop.f32.mrf.mxu1 }
  0xfd   : > { %1055 = vst.msk [vmem:[%s1646_s13 + $0x1c] sm:$0xf] %vm1047_vm0, %v1291_v19  ;;  %1087 = vst.msk [vmem:[%s1646_s13 + $0x9c] sm:$0xf] %vm1047_vm0, %v1323_v20  ;;  %v1289_v25 = vpack.c.bf16 %v556_v21, %v556_v21  ;;  %v1321_v26 = vpack.c.bf16 %v684_v22, %v684_v22  ;;  %v577_v27 = vadd.f32 %v1414_v23, %v1637_v40 }
  0xfe   : > { %v705_v28 = vadd.f32 %v1446_v24, %v1637_v40  ;;  %v568_v29 = vpop.f32.mrf.mxu0  ;;  %v696_v30 = vpop.f32.mrf.mxu1 }
  0xff   : > { %1053 = vst.msk [vmem:[%s1646_s13 + $0x14] sm:$0xf] %vm1047_vm0, %v1289_v25  ;;  %1085 = vst.msk [vmem:[%s1646_s13 + $0x94] sm:$0xf] %vm1047_vm0, %v1321_v26  ;;  %v1294_v31 = vpack.c.bf16 %v577_v27, %v577_v27  ;;  %v569_v33 = vadd.f32 %v1637_v40, %v568_v29  ;;  %v697_v34 = vadd.f32 %v1637_v40, %v696_v30 }
 0x100   : > { %v1326_v32 = vpack.c.bf16 %v705_v28, %v705_v28  ;;  %v1415_v35 = vpop.f32.mrf.mxu0  ;;  %v1447_v36 = vpop.f32.mrf.mxu1 }
 0x101   : > { %1058 = vst.msk [vmem:[%s1646_s13 + $0x28] sm:$0xf] %vm1047_vm0, %v1294_v31  ;;  %v1292_v37 = vpack.c.bf16 %v569_v33, %v569_v33  ;;  %v1324_v38 = vpack.c.bf16 %v697_v34, %v697_v34  ;;  %v580_v39 = vadd.f32 %v1415_v35, %v1637_v40  ;;  %v708_v41 = vadd.f32 %v1447_v36, %v1637_v40 }
 0x102   : > { %1090 = vst.msk [vmem:[%s1646_s13 + $0xa8] sm:$0xf] %vm1047_vm0, %v1326_v32  ;;  %v571_v42 = vpop.f32.mrf.mxu0  ;;  %v699_v43 = vpop.f32.mrf.mxu1 }
 0x103   : > { %1056 = vst.msk [vmem:[%s1646_s13 + $0x20] sm:$0xf] %vm1047_vm0, %v1292_v37  ;;  %1088 = vst.msk [vmem:[%s1646_s13 + $0xa0] sm:$0xf] %vm1047_vm0, %v1324_v38  ;;  %v1295_v44 = vpack.c.bf16 %v580_v39, %v580_v39  ;;  %v1327_v45 = vpack.c.bf16 %v708_v41, %v708_v41  ;;  %v572_v46 = vadd.f32 %v1637_v40, %v571_v42 }
 0x104   : > { %v700_v47 = vadd.f32 %v1637_v40, %v699_v43  ;;  %v1418_v48 = vpop.f32.mrf.mxu0  ;;  %v1450_v49 = vpop.f32.mrf.mxu1 }
 0x105   : > { %1059 = vst.msk [vmem:[%s1646_s13 + $0x2c] sm:$0xf] %vm1047_vm0, %v1295_v44  ;;  %1091 = vst.msk [vmem:[%s1646_s13 + $0xac] sm:$0xf] %vm1047_vm0, %v1327_v45  ;;  %v1293_v50 = vpack.c.bf16 %v572_v46, %v572_v46  ;;  %v593_v52 = vadd.f32 %v1418_v48, %v1637_v40  ;;  %v721_v53 = vadd.f32 %v1450_v49, %v1637_v40 }
 0x106   : > { %v1325_v51 = vpack.c.bf16 %v700_v47, %v700_v47  ;;  %v584_v54 = vpop.f32.mrf.mxu0  ;;  %v712_v55 = vpop.f32.mrf.mxu1 }
 0x107   : > { %1057 = vst.msk [vmem:[%s1646_s13 + $0x24] sm:$0xf] %vm1047_vm0, %v1293_v50  ;;  %v1298_v56 = vpack.c.bf16 %v593_v52, %v593_v52  ;;  %v1330_v57 = vpack.c.bf16 %v721_v53, %v721_v53  ;;  %v585_v58 = vadd.f32 %v1637_v40, %v584_v54  ;;  %v713_v59 = vadd.f32 %v1637_v40, %v712_v55 }
 0x108   : > { %1089 = vst.msk [vmem:[%s1646_s13 + $0xa4] sm:$0xf] %vm1047_vm0, %v1325_v51  ;;  %v1419_v60 = vpop.f32.mrf.mxu0  ;;  %v1451_v61 = vpop.f32.mrf.mxu1 }
 0x109   : > { %1062 = vst.msk [vmem:[%s1646_s13 + $0x38] sm:$0xf] %vm1047_vm0, %v1298_v56  ;;  %1094 = vst.msk [vmem:[%s1646_s13 + $0xb8] sm:$0xf] %vm1047_vm0, %v1330_v57  ;;  %v1296_v62 = vpack.c.bf16 %v585_v58, %v585_v58  ;;  %v1328_v63 = vpack.c.bf16 %v713_v59, %v713_v59  ;;  %v596_v0 = vadd.f32 %v1419_v60, %v1637_v40 }
 0x10a   : > { %v724_v1 = vadd.f32 %v1451_v61, %v1637_v40  ;;  %v587_v2 = vpop.f32.mrf.mxu0  ;;  %v715_v3 = vpop.f32.mrf.mxu1 }
 0x10b   : > { %1060 = vst.msk [vmem:[%s1646_s13 + $0x30] sm:$0xf] %vm1047_vm0, %v1296_v62  ;;  %1092 = vst.msk [vmem:[%s1646_s13 + $0xb0] sm:$0xf] %vm1047_vm0, %v1328_v63  ;;  %v1299_v4 = vpack.c.bf16 %v596_v0, %v596_v0  ;;  %v588_v6 = vadd.f32 %v1637_v40, %v587_v2  ;;  %v716_v7 = vadd.f32 %v1637_v40, %v715_v3 }
 0x10c   : > { %v1331_v5 = vpack.c.bf16 %v724_v1, %v724_v1  ;;  %v1422_v8 = vpop.f32.mrf.mxu0  ;;  %v1454_v9 = vpop.f32.mrf.mxu1 }
 0x10d   : > { %1063 = vst.msk [vmem:[%s1646_s13 + $0x3c] sm:$0xf] %vm1047_vm0, %v1299_v4  ;;  %v1297_v10 = vpack.c.bf16 %v588_v6, %v588_v6  ;;  %v1329_v11 = vpack.c.bf16 %v716_v7, %v716_v7  ;;  %v609_v12 = vadd.f32 %v1422_v8, %v1637_v40  ;;  %v737_v13 = vadd.f32 %v1454_v9, %v1637_v40 }
 0x10e   : > { %1095 = vst.msk [vmem:[%s1646_s13 + $0xbc] sm:$0xf] %vm1047_vm0, %v1331_v5  ;;  %v600_v14 = vpop.f32.mrf.mxu0  ;;  %v728_v15 = vpop.f32.mrf.mxu1 }
 0x10f   : > { %1061 = vst.msk [vmem:[%s1646_s13 + $0x34] sm:$0xf] %vm1047_vm0, %v1297_v10  ;;  %1093 = vst.msk [vmem:[%s1646_s13 + $0xb4] sm:$0xf] %vm1047_vm0, %v1329_v11  ;;  %v1302_v16 = vpack.c.bf16 %v609_v12, %v609_v12  ;;  %v1334_v17 = vpack.c.bf16 %v737_v13, %v737_v13  ;;  %v601_v18 = vadd.f32 %v1637_v40, %v600_v14 }
 0x110   : > { %v729_v19 = vadd.f32 %v1637_v40, %v728_v15  ;;  %v1423_v20 = vpop.f32.mrf.mxu0  ;;  %v1455_v21 = vpop.f32.mrf.mxu1 }
 0x111   : > { %1066 = vst.msk [vmem:[%s1646_s13 + $0x48] sm:$0xf] %vm1047_vm0, %v1302_v16  ;;  %1098 = vst.msk [vmem:[%s1646_s13 + $0xc8] sm:$0xf] %vm1047_vm0, %v1334_v17  ;;  %v1300_v22 = vpack.c.bf16 %v601_v18, %v601_v18  ;;  %v612_v24 = vadd.f32 %v1423_v20, %v1637_v40  ;;  %v740_v25 = vadd.f32 %v1455_v21, %v1637_v40 }
 0x112   : > { %v1332_v23 = vpack.c.bf16 %v729_v19, %v729_v19  ;;  %v603_v26 = vpop.f32.mrf.mxu0  ;;  %v731_v27 = vpop.f32.mrf.mxu1 }
 0x113   : > { %1064 = vst.msk [vmem:[%s1646_s13 + $0x40] sm:$0xf] %vm1047_vm0, %v1300_v22  ;;  %v1303_v28 = vpack.c.bf16 %v612_v24, %v612_v24  ;;  %v1335_v29 = vpack.c.bf16 %v740_v25, %v740_v25  ;;  %v604_v30 = vadd.f32 %v1637_v40, %v603_v26  ;;  %v732_v31 = vadd.f32 %v1637_v40, %v731_v27 }
 0x114   : > { %1096 = vst.msk [vmem:[%s1646_s13 + $0xc0] sm:$0xf] %vm1047_vm0, %v1332_v23  ;;  %v1426_v32 = vpop.f32.mrf.mxu0  ;;  %v1458_v33 = vpop.f32.mrf.mxu1 }
 0x115   : > { %1067 = vst.msk [vmem:[%s1646_s13 + $0x4c] sm:$0xf] %vm1047_vm0, %v1303_v28  ;;  %1099 = vst.msk [vmem:[%s1646_s13 + $0xcc] sm:$0xf] %vm1047_vm0, %v1335_v29  ;;  %v1301_v34 = vpack.c.bf16 %v604_v30, %v604_v30  ;;  %v1333_v35 = vpack.c.bf16 %v732_v31, %v732_v31  ;;  %v625_v36 = vadd.f32 %v1426_v32, %v1637_v40 }
 0x116   : > { %v753_v37 = vadd.f32 %v1458_v33, %v1637_v40  ;;  %v616_v38 = vpop.f32.mrf.mxu0  ;;  %v744_v39 = vpop.f32.mrf.mxu1 }
 0x117   : > { %1065 = vst.msk [vmem:[%s1646_s13 + $0x44] sm:$0xf] %vm1047_vm0, %v1301_v34  ;;  %1097 = vst.msk [vmem:[%s1646_s13 + $0xc4] sm:$0xf] %vm1047_vm0, %v1333_v35  ;;  %v1306_v41 = vpack.c.bf16 %v625_v36, %v625_v36  ;;  %v617_v43 = vadd.f32 %v1637_v40, %v616_v38  ;;  %v745_v44 = vadd.f32 %v1637_v40, %v744_v39 }
 0x118   : > { %v1338_v42 = vpack.c.bf16 %v753_v37, %v753_v37  ;;  %v1427_v45 = vpop.f32.mrf.mxu0  ;;  %v1459_v46 = vpop.f32.mrf.mxu1 }
 0x119   : > { %1070 = vst.msk [vmem:[%s1646_s13 + $0x58] sm:$0xf] %vm1047_vm0, %v1306_v41  ;;  %v1304_v47 = vpack.c.bf16 %v617_v43, %v617_v43  ;;  %v1336_v48 = vpack.c.bf16 %v745_v44, %v745_v44  ;;  %v628_v49 = vadd.f32 %v1427_v45, %v1637_v40  ;;  %v756_v50 = vadd.f32 %v1459_v46, %v1637_v40 }
 0x11a   : > { %1102 = vst.msk [vmem:[%s1646_s13 + $0xd8] sm:$0xf] %vm1047_vm0, %v1338_v42  ;;  %v619_v51 = vpop.f32.mrf.mxu0  ;;  %v747_v52 = vpop.f32.mrf.mxu1 }
 0x11b   : > { %1068 = vst.msk [vmem:[%s1646_s13 + $0x50] sm:$0xf] %vm1047_vm0, %v1304_v47  ;;  %1100 = vst.msk [vmem:[%s1646_s13 + $0xd0] sm:$0xf] %vm1047_vm0, %v1336_v48  ;;  %v1307_v53 = vpack.c.bf16 %v628_v49, %v628_v49  ;;  %v1339_v54 = vpack.c.bf16 %v756_v50, %v756_v50  ;;  %v620_v55 = vadd.f32 %v1637_v40, %v619_v51 }
 0x11c   : > { %v748_v56 = vadd.f32 %v1637_v40, %v747_v52  ;;  %v1430_v57 = vpop.f32.mrf.mxu0  ;;  %v1462_v58 = vpop.f32.mrf.mxu1 }
 0x11d   : > { %1071 = vst.msk [vmem:[%s1646_s13 + $0x5c] sm:$0xf] %vm1047_vm0, %v1307_v53  ;;  %1103 = vst.msk [vmem:[%s1646_s13 + $0xdc] sm:$0xf] %vm1047_vm0, %v1339_v54  ;;  %v1305_v59 = vpack.c.bf16 %v620_v55, %v620_v55  ;;  %v641_v61 = vadd.f32 %v1430_v57, %v1637_v40  ;;  %v769_v62 = vadd.f32 %v1462_v58, %v1637_v40 }
 0x11e   : > { %v1337_v60 = vpack.c.bf16 %v748_v56, %v748_v56  ;;  %v632_v63 = vpop.f32.mrf.mxu0  ;;  %v760_v0 = vpop.f32.mrf.mxu1 }
 0x11f   : > { %1069 = vst.msk [vmem:[%s1646_s13 + $0x54] sm:$0xf] %vm1047_vm0, %v1305_v59  ;;  %v1310_v1 = vpack.c.bf16 %v641_v61, %v641_v61  ;;  %v1342_v2 = vpack.c.bf16 %v769_v62, %v769_v62  ;;  %v633_v3 = vadd.f32 %v1637_v40, %v632_v63  ;;  %v761_v4 = vadd.f32 %v1637_v40, %v760_v0 }
 0x120   : > { %1101 = vst.msk [vmem:[%s1646_s13 + $0xd4] sm:$0xf] %vm1047_vm0, %v1337_v60  ;;  %v1431_v5 = vpop.f32.mrf.mxu0  ;;  %v1463_v6 = vpop.f32.mrf.mxu1 }
 0x121   : > { %1074 = vst.msk [vmem:[%s1646_s13 + $0x68] sm:$0xf] %vm1047_vm0, %v1310_v1  ;;  %1106 = vst.msk [vmem:[%s1646_s13 + $0xe8] sm:$0xf] %vm1047_vm0, %v1342_v2  ;;  %v1308_v7 = vpack.c.bf16 %v633_v3, %v633_v3  ;;  %v1340_v8 = vpack.c.bf16 %v761_v4, %v761_v4  ;;  %v644_v9 = vadd.f32 %v1431_v5, %v1637_v40 }
 0x122   : > { %v772_v10 = vadd.f32 %v1463_v6, %v1637_v40  ;;  %v635_v11 = vpop.f32.mrf.mxu0  ;;  %v763_v12 = vpop.f32.mrf.mxu1 }
 0x123   : > { %1072 = vst.msk [vmem:[%s1646_s13 + $0x60] sm:$0xf] %vm1047_vm0, %v1308_v7  ;;  %1104 = vst.msk [vmem:[%s1646_s13 + $0xe0] sm:$0xf] %vm1047_vm0, %v1340_v8  ;;  %v1311_v13 = vpack.c.bf16 %v644_v9, %v644_v9  ;;  %v636_v15 = vadd.f32 %v1637_v40, %v635_v11  ;;  %v764_v16 = vadd.f32 %v1637_v40, %v763_v12 }
 0x124   : > { %v1343_v14 = vpack.c.bf16 %v772_v10, %v772_v10  ;;  %v1434_v17 = vpop.f32.mrf.mxu0  ;;  %v1466_v18 = vpop.f32.mrf.mxu1 }
 0x125   : > { %1075 = vst.msk [vmem:[%s1646_s13 + $0x6c] sm:$0xf] %vm1047_vm0, %v1311_v13  ;;  %v1309_v19 = vpack.c.bf16 %v636_v15, %v636_v15  ;;  %v1341_v20 = vpack.c.bf16 %v764_v16, %v764_v16  ;;  %v657_v21 = vadd.f32 %v1434_v17, %v1637_v40  ;;  %v785_v22 = vadd.f32 %v1466_v18, %v1637_v40 }
 0x126   : > { %1107 = vst.msk [vmem:[%s1646_s13 + $0xec] sm:$0xf] %vm1047_vm0, %v1343_v14  ;;  %v648_v23 = vpop.f32.mrf.mxu0  ;;  %v776_v24 = vpop.f32.mrf.mxu1 }
 0x127   : > { %1073 = vst.msk [vmem:[%s1646_s13 + $0x64] sm:$0xf] %vm1047_vm0, %v1309_v19  ;;  %1105 = vst.msk [vmem:[%s1646_s13 + $0xe4] sm:$0xf] %vm1047_vm0, %v1341_v20  ;;  %v1314_v25 = vpack.c.bf16 %v657_v21, %v657_v21  ;;  %v1346_v26 = vpack.c.bf16 %v785_v22, %v785_v22  ;;  %v649_v27 = vadd.f32 %v1637_v40, %v648_v23 }
 0x128   : > { %v777_v28 = vadd.f32 %v1637_v40, %v776_v24  ;;  %v1435_v29 = vpop.f32.mrf.mxu0  ;;  %v1467_v30 = vpop.f32.mrf.mxu1 }
 0x129   : > { %1078 = vst.msk [vmem:[%s1646_s13 + $0x78] sm:$0xf] %vm1047_vm0, %v1314_v25  ;;  %1110 = vst.msk [vmem:[%s1646_s13 + $0xf8] sm:$0xf] %vm1047_vm0, %v1346_v26  ;;  %v1312_v31 = vpack.c.bf16 %v649_v27, %v649_v27  ;;  %v660_v33 = vadd.f32 %v1435_v29, %v1637_v40  ;;  %v788_v34 = vadd.f32 %v1467_v30, %v1637_v40 }
 0x12a   : > { %v1344_v32 = vpack.c.bf16 %v777_v28, %v777_v28  ;;  %v651_v35 = vpop.f32.mrf.mxu0  ;;  %v779_v36 = vpop.f32.mrf.mxu1 }
 0x12b   : > { %1076 = vst.msk [vmem:[%s1646_s13 + $0x70] sm:$0xf] %vm1047_vm0, %v1312_v31  ;;  %v1315_v37 = vpack.c.bf16 %v660_v33, %v660_v33  ;;  %v1347_v38 = vpack.c.bf16 %v788_v34, %v788_v34  ;;  %v652_v39 = vadd.f32 %v1637_v40, %v651_v35  ;;  %v780_v41 = vadd.f32 %v1637_v40, %v779_v36 }
 0x12c   : > { %1108 = vst.msk [vmem:[%s1646_s13 + $0xf0] sm:$0xf] %vm1047_vm0, %v1344_v32 }
 0x12d   : > { %1079 = vst.msk [vmem:[%s1646_s13 + $0x7c] sm:$0xf] %vm1047_vm0, %v1315_v37  ;;  %1111 = vst.msk [vmem:[%s1646_s13 + $0xfc] sm:$0xf] %vm1047_vm0, %v1347_v38  ;;  %v1313_v42 = vpack.c.bf16 %v652_v39, %v652_v39  ;;  %v1345_v43 = vpack.c.bf16 %v780_v41, %v780_v41 }
 0x12f   : > { %1077 = vst.msk [vmem:[%s1646_s13 + $0x74] sm:$0xf] %vm1047_vm0, %v1313_v42  ;;  %1109 = vst.msk [vmem:[%s1646_s13 + $0xf4] sm:$0xf] %vm1047_vm0, %v1345_v43 }
 0x130 PF: > { %s13_s12 = sadd.s32 1, %s1538_s12  }
 0x131   : > { %p10_p4 = scmp.ge.s32.totalorder %s13_s12, 6  }
 0x133   :  { %12 = sbr.rel (!%p10_p4) target bundleno = 1 (0x1), region = 62 }

// kernel: tudui_forward.8
= control target key start
LH: loop header
LB: loop body
LE: loop exit
PB: predicated region body
PF: predicated region fallthrough
CT: control target
= control target key end

     0   :  { %s472_s0 = inlined_call_operand.vmem [shape: bf16[4,128,128], index: 0, kind: input, shape index: {}]   ;;  %s473_s1 = inlined_call_operand.vmem [shape: bf16[128,128], index: 1, kind: output, shape index: {}]  }
   0x1   :  { %v8_v0 = vld [vmem:[%s472_s0] sm:$0xf]  ;;  %v9_v1 = vld [vmem:[%s472_s0 + $0x4] sm:$0xf]  ;;  %v10_v10 = vld [vmem:[%s472_s0 + $0x8] sm:$0xf] }
   0x2   :  { %v143_v2 = vld [vmem:[%s472_s0 + $0x40] sm:$0xf]  ;;  %v144_v3 = vld [vmem:[%s472_s0 + $0x44] sm:$0xf]  ;;  %v11_v13 = vld [vmem:[%s472_s0 + $0xc] sm:$0xf] }
   0x3   :  { %v41_v4 = vmax.bf16 %v143_v2, %v8_v0  ;;  %v159_v5 = vld [vmem:[%s472_s0 + $0x80] sm:$0xf]  ;;  %v160_v6 = vld [vmem:[%s472_s0 + $0x84] sm:$0xf]  ;;  %v42_v7 = vmax.bf16 %v144_v3, %v9_v1  ;;  %v145_v14 = vld [vmem:[%s472_s0 + $0x48] sm:$0xf] }
   0x4   :  { %v175_v8 = vld [vmem:[%s472_s0 + $0xc0] sm:$0xf]  ;;  %v176_v9 = vld [vmem:[%s472_s0 + $0xc4] sm:$0xf]  ;;  %v146_v15 = vld [vmem:[%s472_s0 + $0x4c] sm:$0xf]  ;;  %v43_v16 = vmax.bf16 %v145_v14, %v10_v10 }
   0x5   :  { %v91_v11 = vmax.bf16 %v175_v8, %v159_v5  ;;  %v92_v12 = vmax.bf16 %v176_v9, %v160_v6  ;;  %v44_v17 = vmax.bf16 %v146_v15, %v11_v13  ;;  %v161_v18 = vld [vmem:[%s472_s0 + $0x88] sm:$0xf]  ;;  %v162_v19 = vld [vmem:[%s472_s0 + $0x8c] sm:$0xf]  ;;  %v12_v25 = vld [vmem:[%s472_s0 + $0x10] sm:$0xf] }
   0x6   :  { %v177_v20 = vld [vmem:[%s472_s0 + $0xc8] sm:$0xf]  ;;  %v178_v23 = vld [vmem:[%s472_s0 + $0xcc] sm:$0xf]  ;;  %v13_v26 = vld [vmem:[%s472_s0 + $0x14] sm:$0xf] }
   0x7   :  { %v107_v21 = vmax.bf16 %v91_v11, %v41_v4  ;;  %v108_v22 = vmax.bf16 %v92_v12, %v42_v7  ;;  %v93_v24 = vmax.bf16 %v177_v20, %v161_v18  ;;  %v94_v27 = vmax.bf16 %v178_v23, %v162_v19  ;;  %v147_v28 = vld [vmem:[%s472_s0 + $0x50] sm:$0xf]  ;;  %v148_v29 = vld [vmem:[%s472_s0 + $0x54] sm:$0xf]  ;;  %v14_v41 = vld [vmem:[%s472_s0 + $0x18] sm:$0xf] }
   0x8   :  { %v163_v30 = vld [vmem:[%s472_s0 + $0x90] sm:$0xf]  ;;  %v45_v33 = vmax.bf16 %v147_v28, %v12_v25  ;;  %v46_v34 = vmax.bf16 %v148_v29, %v13_v26  ;;  %v164_v35 = vld [vmem:[%s472_s0 + $0x94] sm:$0xf]  ;;  %v15_v42 = vld [vmem:[%s472_s0 + $0x1c] sm:$0xf] }
   0x9   :  { %v231_v31 = vcombine.low %v107_v21, %v108_v22  ;;  %v109_v32 = vmax.bf16 %v93_v24, %v43_v16  ;;  %v179_v36 = vld [vmem:[%s472_s0 + $0xd0] sm:$0xf]  ;;  %v180_v37 = vld [vmem:[%s472_s0 + $0xd4] sm:$0xf]  ;;  %v110_v38 = vmax.bf16 %v94_v27, %v44_v17  ;;  %v149_v43 = vld [vmem:[%s472_s0 + $0x58] sm:$0xf] }
   0xa   :  { %v95_v39 = vmax.bf16 %v179_v36, %v163_v30  ;;  %v96_v40 = vmax.bf16 %v180_v37, %v164_v35  ;;  %v150_v44 = vld [vmem:[%s472_s0 + $0x5c] sm:$0xf]  ;;  %v47_v45 = vmax.bf16 %v149_v43, %v14_v41  ;;  %v165_v46 = vld [vmem:[%s472_s0 + $0x98] sm:$0xf]  ;;  %v16_v54 = vld [vmem:[%s472_s0 + $0x20] sm:$0xf] }
   0xb   :  { %195 = vst [vmem:[%s473_s1] sm:$0xff] %v231_v31   ;;  %v166_v47 = vld [vmem:[%s472_s0 + $0x9c] sm:$0xf]  ;;  %v232_v48 = vcombine.low %v109_v32, %v110_v38  ;;  %v48_v51 = vmax.bf16 %v150_v44, %v15_v42  ;;  %v181_v52 = vld [vmem:[%s472_s0 + $0xd8] sm:$0xf]  ;;  %v17_v57 = vld [vmem:[%s472_s0 + $0x24] sm:$0xf] }
   0xc   :  { %v111_v49 = vmax.bf16 %v95_v39, %v45_v33  ;;  %v112_v50 = vmax.bf16 %v96_v40, %v46_v34  ;;  %v182_v53 = vld [vmem:[%s472_s0 + $0xdc] sm:$0xf]  ;;  %v97_v55 = vmax.bf16 %v181_v52, %v165_v46  ;;  %v151_v58 = vld [vmem:[%s472_s0 + $0x60] sm:$0xf]  ;;  %v152_v59 = vld [vmem:[%s472_s0 + $0x64] sm:$0xf] }
   0xd   :  { %v98_v56 = vmax.bf16 %v182_v53, %v166_v47  ;;  %233 = vst [vmem:[%s473_s1 + $0x8] sm:$0xff] %v232_v48   ;;  %v49_v61 = vmax.bf16 %v151_v58, %v16_v54  ;;  %v50_v62 = vmax.bf16 %v152_v59, %v17_v57  ;;  %v167_v63 = vld [vmem:[%s472_s0 + $0xa0] sm:$0xf]  ;;  %v168_v0 = vld [vmem:[%s472_s0 + $0xa4] sm:$0xf] }
   0xe   :  { %v234_v60 = vcombine.low %v111_v49, %v112_v50  ;;  %v183_v1 = vld [vmem:[%s472_s0 + $0xe0] sm:$0xf]  ;;  %v113_v2 = vmax.bf16 %v97_v55, %v47_v45  ;;  %v184_v4 = vld [vmem:[%s472_s0 + $0xe4] sm:$0xf]  ;;  %v18_v6 = vld [vmem:[%s472_s0 + $0x28] sm:$0xf] }
   0xf   :  { %v114_v3 = vmax.bf16 %v98_v56, %v48_v51  ;;  %v99_v5 = vmax.bf16 %v183_v1, %v167_v63  ;;  %v19_v7 = vld [vmem:[%s472_s0 + $0x2c] sm:$0xf]  ;;  %v100_v8 = vmax.bf16 %v184_v4, %v168_v0  ;;  %v153_v9 = vld [vmem:[%s472_s0 + $0x68] sm:$0xf]  ;;  %v20_v22 = vld [vmem:[%s472_s0 + $0x30] sm:$0xf] }
  0x10   :  { %235 = vst [vmem:[%s473_s1 + $0x10] sm:$0xff] %v234_v60   ;;  %v154_v10 = vld [vmem:[%s472_s0 + $0x6c] sm:$0xf]  ;;  %v169_v11 = vld [vmem:[%s472_s0 + $0xa8] sm:$0xf]  ;;  %v51_v14 = vmax.bf16 %v153_v9, %v18_v6 }
  0x11   :  { %v236_v12 = vcombine.low %v113_v2, %v114_v3  ;;  %v115_v13 = vmax.bf16 %v99_v5, %v49_v61  ;;  %v52_v15 = vmax.bf16 %v154_v10, %v19_v7  ;;  %v170_v16 = vld [vmem:[%s472_s0 + $0xac] sm:$0xf]  ;;  %v185_v17 = vld [vmem:[%s472_s0 + $0xe8] sm:$0xf]  ;;  %v116_v19 = vmax.bf16 %v100_v8, %v50_v62  ;;  %v21_v23 = vld [vmem:[%s472_s0 + $0x34] sm:$0xf] }
  0x12   :  { %v186_v18 = vld [vmem:[%s472_s0 + $0xec] sm:$0xf]  ;;  %v101_v20 = vmax.bf16 %v185_v17, %v169_v11  ;;  %v155_v24 = vld [vmem:[%s472_s0 + $0x70] sm:$0xf]  ;;  %v156_v25 = vld [vmem:[%s472_s0 + $0x74] sm:$0xf] }
  0x13   :  { %v102_v21 = vmax.bf16 %v186_v18, %v170_v16  ;;  %237 = vst [vmem:[%s473_s1 + $0x18] sm:$0xff] %v236_v12   ;;  %v53_v26 = vmax.bf16 %v155_v24, %v20_v22  ;;  %v171_v27 = vld [vmem:[%s472_s0 + $0xb0] sm:$0xf]  ;;  %v172_v28 = vld [vmem:[%s472_s0 + $0xb4] sm:$0xf]  ;;  %v238_v29 = vcombine.low %v115_v13, %v116_v19  ;;  %v54_v32 = vmax.bf16 %v156_v25, %v21_v23 }
  0x14   :  { %v117_v30 = vmax.bf16 %v101_v20, %v51_v14  ;;  %v187_v33 = vld [vmem:[%s472_s0 + $0xf0] sm:$0xf]  ;;  %v188_v34 = vld [vmem:[%s472_s0 + $0xf4] sm:$0xf]  ;;  %v22_v35 = vld [vmem:[%s472_s0 + $0x38] sm:$0xf] }
  0x15   :  { %v118_v31 = vmax.bf16 %v102_v21, %v52_v15  ;;  %v103_v36 = vmax.bf16 %v187_v33, %v171_v27  ;;  %v104_v37 = vmax.bf16 %v188_v34, %v172_v28  ;;  %v23_v38 = vld [vmem:[%s472_s0 + $0x3c] sm:$0xf]  ;;  %v157_v39 = vld [vmem:[%s472_s0 + $0x78] sm:$0xf]  ;;  %239 = vst [vmem:[%s473_s1 + $0x20] sm:$0xff] %v238_v29  }
  0x16   :  { %v158_v40 = vld [vmem:[%s472_s0 + $0x7c] sm:$0xf]  ;;  %v55_v42 = vmax.bf16 %v157_v39, %v22_v35  ;;  %v173_v44 = vld [vmem:[%s472_s0 + $0xb8] sm:$0xf] }
  0x17   :  { %v240_v41 = vcombine.low %v117_v30, %v118_v31  ;;  %v56_v43 = vmax.bf16 %v158_v40, %v23_v38  ;;  %v174_v45 = vld [vmem:[%s472_s0 + $0xbc] sm:$0xf]  ;;  %v189_v46 = vld [vmem:[%s472_s0 + $0xf8] sm:$0xf]  ;;  %v119_v47 = vmax.bf16 %v103_v36, %v53_v26  ;;  %v120_v48 = vmax.bf16 %v104_v37, %v54_v32 }
  0x18   :  { %v190_v49 = vld [vmem:[%s472_s0 + $0xfc] sm:$0xf]  ;;  %v105_v50 = vmax.bf16 %v189_v46, %v173_v44 }
  0x19   :  { %241 = vst [vmem:[%s473_s1 + $0x28] sm:$0xff] %v240_v41   ;;  %v106_v51 = vmax.bf16 %v190_v49, %v174_v45  ;;  %v242_v52 = vcombine.low %v119_v47, %v120_v48 }
  0x1a   :  { %v121_v53 = vmax.bf16 %v105_v50, %v55_v42 }
  0x1b   :  { %v122_v54 = vmax.bf16 %v106_v51, %v56_v43  ;;  %243 = vst [vmem:[%s473_s1 + $0x30] sm:$0xff] %v242_v52  }
  0x1d   :  { %v244_v55 = vcombine.low %v121_v53, %v122_v54 }
  0x1f   :  { %245 = vst [vmem:[%s473_s1 + $0x38] sm:$0xff] %v244_v55  }

// kernel: tudui_forward.9
= control target key start
LH: loop header
LB: loop body
LE: loop exit
PB: predicated region body
PF: predicated region fallthrough
CT: control target
= control target key end

     0   :  { %v4298_v0 = vmov 0   ;;  %vm3290_vm0 = vcmask 257024   ;;  %s6099_s1 = inlined_call_operand.vmem [shape: bf16[896,32], index: 1, kind: input, shape index: {}]   ;;  %s6100_s0 = inlined_call_operand.vmem [shape: bf16[512,896], index: 0, kind: input, shape index: {}]   ;;  %s6101_s2 = inlined_call_operand.vmem [shape: f32[1,32], index: 2, kind: input, shape index: {}]   ;;  %s6102_s3 = inlined_call_operand.vmem [shape: bf16[512,32], index: 3, kind: output, shape index: {}]  }
   0x1   :  { %1878 = vmatprep.subr.bf16.mxu0 %v4298_v0  ;;  %3888 = vmatprep.subr.bf16.mxu1 %v4298_v0  ;;  %v3921_v1 = vld [vmem:[%s6099_s1 + $0x38] sm:$0xff]   ;;  %v3922_v2 = vld [vmem:[%s6099_s1 + $0x30] sm:$0xff]   ;;  %v3923_v3 = vld [vmem:[%s6099_s1 + $0x28] sm:$0xff]  }
   0x2   :  { %1879 = vmatpush1.bf16.msra.mxu0 %v3921_v1  ;;  %3904 = vmatpush1.bf16.msra.mxu1 %v3921_v1  ;;  %v3924_v4 = vld [vmem:[%s6099_s1 + $0x20] sm:$0xff]   ;;  %v3925_v5 = vld [vmem:[%s6099_s1 + $0x18] sm:$0xff]   ;;  %v3926_v7 = vld [vmem:[%s6099_s1 + $0x10] sm:$0xff]  }
   0x3   :  { %1880 = vmatprep.subr.bf16.mxu0 %v4298_v0  ;;  %3889 = vmatprep.subr.bf16.mxu1 %v4298_v0  ;;  %v3939_v6 = vld [vmem:[%s6100_s0 + $0x4] ss:$28 sps:$4 sm:$0xff]   ;;  %v3927_v9 = vld [vmem:[%s6099_s1 + $0x8] sm:$0xff]   ;;  %v3929_v11 = vld [vmem:[%s6099_s1 + $0x78] sm:$0xff]  }
   0x4   :  { %v3942_v8 = vld [vmem:[%s6100_s0 + $0x544] ss:$28 sps:$4 sm:$0xff]   ;;  %1910 = vmatprep.mubr.bf16.mxu0 %v3939_v6  ;;  %v3930_v12 = vld [vmem:[%s6099_s1 + $0x70] sm:$0xff]   ;;  %v3931_v13 = vld [vmem:[%s6099_s1 + $0x68] sm:$0xff]  }
   0x5   :  { %2102 = vmatprep.mubr.bf16.mxu1 %v3942_v8  ;;  %v3928_v10 = vld [vmem:[%s6099_s1] sm:$0xff]   ;;  %v3933_v15 = vld [vmem:[%s6099_s1 + $0x58] sm:$0xff]   ;;  %v3934_v16 = vld [vmem:[%s6099_s1 + $0x50] sm:$0xff]  }
   0x6   :  { %1881 = vmatpush1.bf16.msra.mxu0 %v3922_v2  ;;  %3905 = vmatpush1.bf16.msra.mxu1 %v3922_v2  ;;  %v3932_v14 = vld [vmem:[%s6099_s1 + $0x60] sm:$0xff]   ;;  %v3935_v17 = vld [vmem:[%s6099_s1 + $0x48] sm:$0xff]   ;;  %v3943_v21 = vld [vmem:[%s6099_s1 + $0xb8] sm:$0xff]  }
   0x7   :  { %1882 = vmatprep.subr.bf16.mxu0 %v4298_v0  ;;  %3890 = vmatprep.subr.bf16.mxu1 %v4298_v0  ;;  %v3936_v18 = vld [vmem:[%s6099_s1 + $0x40] sm:$0xff]   ;;  %v3944_v22 = vld [vmem:[%s6099_s1 + $0x138] sm:$0xff]   ;;  %v3945_v25 = vld [vmem:[%s6099_s1 + $0xb0] sm:$0xff]  }
   0x8   :  { %v3937_v19 = vld [vmem:[%s6100_s0] ss:$28 sps:$4 sm:$0xff]   ;;  %v3954_v26 = vld [vmem:[%s6099_s1 + $0x130] sm:$0xff]   ;;  %v3952_v29 = vld [vmem:[%s6099_s1 + $0xa8] sm:$0xff]  }
   0x9   :  { %v3940_v20 = vld [vmem:[%s6100_s0 + $0x540] ss:$28 sps:$4 sm:$0xff]   ;;  %v3950_v27 = vld [vmem:[%s6100_s0 + $0x38] ss:$28 sps:$4 sm:$0xff]   ;;  %v3970_v32 = vld [vmem:[%s6099_s1 + $0x128] sm:$0xff]  }
   0xa   :  { %1883 = vmatpush1.bf16.msra.mxu0 %v3923_v3  ;;  %3906 = vmatpush1.bf16.msra.mxu1 %v3923_v3  ;;  %v3946_v23 = vld [vmem:[%s6100_s0 + $0x3c] ss:$28 sps:$4 sm:$0xff]   ;;  %v3955_v30 = vld [vmem:[%s6100_s0 + $0x74] ss:$28 sps:$4 sm:$0xff]   ;;  %v3953_v33 = vld [vmem:[%s6099_s1 + $0xa0] sm:$0xff]  }
   0xb   :  { %1884 = vmatprep.subr.bf16.mxu0 %v4298_v0  ;;  %3891 = vmatprep.subr.bf16.mxu1 %v4298_v0  ;;  %v3948_v24 = vld [vmem:[%s6100_s0 + $0x57c] ss:$28 sps:$4 sm:$0xff]   ;;  %v3957_v31 = vld [vmem:[%s6100_s0 + $0x5b4] ss:$28 sps:$4 sm:$0xff]   ;;  %v3980_v36 = vld [vmem:[%s6099_s1 + $0x120] sm:$0xff]  }
   0xc   :  { %v3951_v28 = vld [vmem:[%s6100_s0 + $0x578] ss:$28 sps:$4 sm:$0xff]   ;;  %v3959_v34 = vld [vmem:[%s6100_s0 + $0x70] ss:$28 sps:$4 sm:$0xff]   ;;  %v3967_v42 = vld [vmem:[%s6100_s0 + $0xa8] ss:$28 sps:$4 sm:$0xff]  }
   0xd   :  { %v3960_v35 = vld [vmem:[%s6100_s0 + $0x5b0] ss:$28 sps:$4 sm:$0xff]   ;;  %v3961_v37 = vld [vmem:[%s6099_s1 + $0x98] sm:$0xff]   ;;  %v3968_v43 = vld [vmem:[%s6100_s0 + $0x5e8] ss:$28 sps:$4 sm:$0xff]  }
   0xe   :  { %1885 = vmatpush1.bf16.msra.mxu0 %v3924_v4  ;;  %3907 = vmatpush1.bf16.msra.mxu1 %v3924_v4  ;;  %v3963_v38 = vld [vmem:[%s6100_s0 + $0xac] ss:$28 sps:$4 sm:$0xff]   ;;  %v3996_v40 = vld [vmem:[%s6099_s1 + $0x118] sm:$0xff]   ;;  %v3962_v41 = vld [vmem:[%s6099_s1 + $0x90] sm:$0xff]  }
   0xf   :  { %1886 = vmatprep.subr.bf16.mxu0 %v4298_v0  ;;  %3892 = vmatprep.subr.bf16.mxu1 %v4298_v0  ;;  %v3965_v39 = vld [vmem:[%s6100_s0 + $0x5ec] ss:$28 sps:$4 sm:$0xff]   ;;  %v3972_v45 = vld [vmem:[%s6100_s0 + $0xe4] ss:$28 sps:$4 sm:$0xff]   ;;  %v4006_v47 = vld [vmem:[%s6099_s1 + $0x110] sm:$0xff]  }
  0x10   :  { %v3969_v44 = vld [vmem:[%s6099_s1 + $0x88] sm:$0xff]   ;;  %v3974_v46 = vld [vmem:[%s6100_s0 + $0x624] ss:$28 sps:$4 sm:$0xff]   ;;  %v3978_v52 = vld [vmem:[%s6099_s1 + $0xf8] sm:$0xff]  }
  0x11   :  { %v3971_v48 = vld [vmem:[%s6099_s1 + $0x80] sm:$0xff]   ;;  %v4020_v50 = vld [vmem:[%s6099_s1 + $0x108] sm:$0xff]   ;;  %v3981_v53 = vld [vmem:[%s6100_s0 + $0x11c] ss:$28 sps:$4 sm:$0xff]  }
  0x12   :  { %1887 = vmatpush1.bf16.msra.mxu0 %v3925_v5  ;;  %3908 = vmatpush1.bf16.msra.mxu1 %v3925_v5  ;;  %v3976_v49 = vld [vmem:[%s6100_s0 + $0xe0] ss:$28 sps:$4 sm:$0xff]   ;;  %v3979_v56 = vld [vmem:[%s6099_s1 + $0xf0] sm:$0xff]   ;;  %v3987_v59 = vld [vmem:[%s6099_s1 + $0xe8] sm:$0xff]  }
  0x13   :  { %1888 = vmatprep.subr.bf16.mxu0 %v4298_v0  ;;  %3893 = vmatprep.subr.bf16.mxu1 %v4298_v0  ;;  %v3977_v51 = vld [vmem:[%s6100_s0 + $0x620] ss:$28 sps:$4 sm:$0xff]   ;;  %v3985_v57 = vld [vmem:[%s6100_s0 + $0x118] ss:$28 sps:$4 sm:$0xff]   ;;  %v3993_v1 = vld [vmem:[%s6100_s0 + $0x150] ss:$28 sps:$4 sm:$0xff]  }
  0x14   :  { %v3983_v54 = vld [vmem:[%s6100_s0 + $0x65c] ss:$28 sps:$4 sm:$0xff]   ;;  %v4027_v55 = vld [vmem:[%s6099_s1 + $0x100] sm:$0xff]   ;;  %v3989_v60 = vld [vmem:[%s6100_s0 + $0x154] ss:$28 sps:$4 sm:$0xff]  }
  0x15   :  { %v3986_v58 = vld [vmem:[%s6100_s0 + $0x658] ss:$28 sps:$4 sm:$0xff]   ;;  %v3988_v63 = vld [vmem:[%s6099_s1 + $0xe0] sm:$0xff]   ;;  %v3994_v2 = vld [vmem:[%s6100_s0 + $0x690] ss:$28 sps:$4 sm:$0xff]  }
  0x16   :  { %1889 = vmatpush1.bf16.msra.mxu0 %v3926_v7  ;;  %3909 = vmatpush1.bf16.msra.mxu1 %v3926_v7  ;;  %v3991_v61 = vld [vmem:[%s6100_s0 + $0x694] ss:$28 sps:$4 sm:$0xff]   ;;  %v4041_v62 = vld [vmem:[%s6099_s1 + $0x178] sm:$0xff]   ;;  %v3998_v5 = vld [vmem:[%s6100_s0 + $0x18c] ss:$28 sps:$4 sm:$0xff]  }
  0x17   :  { %1890 = vmatprep.subr.bf16.mxu0 %v4298_v0  ;;  %3894 = vmatprep.subr.bf16.mxu1 %v4298_v0  ;;  %v4048_v3 = vld [vmem:[%s6099_s1 + $0x170] sm:$0xff]   ;;  %v3995_v4 = vld [vmem:[%s6099_s1 + $0xd8] sm:$0xff]   ;;  %v4000_v6 = vld [vmem:[%s6100_s0 + $0x6cc] ss:$28 sps:$4 sm:$0xff]  }
  0x18   :  { %v4061_v7 = vld [vmem:[%s6099_s1 + $0x168] sm:$0xff]   ;;  %v3997_v8 = vld [vmem:[%s6099_s1 + $0xd0] sm:$0xff]  }
  0x1a   :  { %1891 = vmatpush1.bf16.msra.mxu0 %v3927_v9  ;;  %3910 = vmatpush1.bf16.msra.mxu1 %v3927_v9  ;;  %v4002_v9 = vld [vmem:[%s6100_s0 + $0x188] ss:$28 sps:$4 sm:$0xff]  }
  0x1b   :  { %1892 = vmatprep.subr.bf16.mxu0 %v4298_v0  ;;  %3895 = vmatprep.subr.bf16.mxu1 %v4298_v0 }
  0x1e   :  { %1893 = vmatpush1.bf16.msra.mxu0 %v3928_v10  ;;  %3911 = vmatpush1.bf16.msra.mxu1 %v3928_v10  ;;  %v4003_v10 = vld [vmem:[%s6100_s0 + $0x6c8] ss:$28 sps:$4 sm:$0xff]  }
  0x1f   :  { %1894 = vmatprep.subr.bf16.mxu0 %v4298_v0  ;;  %3896 = vmatprep.subr.bf16.mxu1 %v4298_v0 }
  0x22   :  { %1895 = vmatpush2.bf16.msra.mxu0 %v3929_v11  ;;  %3912 = vmatpush2.bf16.msra.mxu1 %v3929_v11  ;;  %v4004_v11 = vld [vmem:[%s6099_s1 + $0xc8] sm:$0xff]  }
  0x23   :  { %1896 = vmatprep.subr.bf16.mxu0 %v4298_v0  ;;  %3897 = vmatprep.subr.bf16.mxu1 %v4298_v0 }
  0x26   :  { %1897 = vmatpush2.bf16.msra.mxu0 %v3930_v12  ;;  %3913 = vmatpush2.bf16.msra.mxu1 %v3930_v12  ;;  %v4007_v12 = vld [vmem:[%s6100_s0 + $0x1c4] ss:$28 sps:$4 sm:$0xff]  }
  0x27   :  { %1898 = vmatprep.subr.bf16.mxu0 %v4298_v0  ;;  %3898 = vmatprep.subr.bf16.mxu1 %v4298_v0 }
  0x2a   :  { %1899 = vmatpush2.bf16.msra.mxu0 %v3931_v13  ;;  %3914 = vmatpush2.bf16.msra.mxu1 %v3931_v13  ;;  %v4011_v13 = vld [vmem:[%s6100_s0 + $0xc] ss:$28 sps:$4 sm:$0xff]  }
  0x2b   :  { %1900 = vmatprep.subr.bf16.mxu0 %v4298_v0  ;;  %3899 = vmatprep.subr.bf16.mxu1 %v4298_v0 }
  0x2e   :  { %1901 = vmatpush2.bf16.msra.mxu0 %v3932_v14  ;;  %3915 = vmatpush2.bf16.msra.mxu1 %v3932_v14  ;;  %v4069_v14 = vld [vmem:[%s6099_s1 + $0x160] sm:$0xff]  }
  0x2f   :  { %1902 = vmatprep.subr.bf16.mxu0 %v4298_v0  ;;  %3900 = vmatprep.subr.bf16.mxu1 %v4298_v0 }
  0x32   :  { %1903 = vmatpush2.bf16.msra.mxu0 %v3933_v15  ;;  %3916 = vmatpush2.bf16.msra.mxu1 %v3933_v15  ;;  %v4005_v15 = vld [vmem:[%s6099_s1 + $0xc0] sm:$0xff]  }
  0x33   :  { %1904 = vmatprep.subr.bf16.mxu0 %v4298_v0  ;;  %3901 = vmatprep.subr.bf16.mxu1 %v4298_v0 }
  0x36   :  { %1905 = vmatpush2.bf16.msra.mxu0 %v3934_v16  ;;  %3917 = vmatpush2.bf16.msra.mxu1 %v3934_v16  ;;  %v4013_v16 = vld [vmem:[%s6099_s1 + $0x1b8] sm:$0xff]  }
  0x37   :  { %1906 = vmatprep.subr.bf16.mxu0 %v4298_v0  ;;  %3902 = vmatprep.subr.bf16.mxu1 %v4298_v0 }
  0x3a   :  { %1907 = vmatpush2.bf16.msra.mxu0 %v3935_v17  ;;  %3918 = vmatpush2.bf16.msra.mxu1 %v3935_v17  ;;  %v4009_v17 = vld [vmem:[%s6100_s0 + $0x8] ss:$28 sps:$4 sm:$0xff]  }
  0x3b   :  { %1908 = vmatprep.subr.bf16.mxu0 %v4298_v0  ;;  %3903 = vmatprep.subr.bf16.mxu1 %v4298_v0 }
  0x3e   :  { %1909 = vmatpush2.bf16.msra.mxu0 %v3936_v18  ;;  %3919 = vmatpush2.bf16.msra.mxu1 %v3936_v18  ;;  %v4012_v18 = vld [vmem:[%s6100_s0 + $0x1c0] ss:$28 sps:$4 sm:$0xff]  }
  0x3f   :  { %2167 = vmatprep.subr.bf16.mxu1 %v4298_v0  ;;  %2456 = vmatprep.subr.bf16.mxu0 %v4298_v0 }
  0x41   :  { %1911 = vmatmul.mubr.bf16.vlgmr.msra.gmra.mxu0 %v3937_v19  ;;  %2103 = vmatmul.mubr.bf16.vlgmr.msra.gmra.mxu1 %v3940_v20  ;;  %v4082_v19 = vld [vmem:[%s6099_s1 + $0x158] sm:$0xff]  }
  0x42   :  { %2168 = vmatpush1.bf16.msra.mxu1 %v3943_v21  ;;  %2457 = vmatpush1.bf16.msra.mxu0 %v3944_v22  ;;  %v4014_v20 = vld [vmem:[%s6100_s0 + $0x1fc] ss:$28 sps:$4 sm:$0xff]   ;;  %v4016_v21 = vld [vmem:[%s6100_s0 + $0x44] ss:$28 sps:$4 sm:$0xff]   ;;  %v4040_v22 = vld [vmem:[%s6099_s1 + $0x1b0] sm:$0xff]  }
  0x43   :  { %2169 = vmatprep.subr.bf16.mxu1 %v4298_v0  ;;  %1918 = vmatprep.mubr.bf16.mxu0 %v3946_v23  ;;  %v4089_v23 = vld [vmem:[%s6099_s1 + $0x150] sm:$0xff]  }
  0x44   :  { %2110 = vmatprep.mubr.bf16.mxu1 %v3948_v24  ;;  %2458 = vmatprep.subr.bf16.mxu0 %v4298_v0  ;;  %v4068_v24 = vld [vmem:[%s6099_s1 + $0x1a8] sm:$0xff]  }
  0x46   :  { %2170 = vmatpush1.bf16.msra.mxu1 %v3945_v25  ;;  %2459 = vmatpush1.bf16.msra.mxu0 %v3954_v26  ;;  %v4018_v25 = vld [vmem:[%s6100_s0 + $0x1f8] ss:$28 sps:$4 sm:$0xff]   ;;  %v4019_v26 = vld [vmem:[%s6100_s0 + $0x40] ss:$28 sps:$4 sm:$0xff]  }
  0x47   :  { %2171 = vmatprep.subr.bf16.mxu1 %v4298_v0  ;;  %2460 = vmatprep.subr.bf16.mxu0 %v4298_v0 }
  0x49   :  { %1919 = vmatmul.mubr.bf16.gmra.mxu0 %v3950_v27  ;;  %2111 = vmatmul.mubr.bf16.gmra.mxu1 %v3951_v28  ;;  %v4021_v27 = vld [vmem:[%s6100_s0 + $0x234] ss:$28 sps:$4 sm:$0xff]   ;;  %v4023_v28 = vld [vmem:[%s6100_s0 + $0x7c] ss:$28 sps:$4 sm:$0xff]  }
  0x4a   :  { %2172 = vmatpush1.bf16.msra.mxu1 %v3952_v29  ;;  %1926 = vmatprep.mubr.bf16.mxu0 %v3955_v30  ;;  %v4096_v29 = vld [vmem:[%s6099_s1 + $0x1a0] sm:$0xff]   ;;  %v4103_v30 = vld [vmem:[%s6099_s1 + $0x148] sm:$0xff]  }
  0x4b   :  { %2173 = vmatprep.subr.bf16.mxu1 %v4298_v0  ;;  %2118 = vmatprep.mubr.bf16.mxu1 %v3957_v31  ;;  %v4110_v31 = vld [vmem:[%s6099_s1 + $0x140] sm:$0xff]  }
  0x4c   :  { %2461 = vmatpush1.bf16.msra.mxu0 %v3970_v32  ;;  %v4123_v32 = vld [vmem:[%s6099_s1 + $0x198] sm:$0xff]  }
  0x4d   :  { %2462 = vmatprep.subr.bf16.mxu0 %v4298_v0 }
  0x4e   :  { %2174 = vmatpush1.bf16.msra.mxu1 %v3953_v33  ;;  %v4025_v33 = vld [vmem:[%s6100_s0 + $0x230] ss:$28 sps:$4 sm:$0xff]  }
  0x4f   :  { %2175 = vmatprep.subr.bf16.mxu1 %v4298_v0 }
  0x50   :  { %2463 = vmatpush1.bf16.msra.mxu0 %v3980_v36  ;;  %v4030_v36 = vld [vmem:[%s6100_s0 + $0xb4] ss:$28 sps:$4 sm:$0xff]  }
  0x51   :  { %1927 = vmatmul.mubr.bf16.gmra.mxu0 %v3959_v34  ;;  %2119 = vmatmul.mubr.bf16.gmra.mxu1 %v3960_v35  ;;  %v4026_v34 = vld [vmem:[%s6100_s0 + $0x78] ss:$28 sps:$4 sm:$0xff]   ;;  %v4028_v35 = vld [vmem:[%s6100_s0 + $0x26c] ss:$28 sps:$4 sm:$0xff]  }
  0x52   :  { %2176 = vmatpush1.bf16.msra.mxu1 %v3961_v37  ;;  %1934 = vmatprep.mubr.bf16.mxu0 %v3963_v38  ;;  %v4032_v37 = vld [vmem:[%s6100_s0 + $0x268] ss:$28 sps:$4 sm:$0xff]  }
  0x53   :  { %2177 = vmatprep.subr.bf16.mxu1 %v4298_v0  ;;  %2126 = vmatprep.mubr.bf16.mxu1 %v3965_v39  ;;  %v4034_v38 = vld [vmem:[%s6100_s0 + $0x2a4] ss:$28 sps:$4 sm:$0xff]   ;;  %v4036_v39 = vld [vmem:[%s6100_s0 + $0xec] ss:$28 sps:$4 sm:$0xff]  }
  0x54   :  { %2464 = vmatprep.subr.bf16.mxu0 %v4298_v0 }
  0x55   :  { %2465 = vmatpush1.bf16.msra.mxu0 %v3996_v40  ;;  %v4038_v40 = vld [vmem:[%s6100_s0 + $0x2a0] ss:$28 sps:$4 sm:$0xff]  }
  0x56   :  { %2178 = vmatpush1.bf16.msra.mxu1 %v3962_v41  ;;  %2466 = vmatprep.subr.bf16.mxu0 %v4298_v0  ;;  %v4039_v41 = vld [vmem:[%s6100_s0 + $0xe8] ss:$28 sps:$4 sm:$0xff]  }
  0x57   :  { %2179 = vmatprep.subr.bf16.mxu1 %v4298_v0 }
  0x59   :  { %1935 = vmatmul.mubr.bf16.gmra.mxu0 %v3967_v42  ;;  %2127 = vmatmul.mubr.bf16.gmra.mxu1 %v3968_v43  ;;  %v4042_v42 = vld [vmem:[%s6100_s0 + $0x2dc] ss:$28 sps:$4 sm:$0xff]   ;;  %v4044_v43 = vld [vmem:[%s6100_s0 + $0x124] ss:$28 sps:$4 sm:$0xff]  }
  0x5a   :  { %2180 = vmatpush1.bf16.msra.mxu1 %v3969_v44  ;;  %1942 = vmatprep.mubr.bf16.mxu0 %v3972_v45  ;;  %v4148_v44 = vld [vmem:[%s6099_s1 + $0x190] sm:$0xff]  }
  0x5b   :  { %2181 = vmatprep.subr.bf16.mxu1 %v4298_v0  ;;  %2134 = vmatprep.mubr.bf16.mxu1 %v3974_v46  ;;  %v4046_v45 = vld [vmem:[%s6100_s0 + $0x2d8] ss:$28 sps:$4 sm:$0xff]   ;;  %v4047_v46 = vld [vmem:[%s6100_s0 + $0x120] ss:$28 sps:$4 sm:$0xff]  }
  0x5c   :  { %2467 = vmatpush1.bf16.msra.mxu0 %v4006_v47  ;;  %v4049_v47 = vld [vmem:[%s6100_s0 + $0x314] ss:$28 sps:$4 sm:$0xff]  }
  0x5d   :  { %2468 = vmatprep.subr.bf16.mxu0 %v4298_v0 }
  0x5e   :  { %2182 = vmatpush1.bf16.msra.mxu1 %v3971_v48  ;;  %v4051_v48 = vld [vmem:[%s6100_s0 + $0x15c] ss:$28 sps:$4 sm:$0xff]  }
  0x5f   :  { %2183 = vmatprep.subr.bf16.mxu1 %v4298_v0 }
  0x60   :  { %2469 = vmatpush1.bf16.msra.mxu0 %v4020_v50  ;;  %v4054_v50 = vld [vmem:[%s6100_s0 + $0x158] ss:$28 sps:$4 sm:$0xff]  }
  0x61   :  { %1943 = vmatmul.mubr.bf16.gmra.mxu0 %v3976_v49  ;;  %2135 = vmatmul.mubr.bf16.gmra.mxu1 %v3977_v51  ;;  %v4053_v49 = vld [vmem:[%s6100_s0 + $0x310] ss:$28 sps:$4 sm:$0xff]  }
  0x62   :  { %2184 = vmatpush2.bf16.msra.mxu1 %v3978_v52  ;;  %1950 = vmatprep.mubr.bf16.mxu0 %v3981_v53  ;;  %v4055_v51 = vld [vmem:[%s6100_s0 + $0x34c] ss:$28 sps:$4 sm:$0xff]   ;;  %v4057_v52 = vld [vmem:[%s6100_s0 + $0x194] ss:$28 sps:$4 sm:$0xff]  }
  0x63   :  { %2185 = vmatprep.subr.bf16.mxu1 %v4298_v0  ;;  %2142 = vmatprep.mubr.bf16.mxu1 %v3983_v54  ;;  %v4059_v53 = vld [vmem:[%s6100_s0 + $0x348] ss:$28 sps:$4 sm:$0xff]   ;;  %v4060_v54 = vld [vmem:[%s6100_s0 + $0x190] ss:$28 sps:$4 sm:$0xff]  }
  0x64   :  { %2470 = vmatprep.subr.bf16.mxu0 %v4298_v0 }
  0x65   :  { %2471 = vmatpush1.bf16.msra.mxu0 %v4027_v55  ;;  %v4062_v55 = vld [vmem:[%s6100_s0 + $0x384] ss:$28 sps:$4 sm:$0xff]  }
  0x66   :  { %2186 = vmatpush2.bf16.msra.mxu1 %v3979_v56  ;;  %2472 = vmatprep.subr.bf16.mxu0 %v4298_v0  ;;  %v4064_v56 = vld [vmem:[%s6100_s0 + $0x1cc] ss:$28 sps:$4 sm:$0xff]  }
  0x67   :  { %2187 = vmatprep.subr.bf16.mxu1 %v4298_v0 }
  0x69   :  { %1951 = vmatmul.mubr.bf16.gmra.mxu0 %v3985_v57  ;;  %2143 = vmatmul.mubr.bf16.gmra.mxu1 %v3986_v58  ;;  %v4066_v57 = vld [vmem:[%s6100_s0 + $0x380] ss:$28 sps:$4 sm:$0xff]   ;;  %v4067_v58 = vld [vmem:[%s6100_s0 + $0x1c8] ss:$28 sps:$4 sm:$0xff]  }
  0x6a   :  { %2188 = vmatpush2.bf16.msra.mxu1 %v3987_v59  ;;  %1958 = vmatprep.mubr.bf16.mxu0 %v3989_v60  ;;  %v4070_v59 = vld [vmem:[%s6100_s0 + $0x3bc] ss:$28 sps:$4 sm:$0xff]   ;;  %v4072_v60 = vld [vmem:[%s6100_s0 + $0x204] ss:$28 sps:$4 sm:$0xff]  }
  0x6b   :  { %2189 = vmatprep.subr.bf16.mxu1 %v4298_v0  ;;  %2150 = vmatprep.mubr.bf16.mxu1 %v3991_v61  ;;  %v4173_v61 = vld [vmem:[%s6099_s1 + $0x188] sm:$0xff]  }
  0x6c   :  { %2473 = vmatpush2.bf16.msra.mxu0 %v4041_v62  ;;  %v4074_v62 = vld [vmem:[%s6100_s0 + $0x3b8] ss:$28 sps:$4 sm:$0xff]  }
  0x6d   :  { %2474 = vmatprep.subr.bf16.mxu0 %v4298_v0 }
  0x6e   :  { %2190 = vmatpush2.bf16.msra.mxu1 %v3988_v63  ;;  %v4075_v63 = vld [vmem:[%s6100_s0 + $0x200] ss:$28 sps:$4 sm:$0xff]  }
  0x6f   :  { %2191 = vmatprep.subr.bf16.mxu1 %v4298_v0 }
  0x70   :  { %2475 = vmatpush2.bf16.msra.mxu0 %v4048_v3  ;;  %v4080_v3 = vld [vmem:[%s6100_s0 + $0x3f0] ss:$28 sps:$4 sm:$0xff]  }
  0x71   :  { %1959 = vmatmul.mubr.bf16.gmra.mxu0 %v3993_v1  ;;  %2151 = vmatmul.mubr.bf16.gmra.mxu1 %v3994_v2  ;;  %v4076_v1 = vld [vmem:[%s6100_s0 + $0x3f4] ss:$28 sps:$4 sm:$0xff]   ;;  %v4078_v2 = vld [vmem:[%s6100_s0 + $0x23c] ss:$28 sps:$4 sm:$0xff]  }
  0x72   :  { %2192 = vmatpush2.bf16.msra.mxu1 %v3995_v4  ;;  %1966 = vmatprep.mubr.bf16.mxu0 %v3998_v5  ;;  %v4081_v4 = vld [vmem:[%s6100_s0 + $0x238] ss:$28 sps:$4 sm:$0xff]   ;;  %v4083_v5 = vld [vmem:[%s6100_s0 + $0x42c] ss:$28 sps:$4 sm:$0xff]  }
  0x73   :  { %2193 = vmatprep.subr.bf16.mxu1 %v4298_v0  ;;  %2158 = vmatprep.mubr.bf16.mxu1 %v4000_v6  ;;  %v4085_v6 = vld [vmem:[%s6100_s0 + $0x274] ss:$28 sps:$4 sm:$0xff]  }
  0x74   :  { %2476 = vmatprep.subr.bf16.mxu0 %v4298_v0 }
  0x75   :  { %2477 = vmatpush2.bf16.msra.mxu0 %v4061_v7  ;;  %v4087_v7 = vld [vmem:[%s6100_s0 + $0x428] ss:$28 sps:$4 sm:$0xff]  }
  0x76   :  { %2194 = vmatpush2.bf16.msra.mxu1 %v3997_v8  ;;  %2478 = vmatprep.subr.bf16.mxu0 %v4298_v0  ;;  %v4088_v8 = vld [vmem:[%s6100_s0 + $0x270] ss:$28 sps:$4 sm:$0xff]  }
  0x77   :  { %2195 = vmatprep.subr.bf16.mxu1 %v4298_v0 }
  0x79   :  { %1967 = vmatmul.mubr.bf16.gmra.mxu0 %v4002_v9  ;;  %2159 = vmatmul.mubr.bf16.gmra.mxu1 %v4003_v10  ;;  %v4090_v9 = vld [vmem:[%s6100_s0 + $0x464] ss:$28 sps:$4 sm:$0xff]   ;;  %v4092_v10 = vld [vmem:[%s6100_s0 + $0x2ac] ss:$28 sps:$4 sm:$0xff]  }
  0x7a   :  { %2196 = vmatpush2.bf16.msra.mxu1 %v4004_v11  ;;  %1974 = vmatprep.mubr.bf16.mxu0 %v4007_v12  ;;  %v4094_v11 = vld [vmem:[%s6100_s0 + $0x460] ss:$28 sps:$4 sm:$0xff]   ;;  %v4095_v12 = vld [vmem:[%s6100_s0 + $0x2a8] ss:$28 sps:$4 sm:$0xff]  }
  0x7b   :  { %2197 = vmatprep.subr.bf16.mxu1 %v4298_v0  ;;  %2199 = vmatprep.mubr.bf16.mxu1 %v4011_v13  ;;  %v4097_v13 = vld [vmem:[%s6100_s0 + $0x49c] ss:$28 sps:$4 sm:$0xff]  }
  0x7c   :  { %2479 = vmatpush2.bf16.msra.mxu0 %v4069_v14  ;;  %v4099_v14 = vld [vmem:[%s6100_s0 + $0x2e4] ss:$28 sps:$4 sm:$0xff]  }
  0x7d   :  { %2480 = vmatprep.subr.bf16.mxu0 %v4298_v0 }
  0x7e   :  { %2198 = vmatpush2.bf16.msra.mxu1 %v4005_v15  ;;  %v4198_v15 = vld [vmem:[%s6099_s1 + $0x180] sm:$0xff]  }
  0x7f   :  { %3808 = vmatprep.subr.bf16.mxu1 %v4013_v16 }
  0x80   :  { %2481 = vmatpush2.bf16.msra.mxu0 %v4082_v19  ;;  %v4106_v19 = vld [vmem:[%s6100_s0 + $0x31c] ss:$28 sps:$4 sm:$0xff]  }
  0x81   :  { %1975 = vmatmul.mubr.bf16.gmra.mxu0 %v4012_v18  ;;  %2200 = vmatmul.mubr.bf16.vlgmr.msra.gmra.mxu1 %v4009_v17  ;;  %v4102_v17 = vld [vmem:[%s6100_s0 + $0x2e0] ss:$28 sps:$4 sm:$0xff]   ;;  %v4104_v18 = vld [vmem:[%s6100_s0 + $0x4d4] ss:$28 sps:$4 sm:$0xff]  }
  0x82   :  { %3809 = vmatpush3.bf16.msra.mxu1 %v4013_v16  ;;  %1982 = vmatprep.mubr.bf16.mxu0 %v4014_v20  ;;  %v4101_v16 = vld [vmem:[%s6100_s0 + $0x498] ss:$28 sps:$4 sm:$0xff]   ;;  %v4108_v20 = vld [vmem:[%s6100_s0 + $0x4d0] ss:$28 sps:$4 sm:$0xff]  }
  0x83   :  { %2207 = vmatprep.mubr.bf16.mxu1 %v4016_v21  ;;  %3810 = vmatprep.subr.bf16.mxu1 %v4040_v22  ;;  %v4109_v21 = vld [vmem:[%s6100_s0 + $0x318] ss:$28 sps:$4 sm:$0xff]  }
  0x84   :  { %2482 = vmatprep.subr.bf16.mxu0 %v4298_v0 }
  0x85   :  { %2483 = vmatpush2.bf16.msra.mxu0 %v4089_v23  ;;  %v4113_v23 = vld [vmem:[%s6100_s0 + $0x354] ss:$28 sps:$4 sm:$0xff]  }
  0x86   :  { %3811 = vmatpush3.bf16.msra.mxu1 %v4040_v22  ;;  %2484 = vmatprep.subr.bf16.mxu0 %v4298_v0  ;;  %v4111_v22 = vld [vmem:[%s6100_s0 + $0x50c] ss:$28 sps:$4 sm:$0xff]  }
  0x87   :  { %3812 = vmatprep.subr.bf16.mxu1 %v4068_v24 }
  0x89   :  { %1983 = vmatmul.mubr.bf16.gmra.mxu0 %v4018_v25  ;;  %2208 = vmatmul.mubr.bf16.gmra.mxu1 %v4019_v26  ;;  %v4116_v25 = vld [vmem:[%s6100_s0 + $0x350] ss:$28 sps:$4 sm:$0xff]  }
  0x8a   :  { %1990 = vmatprep.mubr.bf16.mxu0 %v4021_v27  ;;  %2215 = vmatprep.mubr.bf16.mxu1 %v4023_v28  ;;  %v4117_v26 = vld [vmem:[%s6100_s0 + $0x38c] ss:$28 sps:$4 sm:$0xff]   ;;  %v4121_v27 = vld [vmem:[%s6100_s0 + $0x14] ss:$28 sps:$4 sm:$0xff]  }
  0x8b   :  { %3813 = vmatpush3.bf16.msra.mxu1 %v4068_v24  ;;  %2485 = vmatpush2.bf16.msra.mxu0 %v4103_v30  ;;  %v4115_v24 = vld [vmem:[%s6100_s0 + $0x508] ss:$28 sps:$4 sm:$0xff]   ;;  %v4119_v28 = vld [vmem:[%s6100_s0 + $0x10] ss:$28 sps:$4 sm:$0xff]  }
  0x8c   :  { %3814 = vmatprep.subr.bf16.mxu1 %v4096_v29  ;;  %2486 = vmatprep.subr.bf16.mxu0 %v4298_v0  ;;  %v4033_v0 = vld [vmem:[%s6100_s0 + $0xb0] ss:$28 sps:$4 sm:$0xff]   ;;  %v4124_v30 = vld [vmem:[%s6100_s0 + $0x3c4] ss:$28 sps:$4 sm:$0xff]  }
  0x8f   :  { %3815 = vmatpush3.bf16.msra.mxu1 %v4096_v29  ;;  %2487 = vmatpush2.bf16.msra.mxu0 %v4110_v31  ;;  %v4122_v29 = vld [vmem:[%s6100_s0 + $0x388] ss:$28 sps:$4 sm:$0xff]  }
  0x90   :  { %3816 = vmatprep.subr.bf16.mxu1 %v4123_v32  ;;  %v4126_v31 = vld [vmem:[%s6100_s0 + $0x4c] ss:$28 sps:$4 sm:$0xff]  }
  0x91   :  { %1991 = vmatmul.mubr.bf16.gmra.mxu0 %v4025_v33  ;;  %2216 = vmatmul.mubr.bf16.gmra.mxu1 %v4026_v34 }
  0x92   :  { %1998 = vmatprep.mubr.bf16.mxu0 %v4028_v35  ;;  %2223 = vmatprep.mubr.bf16.mxu1 %v4030_v36 }
  0x93   :  { %3817 = vmatpush3.bf16.msra.mxu1 %v4123_v32 }
  0x94   :  { %3818 = vmatprep.subr.bf16.mxu1 %v4148_v44 }
  0x97   :  { %3819 = vmatpush3.bf16.msra.mxu1 %v4148_v44 }
  0x98   :  { %3820 = vmatprep.subr.bf16.mxu1 %v4173_v61 }
  0x99   :  { %1999 = vmatmul.mubr.bf16.gmra.mxu0 %v4032_v37  ;;  %2224 = vmatmul.mubr.bf16.gmra.mxu1 %v4033_v0  ;;  %v4128_v0 = vld [vmem:[%s6100_s0 + $0x3c0] ss:$28 sps:$4 sm:$0xff]  }
  0x9a   :  { %2006 = vmatprep.mubr.bf16.mxu0 %v4034_v38  ;;  %2231 = vmatprep.mubr.bf16.mxu1 %v4036_v39  ;;  %v4129_v38 = vld [vmem:[%s6100_s0 + $0x48] ss:$28 sps:$4 sm:$0xff]   ;;  %v4130_v39 = vld [vmem:[%s6100_s0 + $0x3fc] ss:$28 sps:$4 sm:$0xff]  }
  0x9b   :  { %3821 = vmatpush3.bf16.msra.mxu1 %v4173_v61  ;;  %v4140_v61 = vld [vmem:[%s6100_s0 + $0x430] ss:$28 sps:$4 sm:$0xff]  }
  0x9c   :  { %3822 = vmatprep.subr.bf16.mxu1 %v4198_v15 }
  0x9f   :  { %3823 = vmatpush3.bf16.msra.mxu1 %v4198_v15 }
  0xa1   :  { %2007 = vmatmul.mubr.bf16.gmra.mxu0 %v4038_v40  ;;  %2232 = vmatmul.mubr.bf16.gmra.mxu1 %v4039_v41  ;;  %v4132_v40 = vld [vmem:[%s6100_s0 + $0x84] ss:$28 sps:$4 sm:$0xff]  }
  0xa2   :  { %2014 = vmatprep.mubr.bf16.mxu0 %v4042_v42  ;;  %2239 = vmatprep.mubr.bf16.mxu1 %v4044_v43 }
  0xa9   :  { %2015 = vmatmul.mubr.bf16.gmra.mxu0 %v4046_v45  ;;  %2240 = vmatmul.mubr.bf16.gmra.mxu1 %v4047_v46 }
  0xaa   :  { %2022 = vmatprep.mubr.bf16.mxu0 %v4049_v47  ;;  %2247 = vmatprep.mubr.bf16.mxu1 %v4051_v48 }
  0xb1   :  { %2023 = vmatmul.mubr.bf16.gmra.mxu0 %v4053_v49  ;;  %2248 = vmatmul.mubr.bf16.gmra.mxu1 %v4054_v50  ;;  %v4134_v49 = vld [vmem:[%s6100_s0 + $0x3f8] ss:$28 sps:$4 sm:$0xff]   ;;  %v4135_v50 = vld [vmem:[%s6100_s0 + $0x80] ss:$28 sps:$4 sm:$0xff]  }
  0xb2   :  { %2030 = vmatprep.mubr.bf16.mxu0 %v4055_v51  ;;  %2255 = vmatprep.mubr.bf16.mxu1 %v4057_v52  ;;  %v4136_v51 = vld [vmem:[%s6100_s0 + $0x434] ss:$28 sps:$4 sm:$0xff]   ;;  %v4138_v52 = vld [vmem:[%s6100_s0 + $0xbc] ss:$28 sps:$4 sm:$0xff]  }
  0xb9   :  { %2031 = vmatmul.mubr.bf16.gmra.mxu0 %v4059_v53  ;;  %2256 = vmatmul.mubr.bf16.gmra.mxu1 %v4060_v54 }
  0xba   :  { %2038 = vmatprep.mubr.bf16.mxu0 %v4062_v55  ;;  %2263 = vmatprep.mubr.bf16.mxu1 %v4064_v56 }
  0xc1   :  { %2039 = vmatmul.mubr.bf16.gmra.mxu0 %v4066_v57  ;;  %2264 = vmatmul.mubr.bf16.gmra.mxu1 %v4067_v58 }
  0xc2   :  { %2046 = vmatprep.mubr.bf16.mxu0 %v4070_v59  ;;  %2271 = vmatprep.mubr.bf16.mxu1 %v4072_v60 }
  0xc9   :  { %2047 = vmatmul.mubr.bf16.gmra.mxu0 %v4074_v62  ;;  %2272 = vmatmul.mubr.bf16.gmra.mxu1 %v4075_v63  ;;  %v4141_v62 = vld [vmem:[%s6100_s0 + $0xb8] ss:$28 sps:$4 sm:$0xff]   ;;  %v4144_v63 = vld [vmem:[%s6100_s0 + $0x46c] ss:$28 sps:$4 sm:$0xff]  }
  0xca   :  { %2054 = vmatprep.mubr.bf16.mxu0 %v4076_v1  ;;  %2279 = vmatprep.mubr.bf16.mxu1 %v4078_v2  ;;  %v4147_v1 = vld [vmem:[%s6100_s0 + $0xf4] ss:$28 sps:$4 sm:$0xff]  }
  0xd1   :  { %2055 = vmatmul.mubr.bf16.gmra.mxu0 %v4080_v3  ;;  %2280 = vmatmul.mubr.bf16.gmra.mxu1 %v4081_v4 }
  0xd2   :  { %2062 = vmatprep.mubr.bf16.mxu0 %v4083_v5  ;;  %2287 = vmatprep.mubr.bf16.mxu1 %v4085_v6 }
  0xd9   :  { %2063 = vmatmul.mubr.bf16.gmra.mxu0 %v4087_v7  ;;  %2288 = vmatmul.mubr.bf16.gmra.mxu1 %v4088_v8 }
  0xda   :  { %2070 = vmatprep.mubr.bf16.mxu0 %v4090_v9  ;;  %2295 = vmatprep.mubr.bf16.mxu1 %v4092_v10  ;;  %v4142_v10 = vld [vmem:[%s6100_s0 + $0x468] ss:$28 sps:$4 sm:$0xff]  }
  0xe1   :  { %2071 = vmatmul.mubr.bf16.gmra.mxu0 %v4094_v11  ;;  %2296 = vmatmul.mubr.bf16.gmra.mxu1 %v4095_v12  ;;  %v4145_v11 = vld [vmem:[%s6100_s0 + $0xf0] ss:$28 sps:$4 sm:$0xff]   ;;  %v4151_v12 = vld [vmem:[%s6100_s0 + $0x4a4] ss:$28 sps:$4 sm:$0xff]  }
  0xe2   :  { %2078 = vmatprep.mubr.bf16.mxu0 %v4097_v13  ;;  %2303 = vmatprep.mubr.bf16.mxu1 %v4099_v14  ;;  %v4154_v13 = vld [vmem:[%s6100_s0 + $0x12c] ss:$28 sps:$4 sm:$0xff]  }
  0xe9   :  { %2079 = vmatmul.mubr.bf16.gmra.mxu0 %v4101_v16  ;;  %2304 = vmatmul.mubr.bf16.gmra.mxu1 %v4102_v17 }
  0xea   :  { %2086 = vmatprep.mubr.bf16.mxu0 %v4104_v18  ;;  %2311 = vmatprep.mubr.bf16.mxu1 %v4106_v19 }
  0xf1   :  { %2087 = vmatmul.mubr.bf16.gmra.mxu0 %v4108_v20  ;;  %2312 = vmatmul.mubr.bf16.gmra.mxu1 %v4109_v21 }
  0xf2   :  { %2094 = vmatprep.mubr.bf16.mxu0 %v4111_v22  ;;  %2319 = vmatprep.mubr.bf16.mxu1 %v4113_v23  ;;  %v4149_v22 = vld [vmem:[%s6100_s0 + $0x4a0] ss:$28 sps:$4 sm:$0xff]   ;;  %v4152_v23 = vld [vmem:[%s6100_s0 + $0x128] ss:$28 sps:$4 sm:$0xff]  }
  0xf9   :  { %2095 = vmatmul.mubr.bf16.gmra.mxu0 %v4115_v24  ;;  %2320 = vmatmul.mubr.bf16.gmra.mxu1 %v4116_v25  ;;  %v4157_v24 = vld [vmem:[%s6100_s0 + $0x4dc] ss:$28 sps:$4 sm:$0xff]   ;;  %v4160_v25 = vld [vmem:[%s6100_s0 + $0x164] ss:$28 sps:$4 sm:$0xff]  }
  0xfa   :  { %2327 = vmatprep.mubr.bf16.mxu1 %v4117_v26  ;;  %2488 = vmatprep.mubr.bf16.mxu0 %v4121_v27 }
 0x101   :  { %v4857_v32 = vpop.f32.mrf.mxu0  ;;  %v4859_v33 = vpop.f32.mrf.mxu1  ;;  %2328 = vmatmul.mubr.bf16.gmra.mxu1 %v4122_v29  ;;  %2489 = vmatmul.mubr.bf16.vlgmr.msra.gmra.mxu0 %v4119_v28 }
 0x102   :  { %2335 = vmatprep.mubr.bf16.mxu1 %v4124_v30  ;;  %2496 = vmatprep.mubr.bf16.mxu0 %v4126_v31 }
 0x103   :  { %v1914_v34 = vpop.f32.mrf.mxu0  ;;  %v2106_v35 = vpop.f32.mrf.mxu1 }
 0x105   :  { %v4861_v36 = vpop.f32.mrf.mxu0  ;;  %v4863_v37 = vpop.f32.mrf.mxu1 }
 0x107   :  { %v1917_v41 = vpop.f32.mrf.mxu0  ;;  %v2109_v42 = vpop.f32.mrf.mxu1 }
 0x109   :  { %v4877_v43 = vpop.f32.mrf.mxu0  ;;  %v4879_v44 = vpop.f32.mrf.mxu1  ;;  %2336 = vmatmul.mubr.bf16.gmra.mxu1 %v4128_v0  ;;  %2497 = vmatmul.mubr.bf16.gmra.mxu0 %v4129_v38  ;;  %v4155_v0 = vld [vmem:[%s6100_s0 + $0x4d8] ss:$28 sps:$4 sm:$0xff]   ;;  %v4158_v38 = vld [vmem:[%s6100_s0 + $0x160] ss:$28 sps:$4 sm:$0xff]  }
 0x10a   :  { %2343 = vmatprep.mubr.bf16.mxu1 %v4130_v39  ;;  %2504 = vmatprep.mubr.bf16.mxu0 %v4132_v40  ;;  %v4163_v39 = vld [vmem:[%s6100_s0 + $0x514] ss:$28 sps:$4 sm:$0xff]   ;;  %v4166_v40 = vld [vmem:[%s6100_s0 + $0x19c] ss:$28 sps:$4 sm:$0xff]  }
 0x10b   :  { %v1922_v45 = vpop.f32.mrf.mxu0  ;;  %v2114_v46 = vpop.f32.mrf.mxu1 }
 0x10d   :  { %v4881_v47 = vpop.f32.mrf.mxu0  ;;  %v4883_v48 = vpop.f32.mrf.mxu1 }
 0x10f   :  { %v1925_v53 = vpop.f32.mrf.mxu0  ;;  %v2117_v54 = vpop.f32.mrf.mxu1 }
 0x110   :  { %v4161_v53 = vld [vmem:[%s6100_s0 + $0x510] ss:$28 sps:$4 sm:$0xff]   ;;  %v4164_v54 = vld [vmem:[%s6100_s0 + $0x198] ss:$28 sps:$4 sm:$0xff]  }
 0x111   :  { %v4897_v55 = vpop.f32.mrf.mxu0  ;;  %v4899_v56 = vpop.f32.mrf.mxu1  ;;  %2344 = vmatmul.mubr.bf16.gmra.mxu1 %v4134_v49  ;;  %2505 = vmatmul.mubr.bf16.gmra.mxu0 %v4135_v50 }
 0x112   :  { %2351 = vmatprep.mubr.bf16.mxu1 %v4136_v51  ;;  %2512 = vmatprep.mubr.bf16.mxu0 %v4138_v52 }
 0x113   :  { %v1930_v57 = vpop.f32.mrf.mxu0  ;;  %v2122_v58 = vpop.f32.mrf.mxu1 }
 0x114   :  { %v4169_v57 = vld [vmem:[%s6100_s0 + $0x54c] ss:$28 sps:$4 sm:$0xff]   ;;  %v4172_v58 = vld [vmem:[%s6100_s0 + $0x1d4] ss:$28 sps:$4 sm:$0xff]  }
 0x115   :  { %v4901_v59 = vpop.f32.mrf.mxu0  ;;  %v4903_v60 = vpop.f32.mrf.mxu1 }
 0x117   :  { %v1933_v2 = vpop.f32.mrf.mxu0  ;;  %v2125_v3 = vpop.f32.mrf.mxu1 }
 0x119   :  { %v4917_v4 = vpop.f32.mrf.mxu0  ;;  %v4919_v5 = vpop.f32.mrf.mxu1  ;;  %2352 = vmatmul.mubr.bf16.gmra.mxu1 %v4140_v61  ;;  %2513 = vmatmul.mubr.bf16.gmra.mxu0 %v4141_v62 }
 0x11a   :  { %2359 = vmatprep.mubr.bf16.mxu1 %v4144_v63  ;;  %2520 = vmatprep.mubr.bf16.mxu0 %v4147_v1 }
 0x11b   :  { %v1938_v6 = vpop.f32.mrf.mxu0  ;;  %v2130_v7 = vpop.f32.mrf.mxu1 }
 0x11c   :  { %v5004_v6 = vld [vmem:[%s6101_s2] ss:$0 sm:$0xff] }
 0x11d   :  { %v4921_v8 = vpop.f32.mrf.mxu0  ;;  %v4923_v9 = vpop.f32.mrf.mxu1 }
 0x11f   :  { %v1941_v14 = vpop.f32.mrf.mxu0  ;;  %v2133_v15 = vpop.f32.mrf.mxu1 }
 0x120   :  { %v4179_v14 = vld [vmem:[%s6100_s0 + $0x20c] ss:$28 sps:$4 sm:$0xff]  }
 0x121   :  { %v4937_v16 = vpop.f32.mrf.mxu0  ;;  %v4939_v17 = vpop.f32.mrf.mxu1  ;;  %2360 = vmatmul.mubr.bf16.gmra.mxu1 %v4142_v10  ;;  %2521 = vmatmul.mubr.bf16.gmra.mxu0 %v4145_v11  ;;  %v4167_v11 = vld [vmem:[%s6100_s0 + $0x548] ss:$28 sps:$4 sm:$0xff]  }
 0x122   :  { %2367 = vmatprep.mubr.bf16.mxu1 %v4151_v12  ;;  %2528 = vmatprep.mubr.bf16.mxu0 %v4154_v13  ;;  %v4170_v12 = vld [vmem:[%s6100_s0 + $0x1d0] ss:$28 sps:$4 sm:$0xff]   ;;  %v4176_v13 = vld [vmem:[%s6100_s0 + $0x584] ss:$28 sps:$4 sm:$0xff]  }
 0x123   :  { %v1946_v18 = vpop.f32.mrf.mxu0  ;;  %v2138_v19 = vpop.f32.mrf.mxu1 }
 0x124   :  { %v1913_v19 = vadd.f32 %v5004_v6, %v4857_v32  ;;  %v4174_v32 = vld [vmem:[%s6100_s0 + $0x580] ss:$28 sps:$4 sm:$0xff]  }
 0x125   :  { %v4941_v20 = vpop.f32.mrf.mxu0  ;;  %v4943_v21 = vpop.f32.mrf.mxu1 }
 0x126   :  { %6103 = vst [vmem:[#allocation2_spill] sm:$0xff] %v4943_v21 }
 0x127   :  { %v1949_v26 = vpop.f32.mrf.mxu0  ;;  %v2141_v27 = vpop.f32.mrf.mxu1 }
 0x128   :  { %v1916_v27 = vadd.f32 %v5004_v6, %v4861_v36  ;;  %v4185_v36 = vld [vmem:[%s6100_s0 + $0x244] ss:$28 sps:$4 sm:$0xff]  }
 0x129   :  { %v4957_v28 = vpop.f32.mrf.mxu0  ;;  %v4959_v29 = vpop.f32.mrf.mxu1  ;;  %2368 = vmatmul.mubr.bf16.gmra.mxu1 %v4149_v22  ;;  %2529 = vmatmul.mubr.bf16.gmra.mxu0 %v4152_v23 }
 0x12a   :  { %6104 = vst [vmem:[#allocation3_spill] sm:$0xff] %v4959_v29  ;;  %2375 = vmatprep.mubr.bf16.mxu1 %v4157_v24  ;;  %2536 = vmatprep.mubr.bf16.mxu0 %v4160_v25 }
 0x12b   :  { %v1954_v30 = vpop.f32.mrf.mxu0  ;;  %v2146_v31 = vpop.f32.mrf.mxu1 }
 0x12d   :  { %v4961_v34 = vpop.f32.mrf.mxu0  ;;  %v4963_v35 = vpop.f32.mrf.mxu1 }
 0x12e   :  { %6105 = vst [vmem:[#allocation4_spill] sm:$0xff] %v4963_v35 }
 0x12f   :  { %v1957_v41 = vpop.f32.mrf.mxu0  ;;  %v2149_v42 = vpop.f32.mrf.mxu1 }
 0x130   :  { %v1921_v42 = vadd.f32 %v5004_v6, %v4877_v43  ;;  %v4180_v43 = vld [vmem:[%s6100_s0 + $0x5b8] ss:$28 sps:$4 sm:$0xff]  }
 0x131   :  { %v4977_v45 = vpop.f32.mrf.mxu0  ;;  %v4979_v46 = vpop.f32.mrf.mxu1  ;;  %2376 = vmatmul.mubr.bf16.gmra.mxu1 %v4155_v0  ;;  %2537 = vmatmul.mubr.bf16.gmra.mxu0 %v4158_v38  ;;  %v4177_v0 = vld [vmem:[%s6100_s0 + $0x208] ss:$28 sps:$4 sm:$0xff]  }
 0x132   :  { %6106 = vst [vmem:[#allocation5_spill] sm:$0xff] %v4979_v46  ;;  %2383 = vmatprep.mubr.bf16.mxu1 %v4163_v39  ;;  %2544 = vmatprep.mubr.bf16.mxu0 %v4166_v40  ;;  %v4182_v39 = vld [vmem:[%s6100_s0 + $0x5bc] ss:$28 sps:$4 sm:$0xff]  }
 0x133   :  { %v1962_v49 = vpop.f32.mrf.mxu0  ;;  %v2154_v50 = vpop.f32.mrf.mxu1 }
 0x135   :  { %v4981_v51 = vpop.f32.mrf.mxu0  ;;  %v4983_v52 = vpop.f32.mrf.mxu1 }
 0x136   :  { %6107 = vst [vmem:[#allocation6_spill] sm:$0xff] %v4983_v52 }
 0x137   :  { %v1965_v61 = vpop.f32.mrf.mxu0  ;;  %v2157_v62 = vpop.f32.mrf.mxu1 }
 0x139   :  { %v4997_v63 = vpop.f32.mrf.mxu0  ;;  %v4999_v1 = vpop.f32.mrf.mxu1  ;;  %2384 = vmatmul.mubr.bf16.gmra.mxu1 %v4161_v53  ;;  %2545 = vmatmul.mubr.bf16.gmra.mxu0 %v4164_v54 }
 0x13a   :  { %6108 = vst [vmem:[#allocation7_spill] sm:$0xff] %v4999_v1  ;;  %2391 = vmatprep.mubr.bf16.mxu1 %v4169_v57  ;;  %2552 = vmatprep.mubr.bf16.mxu0 %v4172_v58  ;;  %v1924_v58 = vadd.f32 %v5004_v6, %v4881_v47  ;;  %v4191_v47 = vld [vmem:[%s6100_s0 + $0x27c] ss:$28 sps:$4 sm:$0xff]  }
 0x13b   :  { %v1970_v2 = vpop.f32.mrf.mxu0  ;;  %v2162_v3 = vpop.f32.mrf.mxu1 }
 0x13c   :  { %v4183_v2 = vld [vmem:[%s6100_s0 + $0x240] ss:$28 sps:$4 sm:$0xff]  }
 0x13d   :  { %v5006_v7 = vpop.f32.mrf.mxu0  ;;  %v5008_v10 = vpop.f32.mrf.mxu1 }
 0x13e   :  { %6109 = vst [vmem:[#allocation8_spill] sm:$0xff] %v5008_v10 }
 0x13f   :  { %v1973_v15 = vpop.f32.mrf.mxu0  ;;  %v2165_v18 = vpop.f32.mrf.mxu1 }
 0x141   :  { %v5024_v22 = vpop.f32.mrf.mxu0  ;;  %v2201_v23 = vpop.f32.mrf.mxu1  ;;  %2392 = vmatmul.mubr.bf16.gmra.mxu1 %v4167_v11  ;;  %2553 = vmatmul.mubr.bf16.gmra.mxu0 %v4170_v12  ;;  %v4188_v11 = vld [vmem:[%s6100_s0 + $0x5f4] ss:$28 sps:$4 sm:$0xff]  }
 0x142   :  { %v5026_v24 = vadd.f32 %v2201_v23, %v1913_v19  ;;  %2399 = vmatprep.mubr.bf16.mxu1 %v4176_v13  ;;  %2560 = vmatprep.mubr.bf16.mxu0 %v4179_v14  ;;  %v1929_v14 = vadd.f32 %v5004_v6, %v4897_v55  ;;  %v4186_v55 = vld [vmem:[%s6100_s0 + $0x5f0] ss:$28 sps:$4 sm:$0xff]  }
 0x143   :  { %v1978_v25 = vpop.f32.mrf.mxu0  ;;  %v2203_v26 = vpop.f32.mrf.mxu1 }
 0x144   :  { %v1932_v26 = vadd.f32 %v5004_v6, %v4901_v59  ;;  %v4197_v59 = vld [vmem:[%s6100_s0 + $0x2b4] ss:$28 sps:$4 sm:$0xff]  }
 0x145   :  { %v5030_v30 = vpop.f32.mrf.mxu0  ;;  %v2204_v31 = vpop.f32.mrf.mxu1 }
 0x146   :  { %v5038_v38 = vadd.f32 %v2204_v31, %v1916_v27 }
 0x147   :  { %v1981_v40 = vpop.f32.mrf.mxu0  ;;  %v2206_v41 = vpop.f32.mrf.mxu1 }
 0x148   :  { %v1937_v41 = vadd.f32 %v5004_v6, %v4917_v4  ;;  %v4192_v4 = vld [vmem:[%s6100_s0 + $0x628] ss:$28 sps:$4 sm:$0xff]  }
 0x149   :  { %v5048_v49 = vpop.f32.mrf.mxu0  ;;  %v2209_v50 = vpop.f32.mrf.mxu1  ;;  %2400 = vmatmul.mubr.bf16.gmra.mxu1 %v4174_v32  ;;  %2561 = vmatmul.mubr.bf16.gmra.mxu0 %v4177_v0  ;;  %v4189_v32 = vld [vmem:[%s6100_s0 + $0x278] ss:$28 sps:$4 sm:$0xff]  }
 0x14a   :  { %v5050_v53 = vadd.f32 %v2209_v50, %v1921_v42  ;;  %2407 = vmatprep.mubr.bf16.mxu1 %v4182_v39  ;;  %2568 = vmatprep.mubr.bf16.mxu0 %v4185_v36  ;;  %v4194_v39 = vld [vmem:[%s6100_s0 + $0x62c] ss:$28 sps:$4 sm:$0xff]  }
 0x14b   :  { %v1986_v54 = vpop.f32.mrf.mxu0  ;;  %v2211_v57 = vpop.f32.mrf.mxu1 }
 0x14d   :  { %v5054_v61 = vpop.f32.mrf.mxu0  ;;  %v2212_v62 = vpop.f32.mrf.mxu1 }
 0x14e   :  { %v5062_v3 = vadd.f32 %v2212_v62, %v1924_v58  ;;  %v1940_v62 = vadd.f32 %v5004_v6, %v4921_v8  ;;  %v4204_v8 = vld [vmem:[%s6100_s0 + $0x2ec] ss:$28 sps:$4 sm:$0xff]  }
 0x14f   :  { %v1989_v12 = vpop.f32.mrf.mxu0  ;;  %v2214_v13 = vpop.f32.mrf.mxu1 }
 0x150   :  { %v4201_v12 = vld [vmem:[%s6100_s0 + $0x664] ss:$28 sps:$4 sm:$0xff]  }
 0x151   :  { %v5072_v15 = vpop.f32.mrf.mxu0  ;;  %v2217_v18 = vpop.f32.mrf.mxu1  ;;  %2408 = vmatmul.mubr.bf16.gmra.mxu1 %v4180_v43  ;;  %2569 = vmatmul.mubr.bf16.gmra.mxu0 %v4183_v2 }
 0x152   :  { %v5074_v19 = vadd.f32 %v2217_v18, %v1929_v14  ;;  %2415 = vmatprep.mubr.bf16.mxu1 %v4188_v11  ;;  %2576 = vmatprep.mubr.bf16.mxu0 %v4191_v47  ;;  %v4195_v11 = vld [vmem:[%s6100_s0 + $0x2b0] ss:$28 sps:$4 sm:$0xff]   ;;  %v1945_v18 = vadd.f32 %v5004_v6, %v4937_v16  ;;  %v4199_v16 = vld [vmem:[%s6100_s0 + $0x660] ss:$28 sps:$4 sm:$0xff]  }
 0x153   :  { %v1994_v23 = vpop.f32.mrf.mxu0  ;;  %v2219_v25 = vpop.f32.mrf.mxu1 }
 0x155   :  { %v5078_v27 = vpop.f32.mrf.mxu0  ;;  %v2220_v31 = vpop.f32.mrf.mxu1 }
 0x156   :  { %v5086_v0 = vadd.f32 %v2220_v31, %v1932_v26  ;;  %v1996_v1 = vadd.f32 %v5004_v6, %v5078_v27  ;;  %v4240_v27 = vld [vmem:[%s6100_s0 + $0x1d8] ss:$28 sps:$4 sm:$0xff]  }
 0x157   :  { %v1997_v36 = vpop.f32.mrf.mxu0  ;;  %v2222_v40 = vpop.f32.mrf.mxu1 }
 0x158   :  { %v4202_v36 = vld [vmem:[%s6100_s0 + $0x2e8] ss:$28 sps:$4 sm:$0xff]  }
 0x159   :  { %v5096_v42 = vpop.f32.mrf.mxu0  ;;  %v2225_v50 = vpop.f32.mrf.mxu1  ;;  %2416 = vmatmul.mubr.bf16.gmra.mxu1 %v4186_v55  ;;  %2577 = vmatmul.mubr.bf16.gmra.mxu0 %v4189_v32  ;;  %v1948_v32 = vadd.f32 %v5004_v6, %v4941_v20  ;;  %v4210_v20 = vld [vmem:[%s6100_s0 + $0x324] ss:$28 sps:$4 sm:$0xff]  }
 0x15a   :  { %v5098_v54 = vadd.f32 %v2225_v50, %v1937_v41  ;;  %2423 = vmatprep.mubr.bf16.mxu1 %v4194_v39  ;;  %2584 = vmatprep.mubr.bf16.mxu0 %v4197_v59  ;;  %v4207_v41 = vld [vmem:[%s6100_s0 + $0x69c] ss:$28 sps:$4 sm:$0xff]  }
 0x15b   :  { %v2002_v57 = vpop.f32.mrf.mxu0  ;;  %v2227_v58 = vpop.f32.mrf.mxu1 }
 0x15c   :  { %v1953_v58 = vadd.f32 %v5004_v6, %v4957_v28  ;;  %v4205_v28 = vld [vmem:[%s6100_s0 + $0x698] ss:$28 sps:$4 sm:$0xff]  }
 0x15d   :  { %v5102_v43 = vpop.f32.mrf.mxu0  ;;  %v2228_v2 = vpop.f32.mrf.mxu1 }
 0x15e   :  { %v5110_v47 = vadd.f32 %v2228_v2, %v1940_v62  ;;  %v2004_v46 = vadd.f32 %v5004_v6, %v5102_v43  ;;  %v4245_v43 = vld [vmem:[%s6100_s0 + $0x248] ss:$28 sps:$4 sm:$0xff]  }
 0x15f   :  { %v2005_v13 = vpop.f32.mrf.mxu0  ;;  %v2230_v14 = vpop.f32.mrf.mxu1 }
 0x161   :  { %v5120_v23 = vpop.f32.mrf.mxu0  ;;  %v2233_v25 = vpop.f32.mrf.mxu1  ;;  %2424 = vmatmul.mubr.bf16.gmra.mxu1 %v4192_v4  ;;  %2585 = vmatmul.mubr.bf16.gmra.mxu0 %v4195_v11 }
 0x162   :  { %v5122_v26 = vadd.f32 %v2233_v25, %v1945_v18  ;;  %2431 = vmatprep.mubr.bf16.mxu1 %v4201_v12  ;;  %2592 = vmatprep.mubr.bf16.mxu0 %v4204_v8  ;;  %v1956_v8 = vadd.f32 %v5004_v6, %v4961_v34  ;;  %v4208_v18 = vld [vmem:[%s6100_s0 + $0x320] ss:$28 sps:$4 sm:$0xff]  }
 0x163   :  { %v2010_v31 = vpop.f32.mrf.mxu0  ;;  %v2235_v55 = vpop.f32.mrf.mxu1  ;;  %v4216_v34 = vld [vmem:[%s6100_s0 + $0x35c] ss:$28 sps:$4 sm:$0xff]  }
 0x164   :  { %v4213_v31 = vld [vmem:[%s6100_s0 + $0x6d4] ss:$28 sps:$4 sm:$0xff]  }
 0x165   :  { %v5126_v39 = vpop.f32.mrf.mxu0  ;;  %v2236_v59 = vpop.f32.mrf.mxu1 }
 0x166   :  { %v5134_v40 = vadd.f32 %v2236_v59, %v1948_v32  ;;  %v1961_v59 = vadd.f32 %v5004_v6, %v4977_v45  ;;  %v4211_v45 = vld [vmem:[%s6100_s0 + $0x6d0] ss:$28 sps:$4 sm:$0xff]   ;;  %v2012_v29 = vadd.f32 %v5004_v6, %v5126_v39  ;;  %v4250_v39 = vld [vmem:[%s6100_s0 + $0x2b8] ss:$28 sps:$4 sm:$0xff]  }
 0x167   :  { %v2013_v50 = vpop.f32.mrf.mxu0  ;;  %v2238_v57 = vpop.f32.mrf.mxu1 }
 0x168   :  { %v1964_v57 = vadd.f32 %v5004_v6, %v4981_v51  ;;  %v4220_v51 = vld [vmem:[%s6100_s0 + $0x18] ss:$28 sps:$4 sm:$0xff]  }
 0x169   :  { %v5144_v62 = vpop.f32.mrf.mxu0  ;;  %v2241_v2 = vpop.f32.mrf.mxu1  ;;  %2432 = vmatmul.mubr.bf16.gmra.mxu1 %v4199_v16  ;;  %2593 = vmatmul.mubr.bf16.gmra.mxu0 %v4202_v36 }
 0x16a   :  { %v5146_v4 = vadd.f32 %v2241_v2, %v1953_v58  ;;  %2439 = vmatprep.mubr.bf16.mxu1 %v4207_v41  ;;  %2600 = vmatprep.mubr.bf16.mxu0 %v4210_v20 }
 0x16b   :  { %v2018_v11 = vpop.f32.mrf.mxu0  ;;  %v2243_v12 = vpop.f32.mrf.mxu1 }
 0x16c   :  { %v4214_v11 = vld [vmem:[%s6100_s0 + $0x358] ss:$28 sps:$4 sm:$0xff]  }
 0x16d   :  { %v5150_v13 = vpop.f32.mrf.mxu0  ;;  %v2244_v14 = vpop.f32.mrf.mxu1 }
 0x16e   :  { %v5158_v25 = vadd.f32 %v2244_v14, %v1956_v8  ;;  %v4219_v8 = vld [vmem:[%s6100_s0 + $0x394] ss:$28 sps:$4 sm:$0xff]  }
 0x16f   :  { %v2021_v55 = vpop.f32.mrf.mxu0  ;;  %v2246_v32 = vpop.f32.mrf.mxu1 }
 0x171   :  { %v5168_v16 = vpop.f32.mrf.mxu0  ;;  %v2249_v36 = vpop.f32.mrf.mxu1  ;;  %2440 = vmatmul.mubr.bf16.gmra.mxu1 %v4205_v28  ;;  %2601 = vmatmul.mubr.bf16.gmra.mxu0 %v4208_v18  ;;  %v1969_v18 = vadd.f32 %v5004_v6, %v4997_v63  ;;  %v4217_v63 = vld [vmem:[%s6100_s0 + $0x390] ss:$28 sps:$4 sm:$0xff]  }
 0x172   :  { %v5170_v41 = vadd.f32 %v2249_v36, %v1961_v59  ;;  %2447 = vmatprep.mubr.bf16.mxu1 %v4213_v31  ;;  %2608 = vmatprep.mubr.bf16.mxu0 %v4216_v34  ;;  %v1972_v36 = vadd.f32 %v5004_v6, %v5006_v7  ;;  %v4225_v7 = vld [vmem:[%s6100_s0 + $0x88] ss:$28 sps:$4 sm:$0xff]  }
 0x173   :  { %v2026_v20 = vpop.f32.mrf.mxu0  ;;  %v2251_v50 = vpop.f32.mrf.mxu1 }
 0x175   :  { %v5174_v58 = vpop.f32.mrf.mxu0  ;;  %v2252_v2 = vpop.f32.mrf.mxu1 }
 0x176   :  { %v5182_v12 = vadd.f32 %v2252_v2, %v1964_v57  ;;  %v4221_v57 = vld [vmem:[%s6100_s0 + $0x50] ss:$28 sps:$4 sm:$0xff]  }
 0x177   :  { %v2029_v14 = vpop.f32.mrf.mxu0  ;;  %v2254_v28 = vpop.f32.mrf.mxu1 }
 0x179   :  { %v5192_v31 = vpop.f32.mrf.mxu0  ;;  %v2257_v34 = vpop.f32.mrf.mxu1  ;;  %2448 = vmatmul.mubr.bf16.gmra.mxu1 %v4211_v45  ;;  %2609 = vmatmul.mubr.bf16.gmra.mxu0 %v4214_v11  ;;  %v4224_v45 = vld [vmem:[%s6100_s0 + $0x3cc] ss:$28 sps:$4 sm:$0xff]  }
 0x17a   :  { %v5194_v55 = vadd.f32 %v2257_v34, %v1969_v18  ;;  %2616 = vmatprep.mubr.bf16.mxu0 %v4219_v8  ;;  %3824 = vmatprep.mubr.bf16.mxu1 %v4220_v51  ;;  %v1977_v51 = vadd.f32 %v5004_v6, %v5024_v22  ;;  %v4222_v22 = vld [vmem:[%s6100_s0 + $0x3c8] ss:$28 sps:$4 sm:$0xff]  }
 0x17b   :  { %v2034_v32 = vpop.f32.mrf.mxu0  ;;  %v2259_v59 = vpop.f32.mrf.mxu1 }
 0x17c   :  { %v1980_v59 = vadd.f32 %v5004_v6, %v5030_v30  ;;  %v4230_v30 = vld [vmem:[%s6100_s0 + $0xf8] ss:$28 sps:$4 sm:$0xff]  }
 0x17d   :  { %v5198_v20 = vpop.f32.mrf.mxu0  ;;  %v2260_v50 = vpop.f32.mrf.mxu1 }
 0x17e   :  { %v5206_v2 = vadd.f32 %v2260_v50, %v1972_v36 }
 0x17f   :  { %v2037_v11 = vpop.f32.mrf.mxu0  ;;  %v2262_v8 = vpop.f32.mrf.mxu1 }
 0x180   :  { %v1985_v8 = vadd.f32 %v5004_v6, %v5048_v49  ;;  %v4227_v49 = vld [vmem:[%s6100_s0 + $0x400] ss:$28 sps:$4 sm:$0xff]  }
 0x181   :  { %v5216_v14 = vpop.f32.mrf.mxu0  ;;  %v2265_v28 = vpop.f32.mrf.mxu1  ;;  %2617 = vmatmul.mubr.bf16.gmra.mxu0 %v4217_v63  ;;  %3825 = vmatmul.mubr.bf16.vlgmr.msra.gmra.mxu1 %v4221_v57  ;;  %v4226_v63 = vld [vmem:[%s6100_s0 + $0xc0] ss:$28 sps:$4 sm:$0xff]  }
 0x182   :  { %v5218_v18 = vadd.f32 %v2265_v28, %v1977_v51  ;;  %2624 = vmatprep.mubr.bf16.mxu0 %v4224_v45  ;;  %3828 = vmatprep.mubr.bf16.mxu1 %v4225_v7  ;;  %v4229_v45 = vld [vmem:[%s6100_s0 + $0x404] ss:$28 sps:$4 sm:$0xff]  }
 0x183   :  { %v2042_v34 = vpop.f32.mrf.mxu0  ;;  %v2267_v32 = vpop.f32.mrf.mxu1 }
 0x185   :  { %v5222_v36 = vpop.f32.mrf.mxu0  ;;  %v2268_v50 = vpop.f32.mrf.mxu1 }
 0x186   :  { %v5230_v57 = vadd.f32 %v2268_v50, %v1980_v59  ;;  %v1988_v50 = vadd.f32 %v5004_v6, %v5054_v61  ;;  %v4235_v61 = vld [vmem:[%s6100_s0 + $0x168] ss:$28 sps:$4 sm:$0xff]  }
 0x187   :  { %v2045_v7 = vpop.f32.mrf.mxu0  ;;  %v2270_v11 = vpop.f32.mrf.mxu1 }
 0x189   :  { %v5240_v51 = vpop.f32.mrf.mxu0  ;;  %v2273_v28 = vpop.f32.mrf.mxu1  ;;  %2625 = vmatmul.mubr.bf16.gmra.mxu0 %v4222_v22  ;;  %3829 = vmatmul.mubr.bf16.gmra.mxu1 %v4226_v63  ;;  %v4231_v22 = vld [vmem:[%s6100_s0 + $0x130] ss:$28 sps:$4 sm:$0xff]  }
 0x18a   :  { %v5242_v34 = vadd.f32 %v2273_v28, %v1985_v8  ;;  %2632 = vmatprep.mubr.bf16.mxu0 %v4229_v45  ;;  %3832 = vmatprep.mubr.bf16.mxu1 %v4230_v30  ;;  %v4234_v45 = vld [vmem:[%s6100_s0 + $0x43c] ss:$28 sps:$4 sm:$0xff]   ;;  %v1993_v8 = vadd.f32 %v5004_v6, %v5072_v15 }
 0x18b   :  { %v2050_v32 = vpop.f32.mrf.mxu0  ;;  %v2275_v59 = vpop.f32.mrf.mxu1  ;;  %v4232_v15 = vld [vmem:[%s6100_s0 + $0x438] ss:$28 sps:$4 sm:$0xff]  }
 0x18d   :  { %v5246_v10 = vpop.f32.mrf.mxu0  ;;  %v2276_v7 = vpop.f32.mrf.mxu1 }
 0x18e   :  { %v5254_v63 = vadd.f32 %v2276_v7, %v1988_v50 }
 0x18f   :  { %v2053_v30 = vpop.f32.mrf.mxu0  ;;  %v2278_v11 = vpop.f32.mrf.mxu1 }
 0x191   :  { %v5264_v28 = vpop.f32.mrf.mxu0  ;;  %v2281_v32 = vpop.f32.mrf.mxu1  ;;  %2633 = vmatmul.mubr.bf16.gmra.mxu0 %v4227_v49  ;;  %3833 = vmatmul.mubr.bf16.gmra.mxu1 %v4231_v22  ;;  %v4236_v49 = vld [vmem:[%s6100_s0 + $0x1a0] ss:$28 sps:$4 sm:$0xff]  }
 0x192   :  { %v5266_v59 = vadd.f32 %v2281_v32, %v1993_v8  ;;  %2640 = vmatprep.mubr.bf16.mxu0 %v4234_v45  ;;  %3836 = vmatprep.mubr.bf16.mxu1 %v4235_v61  ;;  %v4239_v45 = vld [vmem:[%s6100_s0 + $0x474] ss:$28 sps:$4 sm:$0xff]   ;;  %v2001_v8 = vadd.f32 %v5004_v6, %v5096_v42 }
 0x193   :  { %v2058_v50 = vpop.f32.mrf.mxu0  ;;  %v2283_v7 = vpop.f32.mrf.mxu1  ;;  %v4237_v42 = vld [vmem:[%s6100_s0 + $0x470] ss:$28 sps:$4 sm:$0xff]  }
 0x195   :  { %v5270_v52 = vpop.f32.mrf.mxu0  ;;  %v2284_v30 = vpop.f32.mrf.mxu1 }
 0x196   :  { %v5278_v22 = vadd.f32 %v2284_v30, %v1996_v1 }
 0x197   :  { %v2061_v61 = vpop.f32.mrf.mxu0  ;;  %v2286_v11 = vpop.f32.mrf.mxu1 }
 0x199   :  { %v5288_v32 = vpop.f32.mrf.mxu0  ;;  %v2289_v50 = vpop.f32.mrf.mxu1  ;;  %2641 = vmatmul.mubr.bf16.gmra.mxu0 %v4232_v15  ;;  %3837 = vmatmul.mubr.bf16.gmra.mxu1 %v4236_v49  ;;  %v4241_v15 = vld [vmem:[%s6100_s0 + $0x210] ss:$28 sps:$4 sm:$0xff]  }
 0x19a   :  { %v5290_v1 = vadd.f32 %v2289_v50, %v2001_v8  ;;  %2648 = vmatprep.mubr.bf16.mxu0 %v4239_v45  ;;  %3840 = vmatprep.mubr.bf16.mxu1 %v4240_v27  ;;  %v4244_v45 = vld [vmem:[%s6100_s0 + $0x4ac] ss:$28 sps:$4 sm:$0xff]   ;;  %v2009_v8 = vadd.f32 %v5004_v6, %v5120_v23 }
 0x19b   :  { %v2066_v7 = vpop.f32.mrf.mxu0  ;;  %v2291_v30 = vpop.f32.mrf.mxu1  ;;  %v4242_v23 = vld [vmem:[%s6100_s0 + $0x4a8] ss:$28 sps:$4 sm:$0xff]  }
 0x19d   :  { %v5294_v35 = vpop.f32.mrf.mxu0  ;;  %v2292_v61 = vpop.f32.mrf.mxu1 }
 0x19e   :  { %v5302_v49 = vadd.f32 %v2292_v61, %v2004_v46 }
 0x19f   :  { %v2069_v27 = vpop.f32.mrf.mxu0  ;;  %v2294_v11 = vpop.f32.mrf.mxu1 }
 0x1a1   :  { %v5312_v50 = vpop.f32.mrf.mxu0  ;;  %v2297_v7 = vpop.f32.mrf.mxu1  ;;  %2649 = vmatmul.mubr.bf16.gmra.mxu0 %v4237_v42  ;;  %3841 = vmatmul.mubr.bf16.gmra.mxu1 %v4241_v15  ;;  %v4246_v42 = vld [vmem:[%s6100_s0 + $0x280] ss:$28 sps:$4 sm:$0xff]  }
 0x1a2   :  { %v5314_v46 = vadd.f32 %v2297_v7, %v2009_v8  ;;  %2656 = vmatprep.mubr.bf16.mxu0 %v4244_v45  ;;  %3844 = vmatprep.mubr.bf16.mxu1 %v4245_v43  ;;  %v4249_v45 = vld [vmem:[%s6100_s0 + $0x4e4] ss:$28 sps:$4 sm:$0xff]   ;;  %v2017_v8 = vadd.f32 %v5004_v6, %v5144_v62 }
 0x1a3   :  { %v2074_v30 = vpop.f32.mrf.mxu0  ;;  %v2299_v61 = vpop.f32.mrf.mxu1  ;;  %v4247_v62 = vld [vmem:[%s6100_s0 + $0x4e0] ss:$28 sps:$4 sm:$0xff]  }
 0x1a4   :  { %6110 = vst [vmem:[#allocation9_spill] sm:$0xff] %v5314_v46 }
 0x1a5   :  { %v5318_v21 = vpop.f32.mrf.mxu0  ;;  %v2300_v27 = vpop.f32.mrf.mxu1 }
 0x1a6   :  { %v5326_v15 = vadd.f32 %v2300_v27, %v2012_v29 }
 0x1a7   :  { %v2077_v43 = vpop.f32.mrf.mxu0  ;;  %v2302_v11 = vpop.f32.mrf.mxu1 }
 0x1a8   :  { %6111 = vst [vmem:[#allocation10_spill] sm:$0xff] %v5326_v15  ;;  %v2020_v15 = vadd.f32 %v5004_v6, %v5150_v13  ;;  %v4255_v13 = vld [vmem:[%s6100_s0 + $0x328] ss:$28 sps:$4 sm:$0xff]  }
 0x1a9   :  { %v5336_v7 = vpop.f32.mrf.mxu0  ;;  %v2305_v30 = vpop.f32.mrf.mxu1  ;;  %2657 = vmatmul.mubr.bf16.gmra.mxu0 %v4242_v23  ;;  %3845 = vmatmul.mubr.bf16.gmra.mxu1 %v4246_v42  ;;  %v4251_v23 = vld [vmem:[%s6100_s0 + $0x2f0] ss:$28 sps:$4 sm:$0xff]  }
 0x1aa   :  { %v5338_v29 = vadd.f32 %v2305_v30, %v2017_v8  ;;  %2664 = vmatprep.mubr.bf16.mxu0 %v4249_v45  ;;  %3848 = vmatprep.mubr.bf16.mxu1 %v4250_v39  ;;  %v4254_v45 = vld [vmem:[%s6100_s0 + $0x51c] ss:$28 sps:$4 sm:$0xff]   ;;  %v2025_v8 = vadd.f32 %v5004_v6, %v5168_v16 }
 0x1ab   :  { %v2082_v61 = vpop.f32.mrf.mxu0  ;;  %v2307_v27 = vpop.f32.mrf.mxu1  ;;  %v4252_v16 = vld [vmem:[%s6100_s0 + $0x518] ss:$28 sps:$4 sm:$0xff]  }
 0x1ac   :  { %6112 = vst [vmem:[#allocation11_spill] sm:$0xff] %v5338_v29 }
 0x1ad   :  { %v5342_v46 = vpop.f32.mrf.mxu0  ;;  %v2308_v43 = vpop.f32.mrf.mxu1 }
 0x1ae   :  { %v5350_v42 = vadd.f32 %v2308_v43, %v2020_v15 }
 0x1af   :  { %v2085_v39 = vpop.f32.mrf.mxu0  ;;  %v2310_v11 = vpop.f32.mrf.mxu1 }
 0x1b0   :  { %6113 = vst [vmem:[#allocation12_spill] sm:$0xff] %v5350_v42  ;;  %v2028_v42 = vadd.f32 %v5004_v6, %v5174_v58  ;;  %v4260_v58 = vld [vmem:[%s6100_s0 + $0x398] ss:$28 sps:$4 sm:$0xff]  }
 0x1b1   :  { %v5360_v30 = vpop.f32.mrf.mxu0  ;;  %v2313_v61 = vpop.f32.mrf.mxu1  ;;  %2665 = vmatmul.mubr.bf16.gmra.mxu0 %v4247_v62  ;;  %3849 = vmatmul.mubr.bf16.gmra.mxu1 %v4251_v23  ;;  %v4256_v62 = vld [vmem:[%s6100_s0 + $0x360] ss:$28 sps:$4 sm:$0xff]  }
 0x1b2   :  { %v5362_v15 = vadd.f32 %v2313_v61, %v2025_v8  ;;  %2672 = vmatprep.mubr.bf16.mxu0 %v4254_v45  ;;  %3852 = vmatprep.mubr.bf16.mxu1 %v4255_v13  ;;  %v4259_v45 = vld [vmem:[%s6100_s0 + $0x554] ss:$28 sps:$4 sm:$0xff]   ;;  %v2033_v8 = vadd.f32 %v5004_v6, %v5192_v31 }
 0x1b3   :  { %v2090_v27 = vpop.f32.mrf.mxu0  ;;  %v2315_v43 = vpop.f32.mrf.mxu1  ;;  %v4257_v31 = vld [vmem:[%s6100_s0 + $0x550] ss:$28 sps:$4 sm:$0xff]  }
 0x1b4   :  { %6114 = vst [vmem:[#allocation13_spill] sm:$0xff] %v5362_v15 }
 0x1b5   :  { %v5366_v29 = vpop.f32.mrf.mxu0  ;;  %v2316_v39 = vpop.f32.mrf.mxu1 }
 0x1b6   :  { %v5374_v23 = vadd.f32 %v2316_v39, %v2028_v42 }
 0x1b7   :  { %v2093_v13 = vpop.f32.mrf.mxu0  ;;  %v2318_v11 = vpop.f32.mrf.mxu1 }
 0x1b8   :  { %6115 = vst [vmem:[#allocation14_spill] sm:$0xff] %v5374_v23  ;;  %v2036_v23 = vadd.f32 %v5004_v6, %v5198_v20  ;;  %v4265_v20 = vld [vmem:[%s6100_s0 + $0x408] ss:$28 sps:$4 sm:$0xff]  }
 0x1b9   :  { %v5384_v61 = vpop.f32.mrf.mxu0  ;;  %v2321_v27 = vpop.f32.mrf.mxu1  ;;  %2673 = vmatmul.mubr.bf16.gmra.mxu0 %v4252_v16  ;;  %3853 = vmatmul.mubr.bf16.gmra.mxu1 %v4256_v62  ;;  %v4261_v16 = vld [vmem:[%s6100_s0 + $0x3d0] ss:$28 sps:$4 sm:$0xff]  }
 0x1ba   :  { %v5386_v42 = vadd.f32 %v2321_v27, %v2033_v8  ;;  %2680 = vmatprep.mubr.bf16.mxu0 %v4259_v45  ;;  %3856 = vmatprep.mubr.bf16.mxu1 %v4260_v58  ;;  %v4264_v45 = vld [vmem:[%s6100_s0 + $0x58c] ss:$28 sps:$4 sm:$0xff]   ;;  %v2041_v8 = vadd.f32 %v5004_v6, %v5216_v14 }
 0x1bb   :  { %v2098_v43 = vpop.f32.mrf.mxu0  ;;  %v2323_v39 = vpop.f32.mrf.mxu1  ;;  %v4262_v14 = vld [vmem:[%s6100_s0 + $0x588] ss:$28 sps:$4 sm:$0xff]  }
 0x1bc   :  { %6116 = vst [vmem:[#allocation15_spill] sm:$0xff] %v5386_v42 }
 0x1bd   :  { %v5390_v15 = vpop.f32.mrf.mxu0  ;;  %v2324_v13 = vpop.f32.mrf.mxu1 }
 0x1be   :  { %v5398_v62 = vadd.f32 %v2324_v13, %v2036_v23 }
 0x1bf   :  { %v2101_v58 = vpop.f32.mrf.mxu0  ;;  %v2326_v11 = vpop.f32.mrf.mxu1 }
 0x1c0   :  { %6117 = vst [vmem:[#allocation16_spill] sm:$0xff] %v5398_v62  ;;  %v2044_v58 = vadd.f32 %v5004_v6, %v5222_v36  ;;  %v4270_v36 = vld [vmem:[%s6100_s0 + $0x478] ss:$28 sps:$4 sm:$0xff]  }
 0x1c1   :  { %v2329_v27 = vpop.f32.mrf.mxu1  ;;  %v2490_v43 = vpop.f32.mrf.mxu0  ;;  %2681 = vmatmul.mubr.bf16.gmra.mxu0 %v4257_v31  ;;  %3857 = vmatmul.mubr.bf16.gmra.mxu1 %v4261_v16  ;;  %v4266_v31 = vld [vmem:[%s6100_s0 + $0x440] ss:$28 sps:$4 sm:$0xff]  }
 0x1c2   :  { %v5408_v39 = vadd.f32 %v2329_v27, %v2041_v8  ;;  %v5411_v23 = vadd.f32 %v2490_v43, %v5026_v24  ;;  %2688 = vmatprep.mubr.bf16.mxu0 %v4264_v45  ;;  %3860 = vmatprep.mubr.bf16.mxu1 %v4265_v20  ;;  %v2049_v8 = vadd.f32 %v5004_v6, %v5240_v51  ;;  %v4267_v51 = vld [vmem:[%s6100_s0 + $0x5c0] ss:$28 sps:$4 sm:$0xff]  }
 0x1c3   :  { %v2331_v13 = vpop.f32.mrf.mxu1  ;;  %v2492_v62 = vpop.f32.mrf.mxu0 }
 0x1c4   :  { %v4269_v62 = vld [vmem:[%s6100_s0 + $0x5c4] ss:$28 sps:$4 sm:$0xff]  }
 0x1c5   :  { %v2332_v11 = vpop.f32.mrf.mxu1  ;;  %v2493_v42 = vpop.f32.mrf.mxu0 }
 0x1c6   :  { %v5421_v16 = vadd.f32 %v2332_v11, %v2044_v58  ;;  %v5424_v24 = vadd.f32 %v2493_v42, %v5038_v38  ;;  %v2052_v11 = vadd.f32 %v5004_v6, %v5246_v10  ;;  %v4275_v10 = vld [vmem:[%s6100_s0 + $0x4e8] ss:$28 sps:$4 sm:$0xff]  }
 0x1c7   :  { %v2334_v45 = vpop.f32.mrf.mxu1  ;;  %v2495_v20 = vpop.f32.mrf.mxu0 }
 0x1c9   :  { %v2337_v27 = vpop.f32.mrf.mxu1  ;;  %v2498_v43 = vpop.f32.mrf.mxu0  ;;  %2689 = vmatmul.mubr.bf16.gmra.mxu0 %v4262_v14  ;;  %3861 = vmatmul.mubr.bf16.gmra.mxu1 %v4266_v31  ;;  %v4271_v14 = vld [vmem:[%s6100_s0 + $0x4b0] ss:$28 sps:$4 sm:$0xff]  }
 0x1ca   :  { %v5434_v13 = vadd.f32 %v2337_v27, %v2049_v8  ;;  %v5437_v38 = vadd.f32 %v2498_v43, %v5050_v53  ;;  %2696 = vmatprep.mubr.bf16.mxu0 %v4269_v62  ;;  %3864 = vmatprep.mubr.bf16.mxu1 %v4270_v36  ;;  %v4274_v62 = vld [vmem:[%s6100_s0 + $0x5fc] ss:$28 sps:$4 sm:$0xff]   ;;  %v2057_v27 = vadd.f32 %v5004_v6, %v5264_v28 }
 0x1cb   :  { %v2339_v42 = vpop.f32.mrf.mxu1  ;;  %v2500_v58 = vpop.f32.mrf.mxu0  ;;  %v4272_v28 = vld [vmem:[%s6100_s0 + $0x5f8] ss:$28 sps:$4 sm:$0xff]  }
 0x1cd   :  { %v2340_v45 = vpop.f32.mrf.mxu1  ;;  %v2501_v20 = vpop.f32.mrf.mxu0 }
 0x1ce   :  { %v5447_v31 = vadd.f32 %v2340_v45, %v2052_v11  ;;  %v5450_v53 = vadd.f32 %v2501_v20, %v5062_v3  ;;  %v2060_v20 = vadd.f32 %v5004_v6, %v5270_v52  ;;  %v4280_v52 = vld [vmem:[%s6100_s0 + $0x558] ss:$28 sps:$4 sm:$0xff]  }
 0x1cf   :  { %v2342_v36 = vpop.f32.mrf.mxu1  ;;  %v2503_v8 = vpop.f32.mrf.mxu0 }
 0x1d1   :  { %v2345_v43 = vpop.f32.mrf.mxu1  ;;  %v2506_v42 = vpop.f32.mrf.mxu0  ;;  %2697 = vmatmul.mubr.bf16.gmra.mxu0 %v4267_v51  ;;  %3865 = vmatmul.mubr.bf16.gmra.mxu1 %v4271_v14  ;;  %v4276_v51 = vld [vmem:[%s6100_s0 + $0x520] ss:$28 sps:$4 sm:$0xff]  }
 0x1d2   :  { %v5460_v58 = vadd.f32 %v2345_v43, %v2057_v27  ;;  %v5463_v3 = vadd.f32 %v2506_v42, %v5074_v19  ;;  %2704 = vmatprep.mubr.bf16.mxu0 %v4274_v62  ;;  %3868 = vmatprep.mubr.bf16.mxu1 %v4275_v10  ;;  %v4279_v62 = vld [vmem:[%s6100_s0 + $0x634] ss:$28 sps:$4 sm:$0xff]   ;;  %v2065_v43 = vadd.f32 %v5004_v6, %v5288_v32 }
 0x1d3   :  { %v2347_v11 = vpop.f32.mrf.mxu1  ;;  %v2508_v45 = vpop.f32.mrf.mxu0  ;;  %v4277_v32 = vld [vmem:[%s6100_s0 + $0x630] ss:$28 sps:$4 sm:$0xff]  }
 0x1d5   :  { %v2348_v36 = vpop.f32.mrf.mxu1  ;;  %v2509_v8 = vpop.f32.mrf.mxu0 }
 0x1d6   :  { %v5473_v14 = vadd.f32 %v2348_v36, %v2060_v20  ;;  %v5476_v19 = vadd.f32 %v2509_v8, %v5086_v0  ;;  %v2068_v8 = vadd.f32 %v5004_v6, %v5294_v35  ;;  %v4285_v35 = vld [vmem:[%s6100_s0 + $0x5c8] ss:$28 sps:$4 sm:$0xff]  }
 0x1d7   :  { %v2350_v10 = vpop.f32.mrf.mxu1  ;;  %v2511_v27 = vpop.f32.mrf.mxu0 }
 0x1d9   :  { %v2353_v42 = vpop.f32.mrf.mxu1  ;;  %v2514_v11 = vpop.f32.mrf.mxu0  ;;  %2705 = vmatmul.mubr.bf16.gmra.mxu0 %v4272_v28  ;;  %3869 = vmatmul.mubr.bf16.gmra.mxu1 %v4276_v51  ;;  %v4281_v28 = vld [vmem:[%s6100_s0 + $0x590] ss:$28 sps:$4 sm:$0xff]  }
 0x1da   :  { %v5486_v45 = vadd.f32 %v2353_v42, %v2065_v43  ;;  %v5489_v0 = vadd.f32 %v2514_v11, %v5098_v54  ;;  %2712 = vmatprep.mubr.bf16.mxu0 %v4279_v62  ;;  %3872 = vmatprep.mubr.bf16.mxu1 %v4280_v52  ;;  %v4284_v62 = vld [vmem:[%s6100_s0 + $0x66c] ss:$28 sps:$4 sm:$0xff]   ;;  %v2073_v42 = vadd.f32 %v5004_v6, %v5312_v50 }
 0x1db   :  { %v2355_v20 = vpop.f32.mrf.mxu1  ;;  %v2516_v36 = vpop.f32.mrf.mxu0  ;;  %v4282_v50 = vld [vmem:[%s6100_s0 + $0x668] ss:$28 sps:$4 sm:$0xff]  }
 0x1dd   :  { %v2356_v10 = vpop.f32.mrf.mxu1  ;;  %v2517_v27 = vpop.f32.mrf.mxu0 }
 0x1de   :  { %v5499_v51 = vadd.f32 %v2356_v10, %v2068_v8  ;;  %v5502_v54 = vadd.f32 %v2517_v27, %v5110_v47  ;;  %v2076_v27 = vadd.f32 %v5004_v6, %v5318_v21  ;;  %v4290_v21 = vld [vmem:[%s6100_s0 + $0x638] ss:$28 sps:$4 sm:$0xff]  }
 0x1df   :  { %v2358_v52 = vpop.f32.mrf.mxu1  ;;  %v2519_v43 = vpop.f32.mrf.mxu0 }
 0x1e1   :  { %v2361_v11 = vpop.f32.mrf.mxu1  ;;  %v2522_v20 = vpop.f32.mrf.mxu0  ;;  %2713 = vmatmul.mubr.bf16.gmra.mxu0 %v4277_v32  ;;  %3873 = vmatmul.mubr.bf16.gmra.mxu1 %v4281_v28  ;;  %v4286_v32 = vld [vmem:[%s6100_s0 + $0x600] ss:$28 sps:$4 sm:$0xff]  }
 0x1e2   :  { %v5512_v36 = vadd.f32 %v2361_v11, %v2073_v42  ;;  %v5515_v47 = vadd.f32 %v2522_v20, %v5122_v26  ;;  %2720 = vmatprep.mubr.bf16.mxu0 %v4284_v62  ;;  %3876 = vmatprep.mubr.bf16.mxu1 %v4285_v35  ;;  %v4289_v62 = vld [vmem:[%s6100_s0 + $0x6a4] ss:$28 sps:$4 sm:$0xff]   ;;  %v2081_v11 = vadd.f32 %v5004_v6, %v5336_v7 }
 0x1e3   :  { %v2363_v8 = vpop.f32.mrf.mxu1  ;;  %v2524_v10 = vpop.f32.mrf.mxu0  ;;  %v4287_v7 = vld [vmem:[%s6100_s0 + $0x6a0] ss:$28 sps:$4 sm:$0xff]  }
 0x1e5   :  { %v2364_v52 = vpop.f32.mrf.mxu1  ;;  %v2525_v43 = vpop.f32.mrf.mxu0 }
 0x1e6   :  { %v5525_v28 = vadd.f32 %v2364_v52, %v2076_v27  ;;  %v5528_v26 = vadd.f32 %v2525_v43, %v5134_v40  ;;  %v2084_v43 = vadd.f32 %v5004_v6, %v5342_v46  ;;  %v4295_v46 = vld [vmem:[%s6100_s0 + $0x6a8] ss:$28 sps:$4 sm:$0xff]  }
 0x1e7   :  { %v2366_v35 = vpop.f32.mrf.mxu1  ;;  %v2527_v42 = vpop.f32.mrf.mxu0 }
 0x1e9   :  { %v2369_v20 = vpop.f32.mrf.mxu1  ;;  %v2530_v8 = vpop.f32.mrf.mxu0  ;;  %2721 = vmatmul.mubr.bf16.gmra.mxu0 %v4282_v50  ;;  %3877 = vmatmul.mubr.bf16.gmra.mxu1 %v4286_v32  ;;  %v4291_v50 = vld [vmem:[%s6100_s0 + $0x670] ss:$28 sps:$4 sm:$0xff]  }
 0x1ea   :  { %v5538_v10 = vadd.f32 %v2369_v20, %v2081_v11  ;;  %v5541_v40 = vadd.f32 %v2530_v8, %v5146_v4  ;;  %2728 = vmatprep.mubr.bf16.mxu0 %v4289_v62  ;;  %3880 = vmatprep.mubr.bf16.mxu1 %v4290_v21  ;;  %v4294_v62 = vld [vmem:[%s6100_s0 + $0x6dc] ss:$28 sps:$4 sm:$0xff]   ;;  %v2089_v20 = vadd.f32 %v5004_v6, %v5360_v30 }
 0x1eb   :  { %v2371_v27 = vpop.f32.mrf.mxu1  ;;  %v2532_v52 = vpop.f32.mrf.mxu0  ;;  %v4292_v30 = vld [vmem:[%s6100_s0 + $0x6d8] ss:$28 sps:$4 sm:$0xff]  }
 0x1ed   :  { %v2372_v35 = vpop.f32.mrf.mxu1  ;;  %v2533_v42 = vpop.f32.mrf.mxu0 }
 0x1ee   :  { %v5551_v32 = vadd.f32 %v2372_v35, %v2084_v43  ;;  %v5554_v4 = vadd.f32 %v2533_v42, %v5158_v25  ;;  %v2092_v42 = vadd.f32 %v5004_v6, %v5366_v29  ;;  %v2097_v29 = vadd.f32 %v5004_v6, %v5384_v61 }
 0x1ef   :  { %v2374_v21 = vpop.f32.mrf.mxu1  ;;  %v2535_v11 = vpop.f32.mrf.mxu0 }
 0x1f1   :  { %v2377_v8 = vpop.f32.mrf.mxu1  ;;  %v2538_v27 = vpop.f32.mrf.mxu0  ;;  %2729 = vmatmul.mubr.bf16.gmra.mxu0 %v4287_v7  ;;  %3881 = vmatmul.mubr.bf16.gmra.mxu1 %v4291_v50  ;;  %v4296_v7 = vld [vmem:[%s6100_s0 + $0x6e0] ss:$28 sps:$4 sm:$0xff]  }
 0x1f2   :  { %v5564_v52 = vadd.f32 %v2377_v8, %v2089_v20  ;;  %v5567_v25 = vadd.f32 %v2538_v27, %v5170_v41  ;;  %2736 = vmatprep.mubr.bf16.mxu0 %v4294_v62  ;;  %3884 = vmatprep.mubr.bf16.mxu1 %v4295_v46 }
 0x1f3   :  { %v2379_v43 = vpop.f32.mrf.mxu1  ;;  %v2540_v35 = vpop.f32.mrf.mxu0 }
 0x1f5   :  { %v2380_v21 = vpop.f32.mrf.mxu1  ;;  %v2541_v11 = vpop.f32.mrf.mxu0 }
 0x1f6   :  { %v5577_v50 = vadd.f32 %v2380_v21, %v2092_v42  ;;  %v5580_v41 = vadd.f32 %v2541_v11, %v5182_v12  ;;  %v2100_v12 = vadd.f32 %v5004_v6, %v5390_v15 }
 0x1f7   :  { %v2382_v62 = vpop.f32.mrf.mxu1  ;;  %v2543_v46 = vpop.f32.mrf.mxu0 }
 0x1f9   :  { %v2385_v20 = vpop.f32.mrf.mxu1  ;;  %v2546_v8 = vpop.f32.mrf.mxu0  ;;  %2737 = vmatmul.mubr.bf16.gmra.mxu0 %v4292_v30  ;;  %3885 = vmatmul.mubr.bf16.gmra.mxu1 %v4296_v7  ;;  %v2105_v7 = vadd.f32 %v5004_v6, %v4859_v33 }
 0x1fa   :  { %v5584_v27 = vadd.f32 %v2385_v20, %v2097_v29  ;;  %v5587_v43 = vadd.f32 %v2546_v8, %v5194_v55 }
 0x1fb   :  { %v2387_v35 = vpop.f32.mrf.mxu1  ;;  %v2548_v42 = vpop.f32.mrf.mxu0 }
 0x1fc   :  { %v2108_v42 = vadd.f32 %v5004_v6, %v4863_v37 }
 0x1fd   :  { %v2388_v21 = vpop.f32.mrf.mxu1  ;;  %v2549_v11 = vpop.f32.mrf.mxu0 }
 0x1fe   :  { %v5591_v62 = vadd.f32 %v2388_v21, %v2100_v12  ;;  %v5594_v61 = vadd.f32 %v2549_v11, %v5206_v2 }
 0x1ff   :  { %v2390_v46 = vpop.f32.mrf.mxu1  ;;  %v2551_v30 = vpop.f32.mrf.mxu0 }
 0x200   :  { %v2113_v30 = vadd.f32 %v5004_v6, %v4879_v44 }
 0x201   :  { %v2393_v29 = vpop.f32.mrf.mxu1  ;;  %v2554_v55 = vpop.f32.mrf.mxu0 }
 0x202   :  { %v5598_v20 = vadd.f32 %v2393_v29, %v2105_v7  ;;  %v5601_v8 = vadd.f32 %v2554_v55, %v5218_v18 }
 0x203   :  { %v2395_v15 = vpop.f32.mrf.mxu1  ;;  %v2556_v35 = vpop.f32.mrf.mxu0 }
 0x204   :  { %6118 = vst [vmem:[#allocation17_spill] sm:$0xff] %v5598_v20  ;;  %v5620_v35 = vld [vmem:[%s6101_s2] ss:$0 sm:$0xff]  ;;  %v6142_v20 = vld [vmem:[#allocation7_spill] sm:$0xff] }
 0x205   :  { %v2396_v12 = vpop.f32.mrf.mxu1  ;;  %v2557_v2 = vpop.f32.mrf.mxu0 }
 0x206   :  { %v5605_v21 = vadd.f32 %v2396_v12, %v2108_v42  ;;  %v5608_v11 = vadd.f32 %v2557_v2, %v5230_v57  ;;  %v2116_v57 = vadd.f32 %v5620_v35, %v4883_v48 }
 0x207   :  { %v2398_v33 = vpop.f32.mrf.mxu1  ;;  %v2559_v46 = vpop.f32.mrf.mxu0 }
 0x208   :  { %6119 = vst [vmem:[#allocation18_spill] sm:$0xff] %v5605_v21  ;;  %v2121_v33 = vadd.f32 %v5620_v35, %v4899_v56  ;;  %v6136_v21 = vld [vmem:[#allocation5_spill] sm:$0xff] }
 0x209   :  { %v2401_v7 = vpop.f32.mrf.mxu1  ;;  %v2562_v18 = vpop.f32.mrf.mxu0 }
 0x20a   :  { %v5612_v29 = vadd.f32 %v2401_v7, %v2113_v30  ;;  %v5615_v55 = vadd.f32 %v2562_v18, %v5242_v34 }
 0x20b   :  { %v2403_v37 = vpop.f32.mrf.mxu1  ;;  %v2564_v15 = vpop.f32.mrf.mxu0 }
 0x20c   :  { %v2124_v15 = vadd.f32 %v5620_v35, %v4903_v60 }
 0x20d   :  { %v2404_v42 = vpop.f32.mrf.mxu1  ;;  %v2565_v12 = vpop.f32.mrf.mxu0 }
 0x20e   :  { %v5624_v44 = vadd.f32 %v2404_v42, %v2116_v57  ;;  %v5627_v6 = vadd.f32 %v2565_v12, %v5254_v63 }
 0x20f   :  { %v2406_v2 = vpop.f32.mrf.mxu1  ;;  %v2567_v34 = vpop.f32.mrf.mxu0 }
 0x210   :  { %6120 = vst [vmem:[#allocation19_spill] sm:$0xff] %v5624_v44  ;;  %v2129_v34 = vadd.f32 %v5620_v35, %v4919_v5  ;;  %v6139_v44 = vld [vmem:[#allocation6_spill] sm:$0xff] }
 0x211   :  { %v2409_v46 = vpop.f32.mrf.mxu1  ;;  %v2570_v30 = vpop.f32.mrf.mxu0 }
 0x212   :  { %v5631_v7 = vadd.f32 %v2409_v46, %v2121_v33  ;;  %v5634_v18 = vadd.f32 %v2570_v30, %v5266_v59 }
 0x213   :  { %v2411_v48 = vpop.f32.mrf.mxu1  ;;  %v2572_v37 = vpop.f32.mrf.mxu0 }
 0x214   :  { %6121 = vst [vmem:[#allocation20_spill] sm:$0xff] %v5631_v7  ;;  %v2132_v37 = vadd.f32 %v5620_v35, %v4923_v9  ;;  %v6130_v7 = vld [vmem:[#allocation3_spill] sm:$0xff] }
 0x215   :  { %v2412_v57 = vpop.f32.mrf.mxu1  ;;  %v2573_v63 = vpop.f32.mrf.mxu0 }
 0x216   :  { %v5638_v42 = vadd.f32 %v2412_v57, %v2124_v15  ;;  %v5641_v12 = vadd.f32 %v2573_v63, %v5278_v22 }
 0x217   :  { %v2414_v56 = vpop.f32.mrf.mxu1  ;;  %v2575_v2 = vpop.f32.mrf.mxu0 }
 0x218   :  { %6122 = vst [vmem:[#allocation21_spill] sm:$0xff] %v5638_v42  ;;  %v2137_v2 = vadd.f32 %v5620_v35, %v4939_v17  ;;  %v6127_v42 = vld [vmem:[#allocation2_spill] sm:$0xff] }
 0x219   :  { %v2417_v33 = vpop.f32.mrf.mxu1  ;;  %v2578_v59 = vpop.f32.mrf.mxu0 }
 0x21a   :  { %v5645_v46 = vadd.f32 %v2417_v33, %v2129_v34  ;;  %v5648_v30 = vadd.f32 %v2578_v59, %v5290_v1  ;;  %v6126_v59 = vld [vmem:[#allocation9_spill] sm:$0xff] }
 0x21b   :  { %v2419_v60 = vpop.f32.mrf.mxu1  ;;  %v2580_v48 = vpop.f32.mrf.mxu0 }
 0x21c   :  { %6123 = vst [vmem:[#allocation22_spill] sm:$0xff] %v5645_v46  ;;  %v6133_v46 = vld [vmem:[#allocation4_spill] sm:$0xff] }
 0x21d   :  { %v2420_v15 = vpop.f32.mrf.mxu1  ;;  %v2581_v22 = vpop.f32.mrf.mxu0 }
 0x21e   :  { %v5652_v57 = vadd.f32 %v2420_v15, %v2132_v37  ;;  %v5655_v63 = vadd.f32 %v2581_v22, %v5302_v49  ;;  %v2140_v37 = vadd.f32 %v5620_v35, %v6127_v42 }
 0x21f   :  { %v2422_v5 = vpop.f32.mrf.mxu1  ;;  %v2583_v56 = vpop.f32.mrf.mxu0 }
 0x220   :  { %6124 = vst [vmem:[#allocation23_spill] sm:$0xff] %v5652_v57  ;;  %v6129_v5 = vld [vmem:[#allocation10_spill] sm:$0xff] }
 0x221   :  { %v2425_v34 = vpop.f32.mrf.mxu1  ;;  %v2586_v1 = vpop.f32.mrf.mxu0 }
 0x222   :  { %v5659_v33 = vadd.f32 %v2425_v34, %v2137_v2  ;;  %v5662_v60 = vadd.f32 %v2586_v1, %v6126_v59  ;;  %v2145_v2 = vadd.f32 %v5620_v35, %v6130_v7 }
 0x223   :  { %v2427_v9 = vpop.f32.mrf.mxu1  ;;  %v2588_v48 = vpop.f32.mrf.mxu0 }
 0x224   :  { %6125 = vst [vmem:[#allocation24_spill] sm:$0xff] %v5659_v33  ;;  %v6132_v9 = vld [vmem:[#allocation11_spill] sm:$0xff] }
 0x225   :  { %v2428_v15 = vpop.f32.mrf.mxu1  ;;  %v2589_v49 = vpop.f32.mrf.mxu0 }
 0x226   :  { %v5666_v22 = vadd.f32 %v2428_v15, %v2140_v37  ;;  %v5669_v56 = vadd.f32 %v2589_v49, %v6129_v5  ;;  %v2148_v37 = vadd.f32 %v5620_v35, %v6133_v46 }
 0x227   :  { %v2430_v17 = vpop.f32.mrf.mxu1  ;;  %v2591_v57 = vpop.f32.mrf.mxu0 }
 0x228   :  { %6128 = vst [vmem:[#allocation9_spill] sm:$0xff] %v5666_v22  ;;  %v6135_v57 = vld [vmem:[#allocation12_spill] sm:$0xff] }
 0x229   :  { %v2433_v34 = vpop.f32.mrf.mxu1  ;;  %v2594_v1 = vpop.f32.mrf.mxu0 }
 0x22a   :  { %v5673_v59 = vadd.f32 %v2433_v34, %v2145_v2  ;;  %v5676_v48 = vadd.f32 %v2594_v1, %v6132_v9  ;;  %v2153_v2 = vadd.f32 %v5620_v35, %v6136_v21 }
 0x22b   :  { %v2435_v42 = vpop.f32.mrf.mxu1  ;;  %v2596_v33 = vpop.f32.mrf.mxu0 }
 0x22c   :  { %6131 = vst [vmem:[#allocation2_spill] sm:$0xff] %v5673_v59  ;;  %v6138_v33 = vld [vmem:[#allocation13_spill] sm:$0xff] }
 0x22d   :  { %v2436_v15 = vpop.f32.mrf.mxu1  ;;  %v2597_v49 = vpop.f32.mrf.mxu0 }
 0x22e   :  { %v5680_v5 = vadd.f32 %v2436_v15, %v2148_v37  ;;  %v5683_v17 = vadd.f32 %v2597_v49, %v6135_v57  ;;  %v2156_v37 = vadd.f32 %v5620_v35, %v6139_v44  ;;  %v6144_v44 = vld [vmem:[#allocation8_spill] sm:$0xff] }
 0x22f   :  { %v2438_v7 = vpop.f32.mrf.mxu1  ;;  %v2599_v22 = vpop.f32.mrf.mxu0 }
 0x230   :  { %6134 = vst [vmem:[#allocation10_spill] sm:$0xff] %v5680_v5  ;;  %v6141_v22 = vld [vmem:[#allocation14_spill] sm:$0xff] }
 0x231   :  { %v2441_v34 = vpop.f32.mrf.mxu1  ;;  %v2602_v1 = vpop.f32.mrf.mxu0 }
 0x232   :  { %v5687_v9 = vadd.f32 %v2441_v34, %v2153_v2  ;;  %v5690_v42 = vadd.f32 %v2602_v1, %v6138_v33  ;;  %v2161_v2 = vadd.f32 %v5620_v35, %v6142_v20 }
 0x233   :  { %v2443_v46 = vpop.f32.mrf.mxu1  ;;  %v2604_v59 = vpop.f32.mrf.mxu0 }
 0x234   :  { %6137 = vst [vmem:[#allocation3_spill] sm:$0xff] %v5687_v9  ;;  %v2164_v9 = vadd.f32 %v5620_v35, %v6144_v44 }
 0x235   :  { %v2444_v15 = vpop.f32.mrf.mxu1  ;;  %v2605_v49 = vpop.f32.mrf.mxu0 }
 0x236   :  { %v5694_v57 = vadd.f32 %v2444_v15, %v2156_v37  ;;  %v5697_v7 = vadd.f32 %v2605_v49, %v6141_v22 }
 0x237   :  { %v2446_v21 = vpop.f32.mrf.mxu1  ;;  %v2607_v5 = vpop.f32.mrf.mxu0 }
 0x238   :  { %6140 = vst [vmem:[#allocation11_spill] sm:$0xff] %v5694_v57 }
 0x239   :  { %v2449_v34 = vpop.f32.mrf.mxu1  ;;  %v5701_v1 = vpop.f32.mrf.mxu0 }
 0x23a   :  { %v5703_v33 = vadd.f32 %v2449_v34, %v2161_v2 }
 0x23b   :  { %v2451_v59 = vpop.f32.mrf.mxu1  ;;  %v2612_v46 = vpop.f32.mrf.mxu0 }
 0x23c   :  { %6143 = vst [vmem:[#allocation4_spill] sm:$0xff] %v5703_v33 }
 0x23d   :  { %v2452_v37 = vpop.f32.mrf.mxu1  ;;  %v5707_v15 = vpop.f32.mrf.mxu0 }
 0x23e   :  { %v5709_v49 = vadd.f32 %v2452_v37, %v2164_v9 }
 0x23f   :  { %v2454_v22 = vpop.f32.mrf.mxu1  ;;  %v2615_v5 = vpop.f32.mrf.mxu0 }
 0x241   :  { %v2618_v21 = vpop.f32.mrf.mxu0  ;;  %v3826_v57 = vpop.f32.mrf.mxu1 }
 0x242   :  { %v5712_v20 = vadd.f32 %v2618_v21, %v5408_v39  ;;  %v2788_v2 = vadd.f32 %v3826_v57, %v5437_v38 }
 0x243   :  { %v2620_v34 = vpop.f32.mrf.mxu0  ;;  %v2779_v59 = vpop.f32.mrf.mxu1 }
 0x244   :  { %v3706_v46 = vpack.c.bf16 %v2788_v2, %v2788_v2  ;;  %v2780_v35 = vadd.f32 %v2779_v59, %v5411_v23 }
 0x245   :  { %v2621_v44 = vpop.f32.mrf.mxu0  ;;  %v3827_v33 = vpop.f32.mrf.mxu1 }
 0x246   :  { %3293 = vst.msk [vmem:[%s6102_s3 + $0x8] sm:$0xf] %vm3290_vm0, %v3706_v46  ;;  %v3704_v9 = vpack.c.bf16 %v2780_v35, %v2780_v35  ;;  %v5721_v37 = vadd.f32 %v2621_v44, %v5421_v16  ;;  %v2791_v39 = vadd.f32 %v3827_v33, %v5450_v53 }
 0x247   :  { %v2623_v38 = vpop.f32.mrf.mxu0  ;;  %v2782_v57 = vpop.f32.mrf.mxu1 }
 0x248   :  { %3291 = vst.msk [vmem:[%s6102_s3] sm:$0xf] %vm3290_vm0, %v3704_v9  ;;  %v3707_v23 = vpack.c.bf16 %v2791_v39, %v2791_v39  ;;  %v2783_v22 = vadd.f32 %v2782_v57, %v5424_v24 }
 0x249   :  { %v5729_v5 = vpop.f32.mrf.mxu0  ;;  %v3830_v21 = vpop.f32.mrf.mxu1 }
 0x24a   :  { %3294 = vst.msk [vmem:[%s6102_s3 + $0xc] sm:$0xf] %vm3290_vm0, %v3707_v23  ;;  %v3705_v16 = vpack.c.bf16 %v2783_v22, %v2783_v22  ;;  %v2804_v53 = vadd.f32 %v3830_v21, %v5489_v0 }
 0x24b   :  { %v2628_v33 = vpop.f32.mrf.mxu0  ;;  %v2795_v2 = vpop.f32.mrf.mxu1 }
 0x24c   :  { %3292 = vst.msk [vmem:[%s6102_s3 + $0x4] sm:$0xf] %vm3290_vm0, %v3705_v16  ;;  %v3710_v34 = vpack.c.bf16 %v2804_v53, %v2804_v53  ;;  %v2796_v24 = vadd.f32 %v2795_v2, %v5463_v3 }
 0x24d   :  { %v5741_v59 = vpop.f32.mrf.mxu0  ;;  %v3831_v46 = vpop.f32.mrf.mxu1 }
 0x24e   :  { %3297 = vst.msk [vmem:[%s6102_s3 + $0x18] sm:$0xf] %vm3290_vm0, %v3710_v34  ;;  %v3708_v35 = vpack.c.bf16 %v2796_v24, %v2796_v24  ;;  %v2807_v0 = vadd.f32 %v3831_v46, %v5502_v54 }
 0x24f   :  { %v2631_v44 = vpop.f32.mrf.mxu0  ;;  %v2798_v9 = vpop.f32.mrf.mxu1 }
 0x250   :  { %3295 = vst.msk [vmem:[%s6102_s3 + $0x10] sm:$0xf] %vm3290_vm0, %v3708_v35  ;;  %v3711_v39 = vpack.c.bf16 %v2807_v0, %v2807_v0  ;;  %v2799_v3 = vadd.f32 %v2798_v9, %v5476_v19 }
 0x251   :  { %v5753_v38 = vpop.f32.mrf.mxu0  ;;  %v3834_v57 = vpop.f32.mrf.mxu1 }
 0x252   :  { %3298 = vst.msk [vmem:[%s6102_s3 + $0x1c] sm:$0xf] %vm3290_vm0, %v3711_v39  ;;  %v3709_v23 = vpack.c.bf16 %v2799_v3, %v2799_v3  ;;  %v2820_v54 = vadd.f32 %v3834_v57, %v5541_v40 }
 0x253   :  { %v2636_v22 = vpop.f32.mrf.mxu0  ;;  %v2811_v21 = vpop.f32.mrf.mxu1 }
 0x254   :  { %3296 = vst.msk [vmem:[%s6102_s3 + $0x14] sm:$0xf] %vm3290_vm0, %v3709_v23  ;;  %v3714_v16 = vpack.c.bf16 %v2820_v54, %v2820_v54  ;;  %v2812_v19 = vadd.f32 %v2811_v21, %v5515_v47 }
 0x255   :  { %v5765_v53 = vpop.f32.mrf.mxu0  ;;  %v3835_v33 = vpop.f32.mrf.mxu1 }
 0x256   :  { %3301 = vst.msk [vmem:[%s6102_s3 + $0x28] sm:$0xf] %vm3290_vm0, %v3714_v16  ;;  %v3712_v2 = vpack.c.bf16 %v2812_v19, %v2812_v19  ;;  %v2823_v40 = vadd.f32 %v3835_v33, %v5554_v4 }
 0x257   :  { %v2639_v34 = vpop.f32.mrf.mxu0  ;;  %v2814_v24 = vpop.f32.mrf.mxu1 }
 0x258   :  { %3299 = vst.msk [vmem:[%s6102_s3 + $0x20] sm:$0xf] %vm3290_vm0, %v3712_v2  ;;  %v3715_v46 = vpack.c.bf16 %v2823_v40, %v2823_v40  ;;  %v2815_v47 = vadd.f32 %v2814_v24, %v5528_v26 }
 0x259   :  { %v5777_v35 = vpop.f32.mrf.mxu0  ;;  %v3838_v0 = vpop.f32.mrf.mxu1 }
 0x25a   :  { %3302 = vst.msk [vmem:[%s6102_s3 + $0x2c] sm:$0xf] %vm3290_vm0, %v3715_v46  ;;  %v3713_v44 = vpack.c.bf16 %v2815_v47, %v2815_v47  ;;  %v2836_v4 = vadd.f32 %v3838_v0, %v5587_v43 }
 0x25b   :  { %v2644_v9 = vpop.f32.mrf.mxu0  ;;  %v2827_v39 = vpop.f32.mrf.mxu1 }
 0x25c   :  { %3300 = vst.msk [vmem:[%s6102_s3 + $0x24] sm:$0xf] %vm3290_vm0, %v3713_v44  ;;  %v3718_v3 = vpack.c.bf16 %v2836_v4, %v2836_v4  ;;  %v2828_v26 = vadd.f32 %v2827_v39, %v5567_v25 }
 0x25d   :  { %v5789_v57 = vpop.f32.mrf.mxu0  ;;  %v3839_v23 = vpop.f32.mrf.mxu1 }
 0x25e   :  { %3305 = vst.msk [vmem:[%s6102_s3 + $0x38] sm:$0xf] %vm3290_vm0, %v3718_v3  ;;  %v3716_v54 = vpack.c.bf16 %v2828_v26, %v2828_v26  ;;  %v2839_v43 = vadd.f32 %v3839_v23, %v5594_v61 }
 0x25f   :  { %v2647_v22 = vpop.f32.mrf.mxu0  ;;  %v2830_v21 = vpop.f32.mrf.mxu1 }
 0x260   :  { %3303 = vst.msk [vmem:[%s6102_s3 + $0x30] sm:$0xf] %vm3290_vm0, %v3716_v54  ;;  %v3719_v16 = vpack.c.bf16 %v2839_v43, %v2839_v43  ;;  %v2831_v25 = vadd.f32 %v2830_v21, %v5580_v41 }
 0x261   :  { %v5801_v19 = vpop.f32.mrf.mxu0  ;;  %v3842_v33 = vpop.f32.mrf.mxu1 }
 0x262   :  { %3306 = vst.msk [vmem:[%s6102_s3 + $0x3c] sm:$0xf] %vm3290_vm0, %v3719_v16  ;;  %v3717_v2 = vpack.c.bf16 %v2831_v25, %v2831_v25  ;;  %v2852_v61 = vadd.f32 %v3842_v33, %v5615_v55 }
 0x263   :  { %v2652_v40 = vpop.f32.mrf.mxu0  ;;  %v2843_v34 = vpop.f32.mrf.mxu1 }
 0x264   :  { %3304 = vst.msk [vmem:[%s6102_s3 + $0x34] sm:$0xf] %vm3290_vm0, %v3717_v2  ;;  %v3722_v24 = vpack.c.bf16 %v2852_v61, %v2852_v61  ;;  %v2844_v41 = vadd.f32 %v2843_v34, %v5601_v8 }
 0x265   :  { %v5813_v46 = vpop.f32.mrf.mxu0  ;;  %v3843_v47 = vpop.f32.mrf.mxu1 }
 0x266   :  { %3309 = vst.msk [vmem:[%s6102_s3 + $0x48] sm:$0xf] %vm3290_vm0, %v3722_v24  ;;  %v3720_v0 = vpack.c.bf16 %v2844_v41, %v2844_v41  ;;  %v2855_v55 = vadd.f32 %v3843_v47, %v5627_v6 }
 0x267   :  { %v2655_v44 = vpop.f32.mrf.mxu0  ;;  %v2846_v4 = vpop.f32.mrf.mxu1 }
 0x268   :  { %3307 = vst.msk [vmem:[%s6102_s3 + $0x40] sm:$0xf] %vm3290_vm0, %v3720_v0  ;;  %v3723_v9 = vpack.c.bf16 %v2855_v55, %v2855_v55  ;;  %v2847_v8 = vadd.f32 %v2846_v4, %v5608_v11 }
 0x269   :  { %v5825_v39 = vpop.f32.mrf.mxu0  ;;  %v3846_v3 = vpop.f32.mrf.mxu1 }
 0x26a   :  { %3310 = vst.msk [vmem:[%s6102_s3 + $0x4c] sm:$0xf] %vm3290_vm0, %v3723_v9  ;;  %v3721_v26 = vpack.c.bf16 %v2847_v8, %v2847_v8  ;;  %v2868_v6 = vadd.f32 %v3846_v3, %v5648_v30  ;;  %v6145_v8 = vld [vmem:[#allocation15_spill] sm:$0xff] }
 0x26b   :  { %v2660_v23 = vpop.f32.mrf.mxu0  ;;  %v2859_v54 = vpop.f32.mrf.mxu1  ;;  %v2611_v3 = vadd.f32 %v5701_v1, %v6145_v8 }
 0x26c   :  { %3308 = vst.msk [vmem:[%s6102_s3 + $0x44] sm:$0xf] %vm3290_vm0, %v3721_v26  ;;  %v3726_v43 = vpack.c.bf16 %v2868_v6, %v2868_v6  ;;  %v2860_v11 = vadd.f32 %v2859_v54, %v5634_v18 }
 0x26d   :  { %v5837_v22 = vpop.f32.mrf.mxu0  ;;  %v3847_v21 = vpop.f32.mrf.mxu1 }
 0x26e   :  { %3313 = vst.msk [vmem:[%s6102_s3 + $0x58] sm:$0xf] %vm3290_vm0, %v3726_v43  ;;  %v3724_v16 = vpack.c.bf16 %v2860_v11, %v2860_v11  ;;  %v2871_v30 = vadd.f32 %v3847_v21, %v5655_v63  ;;  %v6146_v11 = vld [vmem:[#allocation16_spill] sm:$0xff] }
 0x26f   :  { %v2663_v25 = vpop.f32.mrf.mxu0  ;;  %v2862_v33 = vpop.f32.mrf.mxu1  ;;  %v2614_v21 = vadd.f32 %v5707_v15, %v6146_v11  ;;  %v2638_v11 = vadd.f32 %v5765_v53, %v5473_v14 }
 0x270   :  { %3311 = vst.msk [vmem:[%s6102_s3 + $0x50] sm:$0xf] %vm3290_vm0, %v3724_v16  ;;  %v3727_v2 = vpack.c.bf16 %v2871_v30, %v2871_v30  ;;  %v2863_v18 = vadd.f32 %v2862_v33, %v5641_v12 }
 0x271   :  { %v5849_v61 = vpop.f32.mrf.mxu0  ;;  %v3850_v40 = vpop.f32.mrf.mxu1 }
 0x272   :  { %3314 = vst.msk [vmem:[%s6102_s3 + $0x5c] sm:$0xf] %vm3290_vm0, %v3727_v2  ;;  %v3725_v34 = vpack.c.bf16 %v2863_v18, %v2863_v18  ;;  %v2884_v63 = vadd.f32 %v3850_v40, %v5676_v48  ;;  %v2627_v40 = vadd.f32 %v5729_v5, %v5434_v13  ;;  %v2630_v5 = vadd.f32 %v5741_v59, %v5447_v31 }
 0x273   :  { %v2668_v24 = vpop.f32.mrf.mxu0  ;;  %v2875_v41 = vpop.f32.mrf.mxu1  ;;  %v2643_v59 = vadd.f32 %v5777_v35, %v5486_v45 }
 0x274   :  { %3312 = vst.msk [vmem:[%s6102_s3 + $0x54] sm:$0xf] %vm3290_vm0, %v3725_v34  ;;  %v3730_v47 = vpack.c.bf16 %v2884_v63, %v2884_v63  ;;  %v2876_v12 = vadd.f32 %v2875_v41, %v5662_v60 }
 0x275   :  { %v5861_v0 = vpop.f32.mrf.mxu0  ;;  %v3851_v55 = vpop.f32.mrf.mxu1 }
 0x276   :  { %3317 = vst.msk [vmem:[%s6102_s3 + $0x68] sm:$0xf] %vm3290_vm0, %v3730_v47  ;;  %v3728_v44 = vpack.c.bf16 %v2876_v12, %v2876_v12  ;;  %v2887_v48 = vadd.f32 %v3851_v55, %v5683_v17 }
 0x277   :  { %v2671_v4 = vpop.f32.mrf.mxu0  ;;  %v2878_v9 = vpop.f32.mrf.mxu1 }
 0x278   :  { %3315 = vst.msk [vmem:[%s6102_s3 + $0x60] sm:$0xf] %vm3290_vm0, %v3728_v44  ;;  %v3731_v60 = vpack.c.bf16 %v2887_v48, %v2887_v48  ;;  %v2879_v26 = vadd.f32 %v2878_v9, %v5669_v56 }
 0x279   :  { %v5875_v6 = vpop.f32.mrf.mxu0  ;;  %v3854_v23 = vpop.f32.mrf.mxu1 }
 0x27a   :  { %3318 = vst.msk [vmem:[%s6102_s3 + $0x6c] sm:$0xf] %vm3290_vm0, %v3731_v60  ;;  %v3729_v17 = vpack.c.bf16 %v2879_v26, %v2879_v26  ;;  %v2900_v54 = vadd.f32 %v3854_v23, %v2611_v3  ;;  %v2635_v23 = vadd.f32 %v5753_v38, %v5460_v58 }
 0x27b   :  { %v2676_v43 = vpop.f32.mrf.mxu0  ;;  %v2891_v1 = vpop.f32.mrf.mxu1 }
 0x27c   :  { %3316 = vst.msk [vmem:[%s6102_s3 + $0x64] sm:$0xf] %vm3290_vm0, %v3729_v17  ;;  %v3734_v56 = vpack.c.bf16 %v2900_v54, %v2900_v54  ;;  %v2892_v16 = vadd.f32 %v2891_v1, %v5690_v42  ;;  %v2646_v43 = vadd.f32 %v5789_v57, %v5499_v51 }
 0x27d   :  { %v5888_v30 = vpop.f32.mrf.mxu0  ;;  %v3855_v25 = vpop.f32.mrf.mxu1 }
 0x27e   :  { %3321 = vst.msk [vmem:[%s6102_s3 + $0x78] sm:$0xf] %vm3290_vm0, %v3734_v56  ;;  %v3732_v33 = vpack.c.bf16 %v2892_v16, %v2892_v16  ;;  %v2903_v2 = vadd.f32 %v3855_v25, %v2614_v21  ;;  %v2659_v16 = vadd.f32 %v5825_v39, %v5538_v10 }
 0x27f   :  { %v2679_v18 = vpop.f32.mrf.mxu0  ;;  %v2894_v15 = vpop.f32.mrf.mxu1 }
 0x280   :  { %3319 = vst.msk [vmem:[%s6102_s3 + $0x70] sm:$0xf] %vm3290_vm0, %v3732_v33  ;;  %v3735_v42 = vpack.c.bf16 %v2903_v2, %v2903_v2  ;;  %v2895_v34 = vadd.f32 %v2894_v15, %v5697_v7  ;;  %v2651_v2 = vadd.f32 %v5801_v19, %v5512_v36 }
 0x281   :  { %v5901_v63 = vpop.f32.mrf.mxu0  ;;  %v3858_v24 = vpop.f32.mrf.mxu1 }
 0x282   :  { %3322 = vst.msk [vmem:[%s6102_s3 + $0x7c] sm:$0xf] %vm3290_vm0, %v3735_v42  ;;  %v3733_v41 = vpack.c.bf16 %v2895_v34, %v2895_v34  ;;  %v2916_v47 = vadd.f32 %v3858_v24, %v2627_v40  ;;  %v2662_v40 = vadd.f32 %v5837_v22, %v5551_v32  ;;  %v2654_v24 = vadd.f32 %v5813_v46, %v5525_v28 }
 0x283   :  { %v2684_v12 = vpop.f32.mrf.mxu0  ;;  %v2907_v13 = vpop.f32.mrf.mxu1 }
 0x284   :  { %3320 = vst.msk [vmem:[%s6102_s3 + $0x74] sm:$0xf] %vm3290_vm0, %v3733_v41  ;;  %v3738_v7 = vpack.c.bf16 %v2916_v47, %v2916_v47  ;;  %v2908_v55 = vadd.f32 %v2907_v13, %v5712_v20  ;;  %v2675_v12 = vadd.f32 %v5875_v6, %v5584_v27 }
 0x285   :  { %v5914_v44 = vpop.f32.mrf.mxu0  ;;  %v3859_v48 = vpop.f32.mrf.mxu1 }
 0x286   :  { %3325 = vst.msk [vmem:[%s6102_s3 + $0x88] sm:$0xf] %vm3290_vm0, %v3738_v7  ;;  %v3736_v4 = vpack.c.bf16 %v2908_v55, %v2908_v55  ;;  %v2919_v9 = vadd.f32 %v3859_v48, %v2630_v5  ;;  %v2667_v7 = vadd.f32 %v5849_v61, %v5564_v52 }
 0x287   :  { %v2687_v8 = vpop.f32.mrf.mxu0  ;;  %v2910_v31 = vpop.f32.mrf.mxu1 }
 0x288   :  { %3323 = vst.msk [vmem:[%s6102_s3 + $0x80] sm:$0xf] %vm3290_vm0, %v3736_v4  ;;  %v3739_v20 = vpack.c.bf16 %v2919_v9, %v2919_v9  ;;  %v2911_v3 = vadd.f32 %v2910_v31, %v5721_v37  ;;  %v2678_v4 = vadd.f32 %v5888_v30, %v5591_v62  ;;  %v2670_v31 = vadd.f32 %v5861_v0, %v5577_v50 }
 0x289   :  { %v5927_v60 = vpop.f32.mrf.mxu0  ;;  %v3862_v26 = vpop.f32.mrf.mxu1 }
 0x28a   :  { %3326 = vst.msk [vmem:[%s6102_s3 + $0x8c] sm:$0xf] %vm3290_vm0, %v3739_v20  ;;  %v3737_v45 = vpack.c.bf16 %v2911_v3, %v2911_v3  ;;  %v2932_v35 = vadd.f32 %v3862_v26, %v2643_v59  ;;  %v2691_v3 = vadd.f32 %v5927_v60, %v5612_v29 }
 0x28b   :  { %v2692_v17 = vpop.f32.mrf.mxu0  ;;  %v2923_v54 = vpop.f32.mrf.mxu1 }
 0x28c   :  { %3324 = vst.msk [vmem:[%s6102_s3 + $0x84] sm:$0xf] %vm3290_vm0, %v3737_v45  ;;  %v3742_v37 = vpack.c.bf16 %v2932_v35, %v2932_v35  ;;  %v2924_v1 = vadd.f32 %v2923_v54, %v2635_v23  ;;  %v6147_v45 = vld [vmem:[#allocation17_spill] sm:$0xff] }
 0x28d   :  { %v5941_v58 = vpop.f32.mrf.mxu0  ;;  %v3863_v38 = vpop.f32.mrf.mxu1  ;;  %v2683_v35 = vadd.f32 %v5901_v63, %v6147_v45 }
 0x28e   :  { %3329 = vst.msk [vmem:[%s6102_s3 + $0x98] sm:$0xf] %vm3290_vm0, %v3742_v37  ;;  %v3740_v21 = vpack.c.bf16 %v2924_v1, %v2924_v1  ;;  %v2935_v51 = vadd.f32 %v3863_v38, %v2646_v43  ;;  %v6148_v43 = vld [vmem:[#allocation19_spill] sm:$0xff] }
 0x28f   :  { %v2695_v57 = vpop.f32.mrf.mxu0  ;;  %v2926_v56 = vpop.f32.mrf.mxu1  ;;  %v2694_v37 = vadd.f32 %v5941_v58, %v6148_v43 }
 0x290   :  { %3327 = vst.msk [vmem:[%s6102_s3 + $0x90] sm:$0xf] %vm3290_vm0, %v3740_v21  ;;  %v3743_v25 = vpack.c.bf16 %v2935_v51, %v2935_v51  ;;  %v2927_v33 = vadd.f32 %v2926_v56, %v2638_v11  ;;  %v6149_v21 = vld [vmem:[#allocation18_spill] sm:$0xff] }
 0x291   :  { %v5955_v14 = vpop.f32.mrf.mxu0  ;;  %v3866_v53 = vpop.f32.mrf.mxu1  ;;  %v2686_v51 = vadd.f32 %v5914_v44, %v6149_v21 }
 0x292   :  { %3330 = vst.msk [vmem:[%s6102_s3 + $0x9c] sm:$0xf] %vm3290_vm0, %v3743_v25  ;;  %v3741_v18 = vpack.c.bf16 %v2927_v33, %v2927_v33  ;;  %v2948_v10 = vadd.f32 %v3866_v53, %v2659_v16  ;;  %v6150_v25 = vld [vmem:[#allocation22_spill] sm:$0xff] }
 0x293   :  { %v2700_v39 = vpop.f32.mrf.mxu0  ;;  %v2939_v15 = vpop.f32.mrf.mxu1 }
 0x294   :  { %3328 = vst.msk [vmem:[%s6102_s3 + $0x94] sm:$0xf] %vm3290_vm0, %v3741_v18  ;;  %v3746_v42 = vpack.c.bf16 %v2948_v10, %v2948_v10  ;;  %v2940_v34 = vadd.f32 %v2939_v15, %v2651_v2  ;;  %v6151_v10 = vld [vmem:[#allocation20_spill] sm:$0xff] }
 0x295   :  { %v5969_v36 = vpop.f32.mrf.mxu0  ;;  %v3867_v19 = vpop.f32.mrf.mxu1  ;;  %v2699_v39 = vadd.f32 %v5955_v14, %v6151_v10 }
 0x296   :  { %3333 = vst.msk [vmem:[%s6102_s3 + $0xa8] sm:$0xf] %vm3290_vm0, %v3746_v42  ;;  %v3744_v41 = vpack.c.bf16 %v2940_v34, %v2940_v34  ;;  %v2951_v32 = vadd.f32 %v3867_v19, %v2662_v40  ;;  %v6152_v19 = vld [vmem:[#allocation23_spill] sm:$0xff] }
 0x297   :  { %v2703_v22 = vpop.f32.mrf.mxu0  ;;  %v2942_v47 = vpop.f32.mrf.mxu1 }
 0x298   :  { %3331 = vst.msk [vmem:[%s6102_s3 + $0xa0] sm:$0xf] %vm3290_vm0, %v3744_v41  ;;  %v3747_v13 = vpack.c.bf16 %v2951_v32, %v2951_v32  ;;  %v2943_v5 = vadd.f32 %v2942_v47, %v2654_v24  ;;  %v6153_v47 = vld [vmem:[#allocation21_spill] sm:$0xff] }
 0x299   :  { %v2706_v28 = vpop.f32.mrf.mxu0  ;;  %v3870_v46 = vpop.f32.mrf.mxu1 }
 0x29a   :  { %3334 = vst.msk [vmem:[%s6102_s3 + $0xac] sm:$0xf] %vm3290_vm0, %v3747_v13  ;;  %v3745_v55 = vpack.c.bf16 %v2943_v5, %v2943_v5  ;;  %v2964_v48 = vadd.f32 %v3870_v46, %v2675_v12  ;;  %v2707_v33 = vadd.f32 %v2706_v28, %v6150_v25  ;;  %v2702_v12 = vadd.f32 %v5969_v36, %v6153_v47  ;;  %v6160_v25 = vld [vmem:[#allocation11_spill] sm:$0xff] }
 0x29b   :  { %v2708_v27 = vpop.f32.mrf.mxu0  ;;  %v2955_v6 = vpop.f32.mrf.mxu1 }
 0x29c   :  { %3332 = vst.msk [vmem:[%s6102_s3 + $0xa4] sm:$0xf] %vm3290_vm0, %v3745_v55  ;;  %v3750_v9 = vpack.c.bf16 %v2964_v48, %v2964_v48  ;;  %v2956_v8 = vadd.f32 %v2955_v6, %v2667_v7  ;;  %v6154_v7 = vld [vmem:[#allocation2_spill] sm:$0xff] }
 0x29d   :  { %v2709_v52 = vpop.f32.mrf.mxu0  ;;  %v3871_v61 = vpop.f32.mrf.mxu1 }
 0x29e   :  { %3337 = vst.msk [vmem:[%s6102_s3 + $0xb8] sm:$0xf] %vm3290_vm0, %v3750_v9  ;;  %v3748_v59 = vpack.c.bf16 %v2956_v8, %v2956_v8  ;;  %v2967_v20 = vadd.f32 %v3871_v61, %v2678_v4  ;;  %v2710_v24 = vadd.f32 %v2709_v52, %v6152_v19  ;;  %v6155_v4 = vld [vmem:[#allocation24_spill] sm:$0xff] }
 0x29f   :  { %v2711_v62 = vpop.f32.mrf.mxu0  ;;  %v2958_v30 = vpop.f32.mrf.mxu1 }
 0x2a0   :  { %3335 = vst.msk [vmem:[%s6102_s3 + $0xb0] sm:$0xf] %vm3290_vm0, %v3748_v59  ;;  %v3751_v26 = vpack.c.bf16 %v2967_v20, %v2967_v20  ;;  %v2959_v23 = vadd.f32 %v2958_v30, %v2670_v31  ;;  %v6156_v59 = vld [vmem:[#allocation10_spill] sm:$0xff] }
 0x2a1   :  { %v2714_v50 = vpop.f32.mrf.mxu0  ;;  %v3874_v0 = vpop.f32.mrf.mxu1 }
 0x2a2   :  { %3338 = vst.msk [vmem:[%s6102_s3 + $0xbc] sm:$0xf] %vm3290_vm0, %v3751_v26  ;;  %v3749_v17 = vpack.c.bf16 %v2959_v23, %v2959_v23  ;;  %v2980_v54 = vadd.f32 %v3874_v0, %v2691_v3  ;;  %v2715_v9 = vadd.f32 %v2714_v50, %v6155_v4  ;;  %v6157_v23 = vld [vmem:[#allocation9_spill] sm:$0xff] }
 0x2a3   :  { %v2716_v29 = vpop.f32.mrf.mxu0  ;;  %v2971_v60 = vpop.f32.mrf.mxu1 }
 0x2a4   :  { %3336 = vst.msk [vmem:[%s6102_s3 + $0xb4] sm:$0xf] %vm3290_vm0, %v3749_v17  ;;  %v3754_v1 = vpack.c.bf16 %v2980_v54, %v2980_v54  ;;  %v2972_v38 = vadd.f32 %v2971_v60, %v2683_v35 }
 0x2a5   :  { %v2717_v63 = vpop.f32.mrf.mxu0  ;;  %v3875_v11 = vpop.f32.mrf.mxu1 }
 0x2a6   :  { %3341 = vst.msk [vmem:[%s6102_s3 + $0xc8] sm:$0xf] %vm3290_vm0, %v3754_v1  ;;  %v3752_v57 = vpack.c.bf16 %v2972_v38, %v2972_v38  ;;  %v2983_v56 = vadd.f32 %v3875_v11, %v2694_v37  ;;  %v2718_v50 = vadd.f32 %v2717_v63, %v6157_v23  ;;  %v6158_v37 = vld [vmem:[#allocation3_spill] sm:$0xff]  ;;  %v6159_v63 = vld [vmem:[#allocation4_spill] sm:$0xff] }
 0x2a7   :  { %v2719_v58 = vpop.f32.mrf.mxu0  ;;  %v2974_v16 = vpop.f32.mrf.mxu1 }
 0x2a8   :  { %3339 = vst.msk [vmem:[%s6102_s3 + $0xc0] sm:$0xf] %vm3290_vm0, %v3752_v57  ;;  %v3755_v53 = vpack.c.bf16 %v2983_v56, %v2983_v56  ;;  %v2975_v2 = vadd.f32 %v2974_v16, %v2686_v51 }
 0x2a9   :  { %v2722_v18 = vpop.f32.mrf.mxu0  ;;  %v3878_v44 = vpop.f32.mrf.mxu1 }
 0x2aa   :  { %3342 = vst.msk [vmem:[%s6102_s3 + $0xcc] sm:$0xf] %vm3290_vm0, %v3755_v53  ;;  %v3753_v15 = vpack.c.bf16 %v2975_v2, %v2975_v2  ;;  %v2996_v40 = vadd.f32 %v3878_v44, %v2707_v33  ;;  %v2723_v55 = vadd.f32 %v2722_v18, %v6154_v7 }
 0x2ab   :  { %v2724_v42 = vpop.f32.mrf.mxu0  ;;  %v2987_v34 = vpop.f32.mrf.mxu1 }
 0x2ac   :  { %3340 = vst.msk [vmem:[%s6102_s3 + $0xc4] sm:$0xf] %vm3290_vm0, %v3753_v15  ;;  %v3758_v41 = vpack.c.bf16 %v2996_v40, %v2996_v40  ;;  %v2988_v32 = vadd.f32 %v2987_v34, %v2699_v39 }
 0x2ad   :  { %v2725_v22 = vpop.f32.mrf.mxu0  ;;  %v3879_v14 = vpop.f32.mrf.mxu1 }
 0x2ae   :  { %3345 = vst.msk [vmem:[%s6102_s3 + $0xd8] sm:$0xf] %vm3290_vm0, %v3758_v41  ;;  %v3756_v13 = vpack.c.bf16 %v2988_v32, %v2988_v32  ;;  %v2999_v5 = vadd.f32 %v3879_v14, %v2710_v24  ;;  %v2726_v20 = vadd.f32 %v2725_v22, %v6156_v59 }
 0x2af   :  { %v2727_v28 = vpop.f32.mrf.mxu0  ;;  %v2990_v46 = vpop.f32.mrf.mxu1 }
 0x2b0   :  { %3343 = vst.msk [vmem:[%s6102_s3 + $0xd0] sm:$0xf] %vm3290_vm0, %v3756_v13  ;;  %v3759_v48 = vpack.c.bf16 %v2999_v5, %v2999_v5  ;;  %v2991_v27 = vadd.f32 %v2990_v46, %v2702_v12 }
 0x2b1   :  { %v2730_v6 = vpop.f32.mrf.mxu0  ;;  %v3882_v36 = vpop.f32.mrf.mxu1 }
 0x2b2   :  { %3346 = vst.msk [vmem:[%s6102_s3 + $0xdc] sm:$0xf] %vm3290_vm0, %v3759_v48  ;;  %v3757_v8 = vpack.c.bf16 %v2991_v27, %v2991_v27  ;;  %v3012_v52 = vadd.f32 %v3882_v36, %v2723_v55  ;;  %v2731_v1 = vadd.f32 %v2730_v6, %v6158_v37 }
 0x2b3   :  { %v2732_v61 = vpop.f32.mrf.mxu0  ;;  %v3003_v31 = vpop.f32.mrf.mxu1 }
 0x2b4   :  { %3344 = vst.msk [vmem:[%s6102_s3 + $0xd4] sm:$0xf] %vm3290_vm0, %v3757_v8  ;;  %v3762_v62 = vpack.c.bf16 %v3012_v52, %v3012_v52  ;;  %v3004_v30 = vadd.f32 %v3003_v31, %v2715_v9 }
 0x2b5   :  { %v2733_v3 = vpop.f32.mrf.mxu0  ;;  %v3883_v26 = vpop.f32.mrf.mxu1 }
 0x2b6   :  { %3349 = vst.msk [vmem:[%s6102_s3 + $0xe8] sm:$0xf] %vm3290_vm0, %v3762_v62  ;;  %v3760_v0 = vpack.c.bf16 %v3004_v30, %v3004_v30  ;;  %v3015_v45 = vadd.f32 %v3883_v26, %v2726_v20  ;;  %v2734_v33 = vadd.f32 %v2733_v3, %v6160_v25 }
 0x2b7   :  { %v2735_v35 = vpop.f32.mrf.mxu0  ;;  %v3006_v17 = vpop.f32.mrf.mxu1 }
 0x2b8   :  { %3347 = vst.msk [vmem:[%s6102_s3 + $0xe0] sm:$0xf] %vm3290_vm0, %v3760_v0  ;;  %v3763_v54 = vpack.c.bf16 %v3015_v45, %v3015_v45  ;;  %v3007_v29 = vadd.f32 %v3006_v17, %v2718_v50 }
 0x2b9   :  { %v2738_v60 = vpop.f32.mrf.mxu0  ;;  %v3886_v43 = vpop.f32.mrf.mxu1 }
 0x2ba   :  { %3350 = vst.msk [vmem:[%s6102_s3 + $0xec] sm:$0xf] %vm3290_vm0, %v3763_v54  ;;  %v3761_v38 = vpack.c.bf16 %v3007_v29, %v3007_v29  ;;  %v2739_v11 = vadd.f32 %v2738_v60, %v6159_v63 }
 0x2bb   :  { %v2740_v21 = vpop.f32.mrf.mxu0  ;;  %v3019_v51 = vpop.f32.mrf.mxu1 }
 0x2bc   :  { %3348 = vst.msk [vmem:[%s6102_s3 + $0xe4] sm:$0xf] %vm3290_vm0, %v3761_v38  ;;  %v3028_v57 = vadd.f32 %v3886_v43, %v2739_v11  ;;  %v3020_v56 = vadd.f32 %v3019_v51, %v2731_v1 }
 0x2bd   :  { %v2741_v58 = vpop.f32.mrf.mxu0  ;;  %v3887_v16 = vpop.f32.mrf.mxu1 }
 0x2be   :  { %v3766_v53 = vpack.c.bf16 %v3028_v57, %v3028_v57  ;;  %v3764_v2 = vpack.c.bf16 %v3020_v56, %v3020_v56  ;;  %v2742_v18 = vadd.f32 %v2741_v58, %v5709_v49 }
 0x2bf   :  { %v2743_v44 = vpop.f32.mrf.mxu0  ;;  %v3022_v10 = vpop.f32.mrf.mxu1 }
 0x2c0   :  { %3353 = vst.msk [vmem:[%s6102_s3 + $0xf8] sm:$0xf] %vm3290_vm0, %v3766_v53  ;;  %3351 = vst.msk [vmem:[%s6102_s3 + $0xf0] sm:$0xf] %vm3290_vm0, %v3764_v2  ;;  %v3031_v39 = vadd.f32 %v3887_v16, %v2742_v18  ;;  %v3023_v15 = vadd.f32 %v3022_v10, %v2734_v33 }
 0x2c2   :  { %v3767_v40 = vpack.c.bf16 %v3031_v39, %v3031_v39  ;;  %v3765_v42 = vpack.c.bf16 %v3023_v15, %v3023_v15 }
 0x2c4   :  { %3354 = vst.msk [vmem:[%s6102_s3 + $0xfc] sm:$0xf] %vm3290_vm0, %v3767_v40  ;;  %3352 = vst.msk [vmem:[%s6102_s3 + $0xf4] sm:$0xf] %vm3290_vm0, %v3765_v42 }

// kernel: tudui_forward.10
= control target key start
LH: loop header
LB: loop body
LE: loop exit
PB: predicated region body
PF: predicated region fallthrough
CT: control target
= control target key end

     0   :  { %s136_s0 = inlined_call_operand.vmem [shape: bf16[4,32,128], index: 0, kind: input, shape index: {}]   ;;  %s137_s1 = inlined_call_operand.vmem [shape: bf16[32,128], index: 1, kind: output, shape index: {}]  }
   0x1   :  { %v8_v0 = vld [vmem:[%s136_s0] sm:$0xf]  ;;  %v9_v1 = vld [vmem:[%s136_s0 + $0x4] sm:$0xf]  ;;  %v47_v2 = vld [vmem:[%s136_s0 + $0x10] sm:$0xf] }
   0x2   :  { %v48_v3 = vld [vmem:[%s136_s0 + $0x14] sm:$0xf]  ;;  %v17_v4 = vmax.bf16 %v47_v2, %v8_v0  ;;  %v51_v5 = vld [vmem:[%s136_s0 + $0x20] sm:$0xf]  ;;  %v52_v6 = vld [vmem:[%s136_s0 + $0x24] sm:$0xf] }
   0x3   :  { %v18_v7 = vmax.bf16 %v48_v3, %v9_v1  ;;  %v55_v8 = vld [vmem:[%s136_s0 + $0x30] sm:$0xf]  ;;  %v56_v9 = vld [vmem:[%s136_s0 + $0x34] sm:$0xf]  ;;  %v10_v10 = vld [vmem:[%s136_s0 + $0x8] sm:$0xf] }
   0x4   :  { %v31_v11 = vmax.bf16 %v55_v8, %v51_v5  ;;  %v32_v12 = vmax.bf16 %v56_v9, %v52_v6  ;;  %v11_v13 = vld [vmem:[%s136_s0 + $0xc] sm:$0xf]  ;;  %v49_v14 = vld [vmem:[%s136_s0 + $0x18] sm:$0xf]  ;;  %v50_v15 = vld [vmem:[%s136_s0 + $0x1c] sm:$0xf] }
   0x5   :  { %v19_v16 = vmax.bf16 %v49_v14, %v10_v10  ;;  %v20_v17 = vmax.bf16 %v50_v15, %v11_v13  ;;  %v53_v18 = vld [vmem:[%s136_s0 + $0x28] sm:$0xf]  ;;  %v54_v19 = vld [vmem:[%s136_s0 + $0x2c] sm:$0xf]  ;;  %v57_v20 = vld [vmem:[%s136_s0 + $0x38] sm:$0xf] }
   0x6   :  { %v35_v21 = vmax.bf16 %v31_v11, %v17_v4  ;;  %v36_v22 = vmax.bf16 %v32_v12, %v18_v7  ;;  %v58_v23 = vld [vmem:[%s136_s0 + $0x3c] sm:$0xf]  ;;  %v33_v24 = vmax.bf16 %v57_v20, %v53_v18 }
   0x7   :  { %v34_v25 = vmax.bf16 %v58_v23, %v54_v19 }
   0x8   :  { %v69_v26 = vcombine.low %v35_v21, %v36_v22  ;;  %v37_v27 = vmax.bf16 %v33_v24, %v19_v16 }
   0x9   :  { %v38_v28 = vmax.bf16 %v34_v25, %v20_v17 }
   0xa   :  { %63 = vst [vmem:[%s137_s1] sm:$0xff] %v69_v26  }
   0xb   :  { %v70_v29 = vcombine.low %v37_v27, %v38_v28 }
   0xd   :  { %71 = vst [vmem:[%s137_s1 + $0x8] sm:$0xff] %v70_v29  }

// kernel: tudui_forward.12
= control target key start
LH: loop header
LB: loop body
LE: loop exit
PB: predicated region body
PF: predicated region fallthrough
CT: control target
= control target key end

     0   :  { %s80_s0 = inlined_call_operand.vmem [shape: bf16[4,16,128], index: 0, kind: input, shape index: {}]   ;;  %s81_s1 = inlined_call_operand.vmem [shape: bf16[16,128], index: 1, kind: output, shape index: {}]  }
   0x1   :  { %v8_v0 = vld [vmem:[%s80_s0] sm:$0xf]  ;;  %v9_v1 = vld [vmem:[%s80_s0 + $0x4] sm:$0xf]  ;;  %v31_v2 = vld [vmem:[%s80_s0 + $0x8] sm:$0xf] }
   0x2   :  { %v32_v3 = vld [vmem:[%s80_s0 + $0xc] sm:$0xf]  ;;  %v13_v4 = vmax.bf16 %v31_v2, %v8_v0  ;;  %v33_v5 = vld [vmem:[%s80_s0 + $0x10] sm:$0xf]  ;;  %v34_v6 = vld [vmem:[%s80_s0 + $0x14] sm:$0xf] }
   0x3   :  { %v14_v7 = vmax.bf16 %v32_v3, %v9_v1  ;;  %v35_v8 = vld [vmem:[%s80_s0 + $0x18] sm:$0xf]  ;;  %v36_v9 = vld [vmem:[%s80_s0 + $0x1c] sm:$0xf] }
   0x4   :  { %v21_v10 = vmax.bf16 %v35_v8, %v33_v5  ;;  %v22_v11 = vmax.bf16 %v36_v9, %v34_v6 }
   0x6   :  { %v23_v12 = vmax.bf16 %v21_v10, %v13_v4  ;;  %v24_v13 = vmax.bf16 %v22_v11, %v14_v7 }
   0x8   :  { %v42_v14 = vcombine.low %v23_v12, %v24_v13 }
   0xa   :  { %41 = vst [vmem:[%s81_s1] sm:$0xff] %v42_v14  }

// kernel: tudui_forward.11
= control target key start
LH: loop header
LB: loop body
LE: loop exit
PB: predicated region body
PF: predicated region fallthrough
CT: control target
= control target key end

     0   :  { %vm1274_vm0 = vcmask 519168   ;;  %s2434_s1 = inlined_call_operand.vmem [shape: bf16[896,64], index: 1, kind: input, shape index: {}]   ;;  %s2435_s0 = inlined_call_operand.vmem [shape: bf16[128,896], index: 0, kind: input, shape index: {}]   ;;  %s2436_s2 = inlined_call_operand.vmem [shape: f32[1,64], index: 2, kind: input, shape index: {}]   ;;  %s2437_s3 = inlined_call_operand.vmem [shape: bf16[128,64], index: 3, kind: output, shape index: {}]  }
   0x1   :  { %v1680_v0 = vld [vmem:[%s2434_s1 + $0x78] sm:$0xff]   ;;  %v1684_v4 = vld [vmem:[%s2434_s1 + $0x70] sm:$0xff]   ;;  %v1688_v8 = vld [vmem:[%s2434_s1 + $0x68] sm:$0xff]  }
   0x2   :  { %v1681_v1 = vld [vmem:[%s2434_s1 + $0x38] sm:$0xff]   ;;  %1440 = vmatprep.subr.bf16.mxu0 %v1680_v0  ;;  %v1685_v5 = vld [vmem:[%s2434_s1 + $0x30] sm:$0xff]   ;;  %v1689_v9 = vld [vmem:[%s2434_s1 + $0x28] sm:$0xff]  }
   0x3   :  { %v1682_v2 = vld [vmem:[%s2434_s1 + $0xf8] sm:$0xff]   ;;  %1441 = vmatpush3.bf16.msra.mxu0 %v1681_v1  ;;  %v1686_v6 = vld [vmem:[%s2434_s1 + $0xf0] sm:$0xff]   ;;  %v1690_v10 = vld [vmem:[%s2434_s1 + $0xe8] sm:$0xff]  }
   0x4   :  { %v1683_v3 = vld [vmem:[%s2434_s1 + $0xb8] sm:$0xff]   ;;  %1504 = vmatprep.subr.bf16.mxu1 %v1682_v2  ;;  %1442 = vmatprep.subr.bf16.mxu0 %v1684_v4  ;;  %v1687_v7 = vld [vmem:[%s2434_s1 + $0xb0] sm:$0xff]   ;;  %v1691_v11 = vld [vmem:[%s2434_s1 + $0xa8] sm:$0xff]  }
   0x5   :  { %1505 = vmatpush3.bf16.msra.mxu1 %v1683_v3  ;;  %v1692_v12 = vld [vmem:[%s2434_s1 + $0x60] sm:$0xff]   ;;  %v1696_v16 = vld [vmem:[%s2434_s1 + $0x58] sm:$0xff]   ;;  %v1700_v20 = vld [vmem:[%s2434_s1 + $0x50] sm:$0xff]  }
   0x6   :  { %1506 = vmatprep.subr.bf16.mxu1 %v1686_v6  ;;  %v1693_v13 = vld [vmem:[%s2434_s1 + $0x20] sm:$0xff]   ;;  %v1697_v17 = vld [vmem:[%s2434_s1 + $0x18] sm:$0xff]   ;;  %v1701_v21 = vld [vmem:[%s2434_s1 + $0x10] sm:$0xff]  }
   0x7   :  { %1443 = vmatpush3.bf16.msra.mxu0 %v1685_v5  ;;  %v1694_v14 = vld [vmem:[%s2434_s1 + $0xe0] sm:$0xff]   ;;  %v1698_v18 = vld [vmem:[%s2434_s1 + $0xd8] sm:$0xff]   ;;  %v1702_v22 = vld [vmem:[%s2434_s1 + $0xd0] sm:$0xff]  }
   0x8   :  { %1444 = vmatprep.subr.bf16.mxu0 %v1688_v8  ;;  %v1695_v15 = vld [vmem:[%s2434_s1 + $0xa0] sm:$0xff]   ;;  %v1699_v19 = vld [vmem:[%s2434_s1 + $0x98] sm:$0xff]   ;;  %v1703_v23 = vld [vmem:[%s2434_s1 + $0x90] sm:$0xff]  }
   0x9   :  { %1507 = vmatpush3.bf16.msra.mxu1 %v1687_v7  ;;  %v1704_v24 = vld [vmem:[%s2434_s1 + $0x48] sm:$0xff]   ;;  %v1708_v28 = vld [vmem:[%s2434_s1 + $0x40] sm:$0xff]   ;;  %v1715_v34 = vld [vmem:[%s2434_s1 + $0x178] sm:$0xff]  }
   0xa   :  { %1508 = vmatprep.subr.bf16.mxu1 %v1690_v10  ;;  %v1705_v25 = vld [vmem:[%s2434_s1 + $0x8] sm:$0xff]   ;;  %v1709_v29 = vld [vmem:[%s2434_s1] sm:$0xff]   ;;  %v1719_v37 = vld [vmem:[%s2434_s1 + $0x138] sm:$0xff]  }
   0xb   :  { %1445 = vmatpush3.bf16.msra.mxu0 %v1689_v9  ;;  %v1706_v26 = vld [vmem:[%s2434_s1 + $0xc8] sm:$0xff]   ;;  %v1710_v30 = vld [vmem:[%s2434_s1 + $0xc0] sm:$0xff]   ;;  %v1720_v38 = vld [vmem:[%s2435_s0 + $0x3c] ss:$28 sps:$4 sm:$0xff]  }
   0xc   :  { %1446 = vmatprep.subr.bf16.mxu0 %v1692_v12  ;;  %v1707_v27 = vld [vmem:[%s2434_s1 + $0x88] sm:$0xff]   ;;  %v1711_v31 = vld [vmem:[%s2435_s0] ss:$28 sps:$4 sm:$0xff]   ;;  %v1722_v39 = vld [vmem:[%s2435_s0 + $0x38] ss:$28 sps:$4 sm:$0xff]  }
   0xd   :  { %1509 = vmatpush3.bf16.msra.mxu1 %v1691_v11  ;;  %v1713_v32 = vld [vmem:[%s2435_s0 + $0x4] ss:$28 sps:$4 sm:$0xff]   ;;  %v1718_v36 = vld [vmem:[%s2435_s0 + $0xc] ss:$28 sps:$4 sm:$0xff]   ;;  %v1723_v40 = vld [vmem:[%s2434_s1 + $0x170] sm:$0xff]  }
   0xe   :  { %1510 = vmatprep.subr.bf16.mxu1 %v1694_v14  ;;  %v1714_v33 = vld [vmem:[%s2434_s1 + $0x80] sm:$0xff]   ;;  %854 = vmatprep.mubr.bf16.mxu0 %v1713_v32  ;;  %v1726_v42 = vld [vmem:[%s2434_s1 + $0x130] sm:$0xff]   ;;  %v1731_v45 = vld [vmem:[%s2434_s1 + $0x168] sm:$0xff]  }
   0xf   :  { %1447 = vmatpush3.bf16.msra.mxu0 %v1693_v13  ;;  %v1716_v35 = vld [vmem:[%s2435_s0 + $0x8] ss:$28 sps:$4 sm:$0xff]   ;;  %951 = vmatprep.mubr.bf16.mxu1 %v1718_v36  ;;  %v1727_v43 = vld [vmem:[%s2435_s0 + $0x40] ss:$28 sps:$4 sm:$0xff]   ;;  %v1728_v44 = vld [vmem:[%s2435_s0 + $0x74] ss:$28 sps:$4 sm:$0xff]  }
  0x10   :  { %1448 = vmatprep.subr.bf16.mxu0 %v1696_v16  ;;  %v1724_v41 = vld [vmem:[%s2435_s0 + $0x44] ss:$28 sps:$4 sm:$0xff]   ;;  %v1732_v46 = vld [vmem:[%s2435_s0 + $0x7c] ss:$28 sps:$4 sm:$0xff]   ;;  %v1734_v47 = vld [vmem:[%s2434_s1 + $0x128] sm:$0xff]  }
  0x11   :  { %1511 = vmatpush3.bf16.msra.mxu1 %v1695_v15  ;;  %v1730_v48 = vld [vmem:[%s2435_s0 + $0x70] ss:$28 sps:$4 sm:$0xff]   ;;  %v1739_v50 = vld [vmem:[%s2434_s1 + $0x160] sm:$0xff]   ;;  %v1735_v51 = vld [vmem:[%s2435_s0 + $0x78] ss:$28 sps:$4 sm:$0xff]  }
  0x12   :  { %1512 = vmatprep.subr.bf16.mxu1 %v1698_v18  ;;  %v1736_v49 = vld [vmem:[%s2435_s0 + $0xac] ss:$28 sps:$4 sm:$0xff]   ;;  %v1742_v52 = vld [vmem:[%s2434_s1 + $0x120] sm:$0xff]   ;;  %v1740_v53 = vld [vmem:[%s2435_s0 + $0xb4] ss:$28 sps:$4 sm:$0xff]  }
  0x13   :  { %1449 = vmatpush3.bf16.msra.mxu0 %v1697_v17  ;;  %v1747_v54 = vld [vmem:[%s2434_s1 + $0x158] sm:$0xff]   ;;  %v1738_v55 = vld [vmem:[%s2435_s0 + $0xa8] ss:$28 sps:$4 sm:$0xff]   ;;  %v1743_v59 = vld [vmem:[%s2435_s0 + $0xb0] ss:$28 sps:$4 sm:$0xff]  }
  0x14   :  { %1450 = vmatprep.subr.bf16.mxu0 %v1700_v20  ;;  %v1750_v56 = vld [vmem:[%s2434_s1 + $0x118] sm:$0xff]   ;;  %v1744_v57 = vld [vmem:[%s2435_s0 + $0xe4] ss:$28 sps:$4 sm:$0xff]   ;;  %v1748_v60 = vld [vmem:[%s2435_s0 + $0xec] ss:$28 sps:$4 sm:$0xff]  }
  0x15   :  { %1513 = vmatpush3.bf16.msra.mxu1 %v1699_v19  ;;  %v1752_v58 = vld [vmem:[%s2434_s1 + $0x1b8] sm:$0xff]   ;;  %v1756_v61 = vld [vmem:[%s2434_s1 + $0x150] sm:$0xff]   ;;  %v1762_v0 = vld [vmem:[%s2434_s1 + $0x1a8] sm:$0xff]  }
  0x16   :  { %1514 = vmatprep.subr.bf16.mxu1 %v1702_v22  ;;  %v1757_v62 = vld [vmem:[%s2434_s1 + $0x1b0] sm:$0xff]   ;;  %v1746_v1 = vld [vmem:[%s2435_s0 + $0xe0] ss:$28 sps:$4 sm:$0xff]   ;;  %v1751_v2 = vld [vmem:[%s2435_s0 + $0xe8] ss:$28 sps:$4 sm:$0xff]  }
  0x17   :  { %1451 = vmatpush3.bf16.msra.mxu0 %v1701_v21  ;;  %v1760_v63 = vld [vmem:[%s2434_s1 + $0x110] sm:$0xff]   ;;  %v1753_v3 = vld [vmem:[%s2435_s0 + $0x11c] ss:$28 sps:$4 sm:$0xff]   ;;  %v1766_v4 = vld [vmem:[%s2434_s1 + $0x148] sm:$0xff]  }
  0x18   :  { %1452 = vmatprep.subr.bf16.mxu0 %v1704_v24  ;;  %v1767_v5 = vld [vmem:[%s2434_s1 + $0x1a0] sm:$0xff]   ;;  %v1770_v7 = vld [vmem:[%s2434_s1 + $0x108] sm:$0xff]   ;;  %v1772_v8 = vld [vmem:[%s2434_s1 + $0x198] sm:$0xff]  }
  0x19   :  { %1515 = vmatpush3.bf16.msra.mxu1 %v1703_v23  ;;  %v1758_v6 = vld [vmem:[%s2435_s0 + $0x124] ss:$28 sps:$4 sm:$0xff]   ;;  %v1755_v9 = vld [vmem:[%s2435_s0 + $0x118] ss:$28 sps:$4 sm:$0xff]   ;;  %v1782_v16 = vld [vmem:[%s2434_s1 + $0x188] sm:$0xff]  }
  0x1a   :  { %1516 = vmatprep.subr.bf16.mxu1 %v1706_v26  ;;  %v1776_v10 = vld [vmem:[%s2434_s1 + $0x140] sm:$0xff]   ;;  %v1763_v12 = vld [vmem:[%s2435_s0 + $0x154] ss:$28 sps:$4 sm:$0xff]   ;;  %v1768_v15 = vld [vmem:[%s2435_s0 + $0x15c] ss:$28 sps:$4 sm:$0xff]  }
  0x1b   :  { %1453 = vmatpush3.bf16.msra.mxu0 %v1705_v25  ;;  %v1761_v11 = vld [vmem:[%s2435_s0 + $0x120] ss:$28 sps:$4 sm:$0xff]   ;;  %v1777_v13 = vld [vmem:[%s2434_s1 + $0x190] sm:$0xff]   ;;  %v1773_v18 = vld [vmem:[%s2435_s0 + $0x18c] ss:$28 sps:$4 sm:$0xff]  }
  0x1c   :  { %1454 = vmatprep.subr.bf16.mxu0 %v1708_v28  ;;  %v1780_v14 = vld [vmem:[%s2434_s1 + $0x100] sm:$0xff]   ;;  %v1765_v17 = vld [vmem:[%s2435_s0 + $0x150] ss:$28 sps:$4 sm:$0xff]   ;;  %v1771_v20 = vld [vmem:[%s2435_s0 + $0x158] ss:$28 sps:$4 sm:$0xff]  }
  0x1d   :  { %1517 = vmatpush3.bf16.msra.mxu1 %v1707_v27  ;;  %v1786_v19 = vld [vmem:[%s2434_s1 + $0x180] sm:$0xff]   ;;  %v1778_v21 = vld [vmem:[%s2435_s0 + $0x194] ss:$28 sps:$4 sm:$0xff]   ;;  %v1789_v27 = vld [vmem:[%s2435_s0 + $0x4c] ss:$28 sps:$4 sm:$0xff]  }
  0x1e   :  { %1518 = vmatprep.subr.bf16.mxu1 %v1710_v30  ;;  %v1775_v22 = vld [vmem:[%s2435_s0 + $0x188] ss:$28 sps:$4 sm:$0xff]   ;;  %v1785_v23 = vld [vmem:[%s2435_s0 + $0x14] ss:$28 sps:$4 sm:$0xff]   ;;  %v1796_v32 = vld [vmem:[%s2435_s0 + $0xc0] ss:$28 sps:$4 sm:$0xff]  }
  0x1f   :  { %1455 = vmatpush3.bf16.msra.mxu0 %v1709_v29  ;;  %v1781_v24 = vld [vmem:[%s2435_s0 + $0x190] ss:$28 sps:$4 sm:$0xff]   ;;  %v1787_v25 = vld [vmem:[%s2435_s0 + $0x18] ss:$28 sps:$4 sm:$0xff]   ;;  %v1795_v29 = vld [vmem:[%s2435_s0 + $0x88] ss:$28 sps:$4 sm:$0xff]  }
  0x20   :  { %1568 = vmatprep.subr.bf16.mxu0 %v1715_v34  ;;  %v1783_v26 = vld [vmem:[%s2435_s0 + $0x10] ss:$28 sps:$4 sm:$0xff]   ;;  %v1791_v30 = vld [vmem:[%s2435_s0 + $0x48] ss:$28 sps:$4 sm:$0xff]   ;;  %v1794_v34 = vld [vmem:[%s2435_s0 + $0x80] ss:$28 sps:$4 sm:$0xff]  }
  0x21   :  { %1519 = vmatpush3.bf16.msra.mxu1 %v1714_v33  ;;  %v1788_v28 = vld [vmem:[%s2435_s0 + $0x50] ss:$28 sps:$4 sm:$0xff]   ;;  %v1803_v33 = vld [vmem:[%s2435_s0 + $0xf8] ss:$28 sps:$4 sm:$0xff]  }
  0x22   :  { %855 = vmatmul.mubr.bf16.vlgmr.msra.gmra.mxu0 %v1711_v31  ;;  %1648 = vmatprep.subr.bf16.mxu1 %v1752_v58  ;;  %v1792_v31 = vld [vmem:[%s2435_s0 + $0x84] ss:$28 sps:$4 sm:$0xff]   ;;  %v1804_v36 = vld [vmem:[%s2435_s0 + $0x130] ss:$28 sps:$4 sm:$0xff]  }
  0x23   :  { %1569 = vmatpush3.bf16.msra.mxu0 %v1719_v37  ;;  %862 = vmatprep.mubr.bf16.mxu0 %v1720_v38  ;;  %v1811_v37 = vld [vmem:[%s2435_s0 + $0x168] ss:$28 sps:$4 sm:$0xff]   ;;  %v1799_v38 = vld [vmem:[%s2435_s0 + $0xb8] ss:$28 sps:$4 sm:$0xff]  }
  0x24   :  { %952 = vmatmul.mubr.bf16.vlgmr.msra.gmra.mxu1 %v1716_v35  ;;  %1570 = vmatprep.subr.bf16.mxu0 %v1723_v40  ;;  %v1797_v35 = vld [vmem:[%s2435_s0 + $0xbc] ss:$28 sps:$4 sm:$0xff]  }
  0x25   :  { %959 = vmatprep.mubr.bf16.mxu1 %v1724_v41  ;;  %1649 = vmatpush3.bf16.msra.mxu1 %v1752_v58  ;;  %v1812_v40 = vld [vmem:[%s2435_s0 + $0x1a0] ss:$28 sps:$4 sm:$0xff]   ;;  %v1802_v41 = vld [vmem:[%s2435_s0 + $0xf0] ss:$28 sps:$4 sm:$0xff]  }
  0x26   :  { %1650 = vmatprep.subr.bf16.mxu1 %v1757_v62 }
  0x27   :  { %1571 = vmatpush3.bf16.msra.mxu0 %v1726_v42  ;;  %v1805_v42 = vld [vmem:[%s2435_s0 + $0x12c] ss:$28 sps:$4 sm:$0xff]  }
  0x28   :  { %1572 = vmatprep.subr.bf16.mxu0 %v1731_v45  ;;  %v1810_v45 = vld [vmem:[%s2435_s0 + $0x160] ss:$28 sps:$4 sm:$0xff]  }
  0x29   :  { %1651 = vmatpush3.bf16.msra.mxu1 %v1757_v62 }
  0x2a   :  { %863 = vmatmul.mubr.bf16.gmra.mxu0 %v1722_v39  ;;  %1652 = vmatprep.subr.bf16.mxu1 %v1762_v0  ;;  %v1800_v39 = vld [vmem:[%s2435_s0 + $0xf4] ss:$28 sps:$4 sm:$0xff]  }
  0x2b   :  { %870 = vmatprep.mubr.bf16.mxu0 %v1728_v44  ;;  %1573 = vmatpush3.bf16.msra.mxu0 %v1734_v47  ;;  %v1808_v44 = vld [vmem:[%s2435_s0 + $0x164] ss:$28 sps:$4 sm:$0xff]   ;;  %v1815_v47 = vld [vmem:[%s2435_s0 + $0x198] ss:$28 sps:$4 sm:$0xff]  }
  0x2c   :  { %960 = vmatmul.mubr.bf16.gmra.mxu1 %v1727_v43  ;;  %1574 = vmatprep.subr.bf16.mxu0 %v1739_v50  ;;  %v1807_v43 = vld [vmem:[%s2435_s0 + $0x128] ss:$28 sps:$4 sm:$0xff]  }
  0x2d   :  { %967 = vmatprep.mubr.bf16.mxu1 %v1732_v46  ;;  %1653 = vmatpush3.bf16.msra.mxu1 %v1762_v0  ;;  %v1813_v46 = vld [vmem:[%s2435_s0 + $0x19c] ss:$28 sps:$4 sm:$0xff]  }
  0x2e   :  { %1654 = vmatprep.subr.bf16.mxu1 %v1767_v5 }
  0x2f   :  { %1575 = vmatpush3.bf16.msra.mxu0 %v1742_v52 }
  0x30   :  { %1576 = vmatprep.subr.bf16.mxu0 %v1747_v54 }
  0x31   :  { %1655 = vmatpush3.bf16.msra.mxu1 %v1767_v5 }
  0x32   :  { %871 = vmatmul.mubr.bf16.gmra.mxu0 %v1730_v48  ;;  %1656 = vmatprep.subr.bf16.mxu1 %v1772_v8 }
  0x33   :  { %878 = vmatprep.mubr.bf16.mxu0 %v1736_v49  ;;  %1577 = vmatpush3.bf16.msra.mxu0 %v1750_v56 }
  0x34   :  { %968 = vmatmul.mubr.bf16.gmra.mxu1 %v1735_v51  ;;  %1578 = vmatprep.subr.bf16.mxu0 %v1756_v61 }
  0x35   :  { %975 = vmatprep.mubr.bf16.mxu1 %v1740_v53  ;;  %1657 = vmatpush3.bf16.msra.mxu1 %v1772_v8 }
  0x36   :  { %1658 = vmatprep.subr.bf16.mxu1 %v1777_v13 }
  0x37   :  { %1579 = vmatpush3.bf16.msra.mxu0 %v1760_v63 }
  0x38   :  { %1580 = vmatprep.subr.bf16.mxu0 %v1766_v4 }
  0x39   :  { %1659 = vmatpush3.bf16.msra.mxu1 %v1777_v13 }
  0x3a   :  { %879 = vmatmul.mubr.bf16.gmra.mxu0 %v1738_v55  ;;  %1660 = vmatprep.subr.bf16.mxu1 %v1782_v16 }
  0x3b   :  { %886 = vmatprep.mubr.bf16.mxu0 %v1744_v57  ;;  %1581 = vmatpush3.bf16.msra.mxu0 %v1770_v7 }
  0x3c   :  { %976 = vmatmul.mubr.bf16.gmra.mxu1 %v1743_v59  ;;  %1582 = vmatprep.subr.bf16.mxu0 %v1776_v10 }
  0x3d   :  { %983 = vmatprep.mubr.bf16.mxu1 %v1748_v60  ;;  %1661 = vmatpush3.bf16.msra.mxu1 %v1782_v16 }
  0x3e   :  { %1662 = vmatprep.subr.bf16.mxu1 %v1786_v19 }
  0x3f   :  { %1583 = vmatpush3.bf16.msra.mxu0 %v1780_v14 }
  0x41   :  { %1663 = vmatpush3.bf16.msra.mxu1 %v1786_v19 }
  0x42   :  { %887 = vmatmul.mubr.bf16.gmra.mxu0 %v1746_v1 }
  0x43   :  { %894 = vmatprep.mubr.bf16.mxu0 %v1753_v3 }
  0x44   :  { %984 = vmatmul.mubr.bf16.gmra.mxu1 %v1751_v2 }
  0x45   :  { %991 = vmatprep.mubr.bf16.mxu1 %v1758_v6 }
  0x4a   :  { %895 = vmatmul.mubr.bf16.gmra.mxu0 %v1755_v9 }
  0x4b   :  { %902 = vmatprep.mubr.bf16.mxu0 %v1763_v12 }
  0x4c   :  { %992 = vmatmul.mubr.bf16.gmra.mxu1 %v1761_v11 }
  0x4d   :  { %999 = vmatprep.mubr.bf16.mxu1 %v1768_v15 }
  0x52   :  { %903 = vmatmul.mubr.bf16.gmra.mxu0 %v1765_v17 }
  0x53   :  { %910 = vmatprep.mubr.bf16.mxu0 %v1773_v18 }
  0x54   :  { %1000 = vmatmul.mubr.bf16.gmra.mxu1 %v1771_v20 }
  0x55   :  { %1007 = vmatprep.mubr.bf16.mxu1 %v1778_v21 }
  0x5a   :  { %911 = vmatmul.mubr.bf16.gmra.mxu0 %v1775_v22 }
  0x5b   :  { %1048 = vmatprep.mubr.bf16.mxu0 %v1785_v23 }
  0x5c   :  { %1008 = vmatmul.mubr.bf16.gmra.mxu1 %v1781_v24 }
  0x5d   :  { %1664 = vmatprep.mubr.bf16.mxu1 %v1787_v25 }
  0x62   :  { %1049 = vmatmul.mubr.bf16.vlgmr.msra.gmra.mxu0 %v1783_v26 }
  0x63   :  { %1056 = vmatprep.mubr.bf16.mxu0 %v1789_v27 }
  0x64   :  { %1665 = vmatmul.mubr.bf16.vlgmr.msra.gmra.mxu1 %v1788_v28 }
  0x65   :  { %1668 = vmatprep.mubr.bf16.mxu1 %v1795_v29 }
  0x6a   :  { %1057 = vmatmul.mubr.bf16.gmra.mxu0 %v1791_v30 }
  0x6b   :  { %1064 = vmatprep.mubr.bf16.mxu0 %v1792_v31 }
  0x6c   :  { %1669 = vmatmul.mubr.bf16.gmra.mxu1 %v1796_v32 }
  0x6d   :  { %1672 = vmatprep.mubr.bf16.mxu1 %v1803_v33 }
  0x72   :  { %1065 = vmatmul.mubr.bf16.gmra.mxu0 %v1794_v34 }
  0x73   :  { %1072 = vmatprep.mubr.bf16.mxu0 %v1797_v35 }
  0x74   :  { %1673 = vmatmul.mubr.bf16.gmra.mxu1 %v1804_v36 }
  0x75   :  { %1676 = vmatprep.mubr.bf16.mxu1 %v1811_v37 }
  0x7a   :  { %1073 = vmatmul.mubr.bf16.gmra.mxu0 %v1799_v38 }
  0x7b   :  { %1080 = vmatprep.mubr.bf16.mxu0 %v1800_v39 }
  0x7c   :  { %1677 = vmatmul.mubr.bf16.gmra.mxu1 %v1812_v40 }
  0x82   :  { %1081 = vmatmul.mubr.bf16.gmra.mxu0 %v1802_v41 }
  0x83   :  { %1088 = vmatprep.mubr.bf16.mxu0 %v1805_v42 }
  0x8a   :  { %1089 = vmatmul.mubr.bf16.gmra.mxu0 %v1807_v43 }
  0x8b   :  { %1096 = vmatprep.mubr.bf16.mxu0 %v1808_v44  ;;  %v2283_v44 = vld [vmem:[%s2436_s2] ss:$0 sm:$0xff] }
  0x92   :  { %1097 = vmatmul.mubr.bf16.gmra.mxu0 %v1810_v45 }
  0x93   :  { %1104 = vmatprep.mubr.bf16.mxu0 %v1813_v46 }
  0x9a   :  { %1105 = vmatmul.mubr.bf16.gmra.mxu0 %v1815_v47 }
  0xe2   :  { %v1456_v48 = vpop.f32.mrf.mxu0 }
  0xe4   :  { %v1457_v49 = vpop.f32.mrf.mxu0  ;;  %v2172_v50 = vpop.f32.mrf.mxu1 }
  0xe5   :  { %v1458_v42 = vadd.f32 %v1457_v49, %v1456_v48 }
  0xe6   :  { %v2174_v51 = vpop.f32.mrf.mxu0  ;;  %v1521_v52 = vpop.f32.mrf.mxu1 }
  0xe8   :  { %v1460_v53 = vpop.f32.mrf.mxu0  ;;  %v2176_v54 = vpop.f32.mrf.mxu1 }
  0xea   :  { %v2178_v55 = vpop.f32.mrf.mxu0  ;;  %v2180_v56 = vpop.f32.mrf.mxu1 }
  0xec   :  { %v1463_v57 = vpop.f32.mrf.mxu0  ;;  %v2182_v58 = vpop.f32.mrf.mxu1 }
  0xee   :  { %v2184_v59 = vpop.f32.mrf.mxu0  ;;  %v2186_v60 = vpop.f32.mrf.mxu1 }
  0xf0   :  { %v2188_v61 = vpop.f32.mrf.mxu0  ;;  %v2190_v62 = vpop.f32.mrf.mxu1 }
  0xf2   :  { %v2192_v63 = vpop.f32.mrf.mxu0  ;;  %v2194_v0 = vpop.f32.mrf.mxu1 }
  0xf4   :  { %v2196_v1 = vpop.f32.mrf.mxu0  ;;  %v2198_v2 = vpop.f32.mrf.mxu1 }
  0xf6   :  { %v2200_v3 = vpop.f32.mrf.mxu0  ;;  %v2202_v4 = vpop.f32.mrf.mxu1 }
  0xf8   :  { %v2204_v5 = vpop.f32.mrf.mxu0  ;;  %v2206_v6 = vpop.f32.mrf.mxu1 }
  0xfa   :  { %v2208_v7 = vpop.f32.mrf.mxu0  ;;  %v2210_v8 = vpop.f32.mrf.mxu1 }
  0xfc   :  { %v2212_v9 = vpop.f32.mrf.mxu0  ;;  %v2214_v10 = vpop.f32.mrf.mxu1 }
  0xfe   :  { %v2216_v11 = vpop.f32.mrf.mxu0  ;;  %v2218_v12 = vpop.f32.mrf.mxu1 }
 0x100   :  { %v2220_v13 = vpop.f32.mrf.mxu0  ;;  %v2222_v14 = vpop.f32.mrf.mxu1 }
 0x102   :  { %v2224_v15 = vpop.f32.mrf.mxu0  ;;  %v2226_v16 = vpop.f32.mrf.mxu1 }
 0x104   :  { %v2228_v17 = vpop.f32.mrf.mxu0  ;;  %v2230_v18 = vpop.f32.mrf.mxu1 }
 0x106   :  { %v2232_v19 = vpop.f32.mrf.mxu0  ;;  %v2234_v20 = vpop.f32.mrf.mxu1 }
 0x108   :  { %v2236_v21 = vpop.f32.mrf.mxu0  ;;  %v2238_v22 = vpop.f32.mrf.mxu1 }
 0x10a   :  { %v2240_v23 = vpop.f32.mrf.mxu0  ;;  %v2242_v24 = vpop.f32.mrf.mxu1 }
 0x10c   :  { %v2244_v25 = vpop.f32.mrf.mxu0  ;;  %v2246_v26 = vpop.f32.mrf.mxu1 }
 0x10e   :  { %v2248_v27 = vpop.f32.mrf.mxu0  ;;  %v2250_v28 = vpop.f32.mrf.mxu1 }
 0x110   :  { %v2252_v29 = vpop.f32.mrf.mxu0  ;;  %v2254_v30 = vpop.f32.mrf.mxu1 }
 0x112   :  { %v2256_v31 = vpop.f32.mrf.mxu0  ;;  %v2258_v32 = vpop.f32.mrf.mxu1 }
 0x114   :  { %v2260_v33 = vpop.f32.mrf.mxu0  ;;  %v2262_v34 = vpop.f32.mrf.mxu1 }
 0x116   :  { %v2264_v35 = vpop.f32.mrf.mxu0  ;;  %v2266_v36 = vpop.f32.mrf.mxu1 }
 0x117   :  { %2438 = vst [vmem:[#allocation2_spill] sm:$0xff] %v2264_v35  ;;  %2439 = vst [vmem:[#allocation3_spill] sm:$0xff] %v2266_v36 }
 0x118   :  { %v2268_v37 = vpop.f32.mrf.mxu0  ;;  %v2270_v38 = vpop.f32.mrf.mxu1 }
 0x119   :  { %2440 = vst [vmem:[#allocation4_spill] sm:$0xff] %v2268_v37  ;;  %2441 = vst [vmem:[#allocation5_spill] sm:$0xff] %v2270_v38  ;;  %v857_v38 = vadd.f32 %v1458_v42, %v2283_v44 }
 0x11a   :  { %v2272_v39 = vpop.f32.mrf.mxu0  ;;  %v2274_v40 = vpop.f32.mrf.mxu1 }
 0x11b   :  { %2442 = vst [vmem:[#allocation6_spill] sm:$0xff] %v2272_v39  ;;  %2443 = vst [vmem:[#allocation7_spill] sm:$0xff] %v2274_v40  ;;  %v1522_v40 = vadd.f32 %v1521_v52, %v2172_v50  ;;  %v1464_v39 = vadd.f32 %v1463_v57, %v2178_v55  ;;  %v1467_v55 = vadd.f32 %v2188_v61, %v2184_v59 }
 0x11c   :  { %v2276_v41 = vpop.f32.mrf.mxu0  ;;  %v2278_v43 = vpop.f32.mrf.mxu1 }
 0x11d   :  { %2444 = vst [vmem:[#allocation8_spill] sm:$0xff] %v2276_v41  ;;  %2445 = vst [vmem:[#allocation9_spill] sm:$0xff] %v2278_v43  ;;  %v1461_v41 = vadd.f32 %v1460_v53, %v2174_v51  ;;  %v954_v35 = vadd.f32 %v1522_v40, %v857_v38  ;;  %v865_v51 = vadd.f32 %v1464_v39, %v2283_v44 }
 0x11e   :  { %v2285_v45 = vpop.f32.mrf.mxu0  ;;  %v2287_v46 = vpop.f32.mrf.mxu1  ;;  %v1528_v53 = vadd.f32 %v2186_v60, %v2182_v58  ;;  %v1470_v39 = vadd.f32 %v2196_v1, %v2192_v63  ;;  %v868_v58 = vadd.f32 %v1467_v55, %v2283_v44  ;;  %v1531_v60 = vadd.f32 %v2194_v0, %v2190_v62 }
 0x11f   :  { %2446 = vst [vmem:[#allocation10_spill] sm:$0xff] %v2285_v45  ;;  %2447 = vst [vmem:[#allocation11_spill] sm:$0xff] %v2287_v46  ;;  %v860_v45 = vadd.f32 %v1461_v41, %v2283_v44  ;;  %v1534_v63 = vadd.f32 %v2202_v4, %v2198_v2  ;;  %v1473_v62 = vadd.f32 %v2204_v5, %v2200_v3 }
 0x120   :  { %v2289_v47 = vpop.f32.mrf.mxu0  ;;  %v2294_v48 = vpop.f32.mrf.mxu1  ;;  %v1476_v2 = vadd.f32 %v2212_v9, %v2208_v7  ;;  %v1537_v3 = vadd.f32 %v2210_v8, %v2206_v6  ;;  %v1540_v7 = vadd.f32 %v2218_v12, %v2214_v10  ;;  %v1479_v6 = vadd.f32 %v2220_v13, %v2216_v11 }
 0x121   :  { %2448 = vst [vmem:[#allocation12_spill] sm:$0xff] %v2289_v47  ;;  %2449 = vst [vmem:[#allocation13_spill] sm:$0xff] %v2294_v48  ;;  %v1525_v47 = vadd.f32 %v2180_v56, %v2176_v54  ;;  %v1482_v10 = vadd.f32 %v2228_v17, %v2224_v15  ;;  %v1543_v11 = vadd.f32 %v2226_v16, %v2222_v14 }
 0x122   :  { %v1584_v49 = vpop.f32.mrf.mxu0  ;;  %v2296_v43 = vpop.f32.mrf.mxu1  ;;  %v1546_v15 = vadd.f32 %v2234_v20, %v2230_v18  ;;  %v1485_v14 = vadd.f32 %v2236_v21, %v2232_v19  ;;  %v1488_v18 = vadd.f32 %v2244_v25, %v2240_v23  ;;  %v1549_v19 = vadd.f32 %v2242_v24, %v2238_v22 }
 0x123   :  { %2450 = vst [vmem:[#allocation14_spill] sm:$0xff] %v2296_v43  ;;  %v957_v48 = vadd.f32 %v1525_v47, %v860_v45  ;;  %v1552_v23 = vadd.f32 %v2250_v28, %v2246_v26  ;;  %v1491_v22 = vadd.f32 %v2252_v29, %v2248_v27  ;;  %v1494_v26 = vadd.f32 %v2260_v33, %v2256_v31  ;;  %v2451_v31 = vld [vmem:[#allocation3_spill] sm:$0xff] }
 0x124   :  { %v1585_v37 = vpop.f32.mrf.mxu0  ;;  %v1666_v42 = vpop.f32.mrf.mxu1  ;;  %v1555_v27 = vadd.f32 %v2258_v32, %v2254_v30  ;;  %v1558_v33 = vadd.f32 %v2451_v31, %v2262_v34  ;;  %v2453_v30 = vld [vmem:[#allocation4_spill] sm:$0xff] }
 0x125   :  { %v1586_v46 = vadd.f32 %v1585_v37, %v1584_v49  ;;  %v965_v49 = vadd.f32 %v1531_v60, %v868_v58 }
 0x126   :  { %v1587_v36 = vpop.f32.mrf.mxu0  ;;  %v1147_v52 = vpop.f32.mrf.mxu1 }
 0x127   :  { %v1051_v50 = vadd.f32 %v1586_v46, %v954_v35  ;;  %v962_v35 = vadd.f32 %v1528_v53, %v865_v51 }
 0x128   :  { %v1588_v43 = vpop.f32.mrf.mxu0  ;;  %v1667_v40 = vpop.f32.mrf.mxu1 }
 0x129   :  { %v1589_v57 = vadd.f32 %v1588_v43, %v1587_v36  ;;  %v1148_v38 = vadd.f32 %v1147_v52, %v1051_v50 }
 0x12a   :  { %v1590_v54 = vpop.f32.mrf.mxu0  ;;  %v1150_v41 = vpop.f32.mrf.mxu1 }
 0x12b   :  { %v1424_v56 = vpack.c.bf16 %v1148_v38, %v1148_v38  ;;  %v1054_v37 = vadd.f32 %v1589_v57, %v957_v48  ;;  %v873_v48 = vadd.f32 %v1470_v39, %v2283_v44  ;;  %v876_v38 = vadd.f32 %v1473_v62, %v2283_v44 }
 0x12c   :  { %v1591_v46 = vpop.f32.mrf.mxu0  ;;  %v1670_v43 = vpop.f32.mrf.mxu1 }
 0x12d   :  { %1275 = vst.msk [vmem:[%s2437_s3] sm:$0xf] %vm1274_vm0, %v1424_v56  ;;  %v1592_v59 = vadd.f32 %v1591_v46, %v1590_v54  ;;  %v1151_v61 = vadd.f32 %v1150_v41, %v1054_v37  ;;  %v970_v57 = vadd.f32 %v1534_v63, %v873_v48  ;;  %v973_v39 = vadd.f32 %v1537_v3, %v876_v38 }
 0x12e   :  { %v1593_v36 = vpop.f32.mrf.mxu0  ;;  %v1163_v51 = vpop.f32.mrf.mxu1 }
 0x12f   :  { %v1059_v45 = vadd.f32 %v1592_v59, %v962_v35  ;;  %v1425_v47 = vpack.c.bf16 %v1151_v61, %v1151_v61  ;;  %v881_v35 = vadd.f32 %v1476_v2, %v2283_v44 }
 0x130   :  { %v1594_v1 = vpop.f32.mrf.mxu0  ;;  %v1671_v56 = vpop.f32.mrf.mxu1 }
 0x131   :  { %v1156_v0 = vadd.f32 %v1666_v42, %v1059_v45  ;;  %1276 = vst.msk [vmem:[%s2437_s3 + $0x4] sm:$0xf] %vm1274_vm0, %v1425_v47  ;;  %v1595_v50 = vadd.f32 %v1594_v1, %v1593_v36  ;;  %v978_v61 = vadd.f32 %v1540_v7, %v881_v35  ;;  %v884_v36 = vadd.f32 %v1479_v6, %v2283_v44 }
 0x132   :  { %v1596_v52 = vpop.f32.mrf.mxu0  ;;  %v1166_v58 = vpop.f32.mrf.mxu1 }
 0x133   :  { %v1426_v53 = vpack.c.bf16 %v1156_v0, %v1156_v0  ;;  %v1062_v55 = vadd.f32 %v1595_v50, %v965_v49  ;;  %v889_v49 = vadd.f32 %v1482_v10, %v2283_v44  ;;  %v981_v62 = vadd.f32 %v1543_v11, %v884_v36 }
 0x134   :  { %v1597_v4 = vpop.f32.mrf.mxu0  ;;  %v1674_v48 = vpop.f32.mrf.mxu1 }
 0x135   :  { %1277 = vst.msk [vmem:[%s2437_s3 + $0x8] sm:$0xf] %vm1274_vm0, %v1426_v53  ;;  %v1159_v5 = vadd.f32 %v1667_v40, %v1062_v55  ;;  %v1598_v42 = vadd.f32 %v1597_v4, %v1596_v52  ;;  %v986_v55 = vadd.f32 %v1546_v15, %v889_v49 }
 0x136   :  { %v1599_v54 = vpop.f32.mrf.mxu0  ;;  %v1179_v52 = vpop.f32.mrf.mxu1 }
 0x137   :  { %v1427_v37 = vpack.c.bf16 %v1159_v5, %v1159_v5  ;;  %v1067_v41 = vadd.f32 %v1598_v42, %v970_v57  ;;  %v892_v57 = vadd.f32 %v1485_v14, %v2283_v44  ;;  %v897_v5 = vadd.f32 %v1488_v18, %v2283_v44  ;;  %v2459_v18 = vld [vmem:[#allocation11_spill] sm:$0xff] }
 0x138   :  { %v1600_v9 = vpop.f32.mrf.mxu0  ;;  %v1675_v4 = vpop.f32.mrf.mxu1 }
 0x139   :  { %1278 = vst.msk [vmem:[%s2437_s3 + $0xc] sm:$0xf] %vm1274_vm0, %v1427_v37  ;;  %v1601_v8 = vadd.f32 %v1600_v9, %v1599_v54  ;;  %v1164_v40 = vadd.f32 %v1163_v51, %v1067_v41  ;;  %v989_v42 = vadd.f32 %v1549_v19, %v892_v57  ;;  %v994_v7 = vadd.f32 %v1552_v23, %v897_v5 }
 0x13a   :  { %v1602_v46 = vpop.f32.mrf.mxu0  ;;  %v1182_v37 = vpop.f32.mrf.mxu1  ;;  %v900_v9 = vadd.f32 %v1491_v22, %v2283_v44 }
 0x13b   :  { %v1428_v60 = vpack.c.bf16 %v1164_v40, %v1164_v40  ;;  %v1070_v59 = vadd.f32 %v1601_v8, %v973_v39 }
 0x13c   :  { %v1603_v12 = vpop.f32.mrf.mxu0  ;;  %v1678_v8 = vpop.f32.mrf.mxu1 }
 0x13d   :  { %1279 = vst.msk [vmem:[%s2437_s3 + $0x10] sm:$0xf] %vm1274_vm0, %v1428_v60  ;;  %v1604_v13 = vadd.f32 %v1603_v12, %v1602_v46  ;;  %v1167_v45 = vadd.f32 %v1166_v58, %v1070_v59  ;;  %v905_v58 = vadd.f32 %v1494_v26, %v2283_v44  ;;  %v997_v59 = vadd.f32 %v1555_v27, %v900_v9 }
 0x13e   :  { %v1605_v47 = vpop.f32.mrf.mxu0  ;;  %v1195_v11 = vpop.f32.mrf.mxu1 }
 0x13f   :  { %v1075_v63 = vadd.f32 %v1604_v13, %v978_v61  ;;  %v1429_v1 = vpack.c.bf16 %v1167_v45, %v1167_v45  ;;  %v2452_v61 = vld [vmem:[#allocation2_spill] sm:$0xff] }
 0x140   :  { %v1606_v17 = vpop.f32.mrf.mxu0  ;;  %v1497_v32 = vadd.f32 %v2453_v30, %v2452_v61 }
 0x141   :  { %v1172_v16 = vadd.f32 %v1670_v43, %v1075_v63  ;;  %1280 = vst.msk [vmem:[%s2437_s3 + $0x14] sm:$0xf] %vm1274_vm0, %v1429_v1  ;;  %v1607_v0 = vadd.f32 %v1606_v17, %v1605_v47  ;;  %v1002_v47 = vadd.f32 %v1558_v33, %v905_v58  ;;  %v2454_v63 = vld [vmem:[#allocation6_spill] sm:$0xff]  ;;  %v2455_v1 = vld [vmem:[#allocation8_spill] sm:$0xff]  ;;  %v2456_v17 = vld [vmem:[#allocation5_spill] sm:$0xff] }
 0x142   :  { %v1608_v50 = vpop.f32.mrf.mxu0  ;;  %v1500_v34 = vadd.f32 %v2455_v1, %v2454_v63  ;;  %v908_v15 = vadd.f32 %v1497_v32, %v2283_v44 }
 0x143   :  { %v1430_v51 = vpack.c.bf16 %v1172_v16, %v1172_v16  ;;  %v1078_v53 = vadd.f32 %v1607_v0, %v981_v62  ;;  %v2457_v62 = vld [vmem:[#allocation7_spill] sm:$0xff] }
 0x144   :  { %v1609_v20 = vpop.f32.mrf.mxu0 }
 0x145   :  { %1281 = vst.msk [vmem:[%s2437_s3 + $0x18] sm:$0xf] %vm1274_vm0, %v1430_v51  ;;  %v1175_v21 = vadd.f32 %v1671_v56, %v1078_v53  ;;  %v1610_v43 = vadd.f32 %v1609_v20, %v1608_v50  ;;  %v1679_v50 = vpop.f32.mrf.mxu1  ;;  %v913_v53 = vadd.f32 %v1500_v34, %v2283_v44 }
 0x146   :  { %v1611_v2 = vpop.f32.mrf.mxu0 }
 0x147   :  { %v1431_v38 = vpack.c.bf16 %v1175_v21, %v1175_v21  ;;  %v1083_v3 = vadd.f32 %v1610_v43, %v986_v55  ;;  %v2458_v55 = vld [vmem:[#allocation9_spill] sm:$0xff]  ;;  %v2460_v21 = vld [vmem:[#allocation10_spill] sm:$0xff]  ;;  %v2461_v43 = vld [vmem:[#allocation12_spill] sm:$0xff]  ;;  %v1198_v5 = vpop.f32.mrf.mxu1 }
 0x148   :  { %v1612_v25 = vpop.f32.mrf.mxu0  ;;  %v1564_v20 = vadd.f32 %v2459_v18, %v2458_v55 }
 0x149   :  { %1282 = vst.msk [vmem:[%s2437_s3 + $0x1c] sm:$0xf] %vm1274_vm0, %v1431_v38  ;;  %v1613_v24 = vadd.f32 %v1612_v25, %v1611_v2  ;;  %v1180_v54 = vadd.f32 %v1179_v52, %v1083_v3  ;;  %v1503_v2 = vadd.f32 %v2461_v43, %v2460_v21 }
 0x14a   :  { %v1614_v56 = vpop.f32.mrf.mxu0 }
 0x14b   :  { %v1432_v41 = vpack.c.bf16 %v1180_v54, %v1180_v54  ;;  %v1086_v35 = vadd.f32 %v1613_v24, %v989_v42  ;;  %v1010_v42 = vadd.f32 %v1564_v20, %v913_v53  ;;  %v916_v24 = vadd.f32 %v1503_v2, %v2283_v44  ;;  %v2462_v54 = vld [vmem:[#allocation13_spill] sm:$0xff] }
 0x14c   :  { %v1615_v28 = vpop.f32.mrf.mxu0 }
 0x14d   :  { %1283 = vst.msk [vmem:[%s2437_s3 + $0x20] sm:$0xf] %vm1274_vm0, %v1432_v41  ;;  %v1616_v29 = vadd.f32 %v1615_v28, %v1614_v56  ;;  %v1183_v39 = vadd.f32 %v1182_v37, %v1086_v35  ;;  %v2463_v56 = vld [vmem:[#allocation14_spill] sm:$0xff] }
 0x14e   :  { %v1617_v6 = vpop.f32.mrf.mxu0  ;;  %v1567_v37 = vadd.f32 %v2463_v56, %v2462_v54 }
 0x14f   :  { %v1091_v40 = vadd.f32 %v1616_v29, %v994_v7  ;;  %v1433_v46 = vpack.c.bf16 %v1183_v39, %v1183_v39 }
 0x150   :  { %v1618_v60 = vpop.f32.mrf.mxu0  ;;  %v1013_v27 = vadd.f32 %v1567_v37, %v916_v24 }
 0x151   :  { %v1188_v10 = vadd.f32 %v1674_v48, %v1091_v40  ;;  %1284 = vst.msk [vmem:[%s2437_s3 + $0x24] sm:$0xf] %vm1274_vm0, %v1433_v46  ;;  %v1619_v12 = vadd.f32 %v1618_v60, %v1617_v6  ;;  %v1561_v48 = vadd.f32 %v2457_v62, %v2456_v17 }
 0x152   :  { %v1620_v36 = vpop.f32.mrf.mxu0 }
 0x153   :  { %v1434_v13 = vpack.c.bf16 %v1188_v10, %v1188_v10  ;;  %v1094_v45 = vadd.f32 %v1619_v12, %v997_v59  ;;  %v1005_v19 = vadd.f32 %v1561_v48, %v908_v15 }
 0x154   :  { %v1621_v49 = vpop.f32.mrf.mxu0 }
 0x155   :  { %1285 = vst.msk [vmem:[%s2437_s3 + $0x28] sm:$0xf] %vm1274_vm0, %v1434_v13  ;;  %v1191_v14 = vadd.f32 %v1675_v4, %v1094_v45  ;;  %v1622_v16 = vadd.f32 %v1621_v49, %v1620_v36 }
 0x156   :  { %v1623_v0 = vpop.f32.mrf.mxu0 }
 0x157   :  { %v1435_v52 = vpack.c.bf16 %v1191_v14, %v1191_v14  ;;  %v1099_v51 = vadd.f32 %v1622_v16, %v1002_v47 }
 0x158   :  { %v1624_v57 = vpop.f32.mrf.mxu0 }
 0x159   :  { %1286 = vst.msk [vmem:[%s2437_s3 + $0x2c] sm:$0xf] %vm1274_vm0, %v1435_v52  ;;  %v1625_v4 = vadd.f32 %v1624_v57, %v1623_v0  ;;  %v1196_v38 = vadd.f32 %v1195_v11, %v1099_v51 }
 0x15a   :  { %v1626_v3 = vpop.f32.mrf.mxu0 }
 0x15b   :  { %v1436_v23 = vpack.c.bf16 %v1196_v38, %v1196_v38  ;;  %v1102_v25 = vadd.f32 %v1625_v4, %v1005_v19 }
 0x15c   :  { %v1627_v22 = vpop.f32.mrf.mxu0 }
 0x15d   :  { %1287 = vst.msk [vmem:[%s2437_s3 + $0x30] sm:$0xf] %vm1274_vm0, %v1436_v23  ;;  %v1628_v41 = vadd.f32 %v1627_v22, %v1626_v3  ;;  %v1199_v35 = vadd.f32 %v1198_v5, %v1102_v25 }
 0x15e   :  { %v1629_v7 = vpop.f32.mrf.mxu0 }
 0x15f   :  { %v1107_v26 = vadd.f32 %v1628_v41, %v1010_v42  ;;  %v1437_v28 = vpack.c.bf16 %v1199_v35, %v1199_v35 }
 0x160   :  { %v1630_v9 = vpop.f32.mrf.mxu0 }
 0x161   :  { %v1204_v29 = vadd.f32 %v1678_v8, %v1107_v26  ;;  %1288 = vst.msk [vmem:[%s2437_s3 + $0x34] sm:$0xf] %vm1274_vm0, %v1437_v28  ;;  %v1631_v44 = vadd.f32 %v1630_v9, %v1629_v7 }
 0x163   :  { %v1438_v39 = vpack.c.bf16 %v1204_v29, %v1204_v29  ;;  %v1110_v6 = vadd.f32 %v1631_v44, %v1013_v27 }
 0x165   :  { %1289 = vst.msk [vmem:[%s2437_s3 + $0x38] sm:$0xf] %vm1274_vm0, %v1438_v39  ;;  %v1207_v40 = vadd.f32 %v1679_v50, %v1110_v6 }
 0x167   :  { %v1439_v46 = vpack.c.bf16 %v1207_v40, %v1207_v40 }
 0x169   :  { %1290 = vst.msk [vmem:[%s2437_s3 + $0x3c] sm:$0xf] %vm1274_vm0, %v1439_v46 }

// kernel: tudui_forward.13
= control target key start
LH: loop header
LB: loop body
LE: loop exit
PB: predicated region body
PF: predicated region fallthrough
CT: control target
= control target key end

     0   :  { %vm1099_vm0 = vmmov 0   ;;  %vm792_vm1 = vcmask 523264   ;;  %vm837_vm2 = vcmask 80896   ;;  %s1370_s1 = inlined_call_operand.vmem [shape: bf16[1024,64], index: 1, kind: input, shape index: {}]   ;;  %s1371_s0 = inlined_call_operand.vmem [shape: bf16[16,1024], index: 0, kind: input, shape index: {}]   ;;  %s1372_s3 = inlined_call_operand.vmem [shape: bf16[64,10], index: 3, kind: input, shape index: {}]   ;;  %s1373_s2 = inlined_call_operand.vmem [shape: f32[1,64], index: 2, kind: input, shape index: {}]   ;;  %s1374_s4 = inlined_call_operand.vmem [shape: f32[1,10], index: 4, kind: input, shape index: {}]   ;;  %s1375_s5 = inlined_call_operand.vmem [shape: f32[16,10], index: 5, kind: output, shape index: {}]  }
   0x1   :  { %v1030_v0 = vld [vmem:[%s1370_s1 + $0x78] sm:$0xff]   ;;  %v1034_v4 = vld [vmem:[%s1370_s1 + $0x70] sm:$0xff]   ;;  %v1038_v8 = vld [vmem:[%s1370_s1 + $0x68] sm:$0xff]  }
   0x2   :  { %v1031_v1 = vld [vmem:[%s1370_s1 + $0xf8] sm:$0xff]   ;;  %923 = vmatprep.subr.bf16.mxu0 %v1030_v0  ;;  %v1035_v5 = vld [vmem:[%s1370_s1 + $0xf0] sm:$0xff]   ;;  %v1039_v9 = vld [vmem:[%s1370_s1 + $0xe8] sm:$0xff]  }
   0x3   :  { %v1032_v2 = vld [vmem:[%s1370_s1 + $0x38] sm:$0xff]   ;;  %945 = vmatprep.subr.bf16.mxu1 %v1031_v1  ;;  %v1036_v6 = vld [vmem:[%s1370_s1 + $0x30] sm:$0xff]   ;;  %v1040_v10 = vld [vmem:[%s1370_s1 + $0x28] sm:$0xff]  }
   0x4   :  { %v1033_v3 = vld [vmem:[%s1370_s1 + $0xb8] sm:$0xff]   ;;  %924 = vmatpush3.bf16.msra.mxu0 %v1032_v2  ;;  %v1037_v7 = vld [vmem:[%s1370_s1 + $0xb0] sm:$0xff]   ;;  %v1041_v11 = vld [vmem:[%s1370_s1 + $0xa8] sm:$0xff]  }
   0x5   :  { %946 = vmatpush3.bf16.msra.mxu1 %v1033_v3  ;;  %925 = vmatprep.subr.bf16.mxu0 %v1034_v4  ;;  %v1042_v12 = vld [vmem:[%s1370_s1 + $0x60] sm:$0xff]   ;;  %v1046_v16 = vld [vmem:[%s1370_s1 + $0x58] sm:$0xff]   ;;  %v1050_v20 = vld [vmem:[%s1370_s1 + $0x50] sm:$0xff]  }
   0x6   :  { %947 = vmatprep.subr.bf16.mxu1 %v1035_v5  ;;  %v1043_v13 = vld [vmem:[%s1370_s1 + $0xe0] sm:$0xff]   ;;  %v1047_v17 = vld [vmem:[%s1370_s1 + $0xd8] sm:$0xff]   ;;  %v1051_v21 = vld [vmem:[%s1370_s1 + $0xd0] sm:$0xff]  }
   0x7   :  { %v1044_v14 = vld [vmem:[%s1370_s1 + $0x20] sm:$0xff]   ;;  %v1048_v18 = vld [vmem:[%s1370_s1 + $0x18] sm:$0xff]   ;;  %v1052_v22 = vld [vmem:[%s1370_s1 + $0x10] sm:$0xff]  }
   0x8   :  { %926 = vmatpush3.bf16.msra.mxu0 %v1036_v6  ;;  %v1045_v15 = vld [vmem:[%s1370_s1 + $0xa0] sm:$0xff]   ;;  %v1049_v19 = vld [vmem:[%s1370_s1 + $0x98] sm:$0xff]   ;;  %v1053_v23 = vld [vmem:[%s1370_s1 + $0x90] sm:$0xff]  }
   0x9   :  { %948 = vmatpush3.bf16.msra.mxu1 %v1037_v7  ;;  %927 = vmatprep.subr.bf16.mxu0 %v1038_v8  ;;  %v1054_v24 = vld [vmem:[%s1370_s1 + $0x48] sm:$0xff]   ;;  %v1058_v28 = vld [vmem:[%s1370_s1 + $0x40] sm:$0xff]   ;;  %v1062_v40 = vld [vmem:[%s1370_s1 + $0x178] sm:$0xff]  }
   0xa   :  { %949 = vmatprep.subr.bf16.mxu1 %v1039_v9  ;;  %v1055_v25 = vld [vmem:[%s1370_s1 + $0xc8] sm:$0xff]   ;;  %v1059_v29 = vld [vmem:[%s1370_s1 + $0xc0] sm:$0xff]   ;;  %v1063_v41 = vld [vmem:[%s1370_s1 + $0x1f8] sm:$0xff]  }
   0xb   :  { %v1056_v26 = vld [vmem:[%s1370_s1 + $0x8] sm:$0xff]   ;;  %v1060_v30 = vld [vmem:[%s1370_s1] sm:$0xff]   ;;  %v1064_v42 = vld [vmem:[%s1370_s1 + $0x138] sm:$0xff]  }
   0xc   :  { %928 = vmatpush3.bf16.msra.mxu0 %v1040_v10  ;;  %v1057_v27 = vld [vmem:[%s1370_s1 + $0x88] sm:$0xff]   ;;  %v1061_v31 = vld [vmem:[%s1370_s1 + $0x80] sm:$0xff]   ;;  %v1065_v43 = vld [vmem:[%s1370_s1 + $0x1b8] sm:$0xff]  }
   0xd   :  { %950 = vmatpush3.bf16.msra.mxu1 %v1041_v11  ;;  %929 = vmatprep.subr.bf16.mxu0 %v1042_v12  ;;  %v21_v32 = vld [vmem:[%s1371_s0] sm:$0xff]  ;;  %v22_v34 = vld [vmem:[%s1371_s0 + $0x8] sm:$0xff]  ;;  %v1066_v44 = vld [vmem:[%s1370_s1 + $0x170] sm:$0xff]  }
   0xe   :  { %951 = vmatprep.subr.bf16.mxu1 %v1043_v13  ;;  %v25_v33 = vld [vmem:[%s1371_s0 + $0x20] sm:$0xff]  ;;  %v26_v37 = vld [vmem:[%s1371_s0 + $0x28] sm:$0xff]  ;;  %v1067_v45 = vld [vmem:[%s1370_s1 + $0x1f0] sm:$0xff]  }
   0xf   :  { %v845_v35 = vcombine.low %v21_v32, %v25_v33  ;;  %v846_v36 = vcombine.high %v21_v32, %v25_v33  ;;  %v847_v38 = vcombine.low %v22_v34, %v26_v37  ;;  %v848_v39 = vcombine.high %v22_v34, %v26_v37  ;;  %v1068_v46 = vld [vmem:[%s1370_s1 + $0x130] sm:$0xff]   ;;  %v1070_v48 = vld [vmem:[%s1370_s1 + $0x168] sm:$0xff]   ;;  %v1074_v52 = vld [vmem:[%s1370_s1 + $0x160] sm:$0xff]  }
  0x10   :  { %930 = vmatpush3.bf16.msra.mxu0 %v1044_v14  ;;  %v1069_v47 = vld [vmem:[%s1370_s1 + $0x1b0] sm:$0xff]   ;;  %v1071_v49 = vld [vmem:[%s1370_s1 + $0x1e8] sm:$0xff]   ;;  %v1075_v53 = vld [vmem:[%s1370_s1 + $0x1e0] sm:$0xff]  }
  0x11   :  { %952 = vmatpush3.bf16.msra.mxu1 %v1045_v15  ;;  %931 = vmatprep.subr.bf16.mxu0 %v1046_v16  ;;  %v1072_v50 = vld [vmem:[%s1370_s1 + $0x128] sm:$0xff]   ;;  %v1076_v54 = vld [vmem:[%s1370_s1 + $0x120] sm:$0xff]   ;;  %v1078_v56 = vld [vmem:[%s1370_s1 + $0x158] sm:$0xff]   ;;  %v1098_v16 = vmov 0.0  }
  0x12   :  { %953 = vmatprep.subr.bf16.mxu1 %v1047_v17  ;;  %620 = vmatprep.mubr.bf16.mxu0 %v846_v36  ;;  %v1073_v51 = vld [vmem:[%s1370_s1 + $0x1a8] sm:$0xff]   ;;  %v1077_v55 = vld [vmem:[%s1370_s1 + $0x1a0] sm:$0xff]   ;;  %v1079_v57 = vld [vmem:[%s1370_s1 + $0x1d8] sm:$0xff]  }
  0x13   :  { %661 = vmatprep.mubr.bf16.mxu1 %v848_v39  ;;  %v1080_v58 = vld [vmem:[%s1370_s1 + $0x118] sm:$0xff]   ;;  %v1082_v60 = vld [vmem:[%s1370_s1 + $0x150] sm:$0xff]   ;;  %v1086_v0 = vld [vmem:[%s1370_s1 + $0x148] sm:$0xff]  }
  0x14   :  { %932 = vmatpush3.bf16.msra.mxu0 %v1048_v18  ;;  %v1081_v59 = vld [vmem:[%s1370_s1 + $0x198] sm:$0xff]   ;;  %v1083_v61 = vld [vmem:[%s1370_s1 + $0x1d0] sm:$0xff]   ;;  %v1087_v1 = vld [vmem:[%s1370_s1 + $0x1c8] sm:$0xff]  }
  0x15   :  { %954 = vmatpush3.bf16.msra.mxu1 %v1049_v19  ;;  %933 = vmatprep.subr.bf16.mxu0 %v1050_v20  ;;  %v1084_v62 = vld [vmem:[%s1370_s1 + $0x110] sm:$0xff]   ;;  %v1088_v2 = vld [vmem:[%s1370_s1 + $0x108] sm:$0xff]   ;;  %v1090_v4 = vld [vmem:[%s1370_s1 + $0x140] sm:$0xff]  }
  0x16   :  { %955 = vmatprep.subr.bf16.mxu1 %v1051_v21  ;;  %v1085_v63 = vld [vmem:[%s1370_s1 + $0x190] sm:$0xff]   ;;  %v1089_v3 = vld [vmem:[%s1370_s1 + $0x188] sm:$0xff]   ;;  %v1091_v5 = vld [vmem:[%s1370_s1 + $0x1c0] sm:$0xff]  }
  0x17   :  { %v1092_v6 = vld [vmem:[%s1370_s1 + $0x100] sm:$0xff]   ;;  %v23_v8 = vld [vmem:[%s1371_s0 + $0x10] sm:$0xff]  ;;  %v24_v12 = vld [vmem:[%s1371_s0 + $0x18] sm:$0xff] }
  0x18   :  { %934 = vmatpush3.bf16.msra.mxu0 %v1052_v22  ;;  %v1093_v7 = vld [vmem:[%s1370_s1 + $0x180] sm:$0xff]   ;;  %v27_v9 = vld [vmem:[%s1371_s0 + $0x30] sm:$0xff]  ;;  %v28_v13 = vld [vmem:[%s1371_s0 + $0x38] sm:$0xff] }
  0x19   :  { %956 = vmatpush3.bf16.msra.mxu1 %v1053_v23  ;;  %935 = vmatprep.subr.bf16.mxu0 %v1054_v24  ;;  %v849_v10 = vcombine.low %v23_v8, %v27_v9  ;;  %v850_v11 = vcombine.high %v23_v8, %v27_v9  ;;  %v851_v14 = vcombine.low %v24_v12, %v28_v13  ;;  %v1094_v17 = vld [vmem:[%s1372_s3 + $0x18] sm:$0xff]   ;;  %v1095_v18 = vld [vmem:[%s1372_s3 + $0x10] sm:$0xff]   ;;  %v1096_v19 = vld [vmem:[%s1372_s3 + $0x8] sm:$0xff]  }
  0x1a   :  { %957 = vmatprep.subr.bf16.mxu1 %v1055_v25  ;;  %v852_v15 = vcombine.high %v24_v12, %v28_v13  ;;  %v1097_v20 = vld [vmem:[%s1372_s3] sm:$0xff]  }
  0x1c   :  { %936 = vmatpush3.bf16.msra.mxu0 %v1056_v26 }
  0x1d   :  { %958 = vmatpush3.bf16.msra.mxu1 %v1057_v27  ;;  %937 = vmatprep.subr.bf16.mxu0 %v1058_v28 }
  0x1e   :  { %959 = vmatprep.subr.bf16.mxu1 %v1059_v29  ;;  %v844_v29 = vld [vmem:[%s1373_s2] ss:$0 sm:$0xff] }
  0x20   :  { %938 = vmatpush3.bf16.msra.mxu0 %v1060_v30 }
  0x21   :  { %960 = vmatpush3.bf16.msra.mxu1 %v1061_v31  ;;  %967 = vmatprep.subr.bf16.mxu0 %v1062_v40 }
  0x22   :  { %989 = vmatprep.subr.bf16.mxu1 %v1063_v41 }
  0x23   :  { %621 = vmatmul.mubr.bf16.vlgmr.msra.gmra.mxu0 %v845_v35 }
  0x24   :  { %662 = vmatmul.mubr.bf16.vlgmr.msra.gmra.mxu1 %v847_v38  ;;  %968 = vmatpush3.bf16.msra.mxu0 %v1064_v42 }
  0x25   :  { %990 = vmatpush3.bf16.msra.mxu1 %v1065_v43  ;;  %969 = vmatprep.subr.bf16.mxu0 %v1066_v44 }
  0x26   :  { %991 = vmatprep.subr.bf16.mxu1 %v1067_v45  ;;  %702 = vmatprep.mubr.bf16.mxu0 %v850_v11 }
  0x27   :  { %743 = vmatprep.mubr.bf16.mxu1 %v852_v15 }
  0x28   :  { %970 = vmatpush3.bf16.msra.mxu0 %v1068_v46 }
  0x29   :  { %992 = vmatpush3.bf16.msra.mxu1 %v1069_v47  ;;  %971 = vmatprep.subr.bf16.mxu0 %v1070_v48 }
  0x2a   :  { %993 = vmatprep.subr.bf16.mxu1 %v1071_v49 }
  0x2c   :  { %972 = vmatpush3.bf16.msra.mxu0 %v1072_v50 }
  0x2d   :  { %994 = vmatpush3.bf16.msra.mxu1 %v1073_v51  ;;  %973 = vmatprep.subr.bf16.mxu0 %v1074_v52 }
  0x2e   :  { %995 = vmatprep.subr.bf16.mxu1 %v1075_v53 }
  0x30   :  { %974 = vmatpush3.bf16.msra.mxu0 %v1076_v54 }
  0x31   :  { %996 = vmatpush3.bf16.msra.mxu1 %v1077_v55  ;;  %975 = vmatprep.subr.bf16.mxu0 %v1078_v56  ;;  %v917_v55 = vld [vmem:[%s1374_s4] ss:$0 sm:$0xff] }
  0x32   :  { %997 = vmatprep.subr.bf16.mxu1 %v1079_v57 }
  0x34   :  { %976 = vmatpush3.bf16.msra.mxu0 %v1080_v58 }
  0x35   :  { %998 = vmatpush3.bf16.msra.mxu1 %v1081_v59  ;;  %977 = vmatprep.subr.bf16.mxu0 %v1082_v60 }
  0x36   :  { %999 = vmatprep.subr.bf16.mxu1 %v1083_v61 }
  0x38   :  { %978 = vmatpush3.bf16.msra.mxu0 %v1084_v62 }
  0x39   :  { %1000 = vmatpush3.bf16.msra.mxu1 %v1085_v63  ;;  %979 = vmatprep.subr.bf16.mxu0 %v1086_v0 }
  0x3a   :  { %1001 = vmatprep.subr.bf16.mxu1 %v1087_v1 }
  0x3c   :  { %980 = vmatpush3.bf16.msra.mxu0 %v1088_v2 }
  0x3d   :  { %1002 = vmatpush3.bf16.msra.mxu1 %v1089_v3  ;;  %981 = vmatprep.subr.bf16.mxu0 %v1090_v4 }
  0x3e   :  { %1003 = vmatprep.subr.bf16.mxu1 %v1091_v5 }
  0x40   :  { %982 = vmatpush3.bf16.msra.mxu0 %v1092_v6 }
  0x41   :  { %1004 = vmatpush3.bf16.msra.mxu1 %v1093_v7  ;;  %1016 = vmatprep.subr.bf16.mxu0 %v1098_v16 }
  0x43   :  { %703 = vmatmul.mubr.bf16.vlgmr.msra.gmra.mxu0 %v849_v10 }
  0x44   :  { %744 = vmatmul.mubr.bf16.vlgmr.msra.gmra.mxu1 %v851_v14  ;;  %1017 = vmatpush3.bf16.msra.mxu0 %v1094_v17 }
  0x45   :  { %1018 = vmatprep.subr.bf16.mxu0 %v1098_v16  ;;  %1024 = vmatprep.mubr.msk.bf16.mxu0 %vm1099_vm0, %v1098_v16 }
  0x48   :  { %1019 = vmatpush3.bf16.msra.mxu0 %v1095_v18 }
  0x49   :  { %1020 = vmatprep.subr.bf16.mxu0 %v1098_v16 }
  0x4c   :  { %1021 = vmatpush3.bf16.msra.mxu0 %v1096_v19 }
  0x4d   :  { %1022 = vmatprep.subr.bf16.mxu0 %v1098_v16 }
  0x50   :  { %1023 = vmatpush3.bf16.msra.mxu0 %v1097_v20 }
  0xe3   :  { %v939_v21 = vpop.f32.mrf.mxu0 }
  0xe4   :  { %v961_v22 = vpop.f32.mrf.mxu1 }
  0xe5   :  { %v940_v23 = vpop.f32.mrf.mxu0 }
  0xe6   :  { %v962_v24 = vpop.f32.mrf.mxu1  ;;  %v941_v28 = vadd.f32 %v940_v23, %v939_v21 }
  0xe7   :  { %v942_v25 = vpop.f32.mrf.mxu0  ;;  %v963_v34 = vadd.f32 %v962_v24, %v961_v22 }
  0xe8   :  { %v964_v26 = vpop.f32.mrf.mxu1  ;;  %v623_v33 = vadd.f32 %v941_v28, %v844_v29 }
  0xe9   :  { %v943_v27 = vpop.f32.mrf.mxu0 }
  0xea   :  { %v944_v30 = vadd.f32 %v943_v27, %v942_v25  ;;  %v965_v31 = vpop.f32.mrf.mxu1  ;;  %v664_v41 = vadd.f32 %v963_v34, %v623_v33 }
  0xeb   :  { %v966_v42 = vadd.f32 %v965_v31, %v964_v26 }
  0xec   :  { %v626_v37 = vadd.f32 %v944_v30, %v844_v29 }
  0xee   :  { %v667_v45 = vadd.f32 %v966_v42, %v626_v37 }
 0x103   :  { %v983_v32 = vpop.f32.mrf.mxu0 }
 0x104   :  { %v1005_v35 = vpop.f32.mrf.mxu1 }
 0x105   :  { %v984_v36 = vpop.f32.mrf.mxu0 }
 0x106   :  { %v985_v38 = vadd.f32 %v984_v36, %v983_v32  ;;  %v1006_v39 = vpop.f32.mrf.mxu1 }
 0x107   :  { %v986_v40 = vpop.f32.mrf.mxu0  ;;  %v1007_v49 = vadd.f32 %v1006_v39, %v1005_v35 }
 0x108   :  { %v1008_v43 = vpop.f32.mrf.mxu1  ;;  %v705_v46 = vadd.f32 %v985_v38, %v664_v41 }
 0x109   :  { %v987_v44 = vpop.f32.mrf.mxu0 }
 0x10a   :  { %v988_v47 = vadd.f32 %v987_v44, %v986_v40  ;;  %v1009_v48 = vpop.f32.mrf.mxu1  ;;  %v746_v52 = vadd.f32 %v1007_v49, %v705_v46 }
 0x10b   :  { %v1010_v51 = vadd.f32 %v1009_v48, %v1008_v43 }
 0x10c   :  { %v708_v50 = vadd.f32 %v988_v47, %v667_v45 }
 0x10e   :  { %v749_v53 = vadd.f32 %v1010_v51, %v708_v50 }
 0x110   :  { %v752_v54 = vpack.c.bf16 %v749_v53, %v746_v52 }
 0x112   :  { %1025 = vmatmul.mubr.msk.bf16.vlgmr.msra.gmra.mxu0 %vm792_vm1, %v752_v54 }
 0x1d2   :  { %v830_v56 = vpop.f32.mrf.mxu0 }
 0x1d3   :  { %v831_v57 = vadd.f32 %v917_v55, %v830_v56 }
 0x1d4   :  { %v1026_v58 = vpop.f32.mrf.mxu0 }
 0x1d5   :  { %838 = vst.msk [vmem:[%s1375_s5] sm:$0xff] %vm837_vm2, %v831_v57 }
 0x1d6   :  { %v833_v59 = vpop.f32.mrf.mxu0 }
 0x1d7   :  { %v834_v60 = vadd.f32 %v917_v55, %v833_v59 }
 0x1d8   :  { %v1027_v61 = vpop.f32.mrf.mxu0 }
 0x1d9   :  { %839 = vst.msk [vmem:[%s1375_s5 + $0x8] sm:$0xff] %vm837_vm2, %v834_v60 }

</bundles_post_ra>
